<compile_context>
chip_gen: v7x
topology: tpu7x:2x2x1
jax: 0.10.0
libtpu: 0.0.40
codegen_flags: <defaults>
</compile_context>

<pallas_src>
import numpy as np
import jax
import jax.numpy as jnp
from jax.experimental import pallas as pl
from jax.experimental.pallas import tpu as pltpu


# ------------------------------ model configuration ---------------------------

GROWTH_RATE = 4
NUM_INIT_FEATURES = 8
ENCODER_BLOCK_CONFIG = (2,)
BOTTLENECK_LAYERS = 2
COMPRESSION_RATIO = 1.0   # forward requires 1.0 to be shape-consistent (see header)
BN_EPS = 1e-5


def _round_up(x, m):
    return (x + m - 1) // m * m


def model_layout():
    g, c_init = GROWTH_RATE, NUM_INIT_FEATURES
    b1_cins = tuple(c_init + i * g for i in range(ENCODER_BLOCK_CONFIG[0]))
    c1 = c_init + ENCODER_BLOCK_CONFIG[0] * g
    c_skip = int(c1 * COMPRESSION_RATIO)
    assert c_skip == c1, "DenseNet.forward is only shape-consistent for compression_ratio=1.0"
    bn_cins = tuple(c1 + i * g for i in range(BOTTLENECK_LAYERS))
    c_bot = c1 + BOTTLENECK_LAYERS * g
    dense_cins = b1_cins + bn_cins
    cmax = max((3, c1) + dense_cins)
    # packed weight-slab row offsets (sublane-aligned block starts)
    rows = {"conv0": 0}
    r = 9 * c_init
    dense_rows = []
    for _ in dense_cins:
        dense_rows.append(r)
        r += _round_up(9 * g, 8)
    rows["dense"] = tuple(dense_rows)
    rows["ts"] = r
    r += _round_up(c_skip, 8)
    rows["total"] = r
    n_vec_cols = 2 + 2 * len(dense_cins)       # [b0, (scale, shift) x layer, b_ts]
    return dict(g=g, c_init=c_init, b1_cins=b1_cins, bn_cins=bn_cins, c1=c1,
                c_skip=c_skip, c_bot=c_bot, cmax=cmax, rows=rows,
                n_vec_cols=n_vec_cols)


LAYOUT = model_layout()


# ------------------------------ fused Pallas kernel ----------------------------

def make_fused_kernel(N, H1, W1, L):
    H2, W2 = H1 // 2, W1 // 2
    M1, M2 = N * H1 * W1, N * H2 * W2
    g, c_init, c1, c_skip = L["g"], L["c_init"], L["c1"], L["c_skip"]
    rows = L["rows"]
    n_dense = len(L["b1_cins"]) + len(L["bn_cins"])
    bts_col = 1 + 2 * n_dense                  # last column of the vector slab

    def shifted(y, off, M):
        # value whose lane p equals y[:, p + off]; out-of-range lanes are zero
        # (they are always killed by the tap mask anyway).
        if off == 0:
            return y
        z = jnp.zeros((y.shape[0], abs(off)), y.dtype)
        if off > 0:
            return jnp.concatenate([y[:, off:], z], axis=1)
        return jnp.concatenate([z, y[:, :M + off]], axis=1)

    def conv3x3(w_ref, m_ref, a, row0, cin, cout, W_img, M):
        # One MXU matmul per layer:  y[t*cout + o, p] = sum_i W[o, i, kh, kw] * a[i, p]
        # with t = kh*3 + kw; then combine the 9 tap rows with static lane shifts
        # and the precomputed zero-padding masks.
        w = w_ref[row0:row0 + 9 * cout, :cin]                       # (9*cout, cin)
        y = jnp.dot(w, a, preferred_element_type=jnp.float32)       # (9*cout, M)
        out = y[4 * cout:5 * cout]                                  # centre tap (no shift/mask)
        for t in range(9):
            if t == 4:
                continue
            kh, kw = divmod(t, 3)
            off = (kh - 1) * W_img + (kw - 1)
            out = out + m_ref[t:t + 1, :] * shifted(y[t * cout:(t + 1) * cout], off, M)
        return out

    def kernel(x_ref, w_ref, v_ref, p_ref, m1_ref, m2_ref, enc_ref, bot_ref, feat1):
        # ---- encoder.conv0 (3x3, bias) + relu0 --------------------------------
        y0 = conv3x3(w_ref, m1_ref, x_ref[...], rows["conv0"], 3, c_init, W1, M1)
        feat1[:c_init, :] = jnp.maximum(y0 + v_ref[:c_init, 0:1], 0.0)

        def dense_layer(feat, m_ref, W_img, M, cin, lidx):
            # _DenseLayer: BN (eval, folded scale/shift) -> ReLU -> conv3x3 (no bias).
            # The new growth_rate channels are appended as sublane rows of the
            # resident feature buffer (torch.cat folded into VMEM).
            scale = v_ref[:cin, 1 + 2 * lidx:2 + 2 * lidx]          # (cin, 1)
            shift = v_ref[:cin, 2 + 2 * lidx:3 + 2 * lidx]
            a = jnp.maximum(feat[:cin, :] * scale + shift, 0.0)
            y = conv3x3(w_ref, m_ref, a, rows["dense"][lidx], cin, g, W_img, M)
            feat[cin:cin + g, :] = y

        # ---- encoder.denseblock1 ----------------------------------------------
        for i, cin in enumerate(L["b1_cins"]):
            dense_layer(feat1, m1_ref, W1, M1, cin, i)

        # ---- encoder.transition1 (1x1 conv + AvgPool2d(2,2)) + encoder.skip1 ---
        # Pool FIRST via the constant pooling matrix (one MXU matmul), then apply
        # the single folded 1x1 conv  W = skip_w @ trans_w, b = skip_w@trans_b + skip_b.
        # Exact: pooling and 1x1 convs are all affine and commute.
        pooled = jnp.dot(feat1[:c1, :], p_ref[...],
                         preferred_element_type=jnp.float32)        # (c1, M2)
        wts = w_ref[rows["ts"]:rows["ts"] + c_skip, :c1]            # (c_skip, c1)
        s_out = jnp.dot(wts, pooled, preferred_element_type=jnp.float32) \
                + v_ref[:c_skip, bts_col:bts_col + 1]
        enc_ref[...] = s_out
        bot_ref[:c_skip, :] = s_out

        # ---- bottleneck dense block (dropout p=0.2 is identity in eval) --------
        n_b1 = len(L["b1_cins"])
        for i, cin in enumerate(L["bn_cins"]):
            dense_layer(bot_ref, m2_ref, W2, M2, cin, n_b1 + i)

    return kernel


# ------------------------------ pallas_call wrapper ----------------------------

def fused_densenet(x_cm, w_slab, vec_slab, pool_mat, mask1, mask2, N, H1, W1, L):
    H2, W2 = H1 // 2, W1 // 2
    M2 = N * H2 * W2
    kernel = make_fused_kernel(N, H1, W1, L)

    inputs = (x_cm, w_slab, vec_slab, pool_mat, mask1, mask2)
    in_specs = [pl.BlockSpec(tuple(a.shape), lambda i: (0, 0)) for a in inputs]
    out_shape = (jax.ShapeDtypeStruct((L["c_skip"], M2), jnp.float32),
                 jax.ShapeDtypeStruct((L["c_bot"], M2), jnp.float32))
    out_specs = [pl.BlockSpec((L["c_skip"], M2), lambda i: (0, 0)),
                 pl.BlockSpec((L["c_bot"], M2), lambda i: (0, 0))]
    scratch_shapes = [pltpu.VMEM((L["c1"], N * H1 * W1), jnp.float32)]   # feat1

    # VMEM footprint here is < 1 MiB; no vmem_limit override needed.
    # TODO(synk): for real segmentation resolutions, tile the flat M axis into
    # row-bands (halo overlap) and raise vmem_limit_bytes, especially on v7x.
    return pl.pallas_call(
        kernel,
        out_shape=out_shape,
        grid_spec=pltpu.PrefetchScalarGridSpec(
            num_scalar_prefetch=0,
            grid=(1,),                       # whole batch in one step (single-TC friendly)
            in_specs=in_specs,
            out_specs=out_specs,
            scratch_shapes=scratch_shapes,
        ),
        compiler_params=pltpu.CompilerParams(dimension_semantics=("arbitrary",)),
    )(*inputs)


# ------------------------------ static constants (pool / masks) ----------------

def build_tap_masks(N, H, W):
    # mask[t, p] = 1 iff the 3x3 tap t = kh*3+kw reads an in-bounds pixel for
    # output pixel p (zero padding of the conv, and inter-image isolation).
    p = np.arange(N * H * W)
    h = (p // W) % H
    w = p % W
    m = np.zeros((9, N * H * W), np.float32)
    for t in range(9):
        kh, kw = divmod(t, 3)
        hh, ww = h + kh - 1, w + kw - 1
        m[t] = ((hh >= 0) & (hh < H) & (ww >= 0) & (ww < W)).astype(np.float32)
    return jnp.asarray(m)


def build_pool_matrix(N, H, W):
    # P[p1, p2] = 0.25 iff full-res pixel p1 belongs to the 2x2 block of pooled
    # pixel p2 (same image).  AvgPool2d(2,2) == act @ P.
    H2, W2 = H // 2, W // 2
    p = np.arange(N * H * W)
    n, h, w = p // (H * W), (p // W) % H, p % W
    q = n * (H2 * W2) + (h // 2) * W2 + (w // 2)
    P = np.zeros((N * H * W, N * H2 * W2), np.float32)
    P[p, q] = 0.25
    return jnp.asarray(P)


# ------------------------------ parameter packing ------------------------------

def bn_fold(gamma, beta, mean, var, eps=BN_EPS):
    scale = gamma / jnp.sqrt(var + eps)
    return scale, beta - mean * scale


def _conv3x3_tap_rows(w_oihw):
    # OIHW (Cout, Cin, 3, 3) -> (9*Cout, Cin); row t*Cout + o holds W[o, :, kh, kw]
    # with t = kh*3 + kw (matches the kernel's per-tap row slices).
    cout, cin = w_oihw.shape[0], w_oihw.shape[1]
    return jnp.transpose(w_oihw, (2, 3, 0, 1)).reshape(9 * cout, cin)


def pack_params(params, L):
    rows, cmax = L["rows"], L["cmax"]
    dense_layers = list(params["enc_block1"]) + list(params["bottleneck"])
    n_cols = L["n_vec_cols"]

    w_slab = np.zeros((rows["total"], cmax), np.float32)
    vec_slab = np.zeros((cmax, n_cols), np.float32)

    # encoder.conv0
    w0 = np.asarray(_conv3x3_tap_rows(params["conv0_w"]))
    w_slab[rows["conv0"]:rows["conv0"] + w0.shape[0], :w0.shape[1]] = w0
    vec_slab[:L["c_init"], 0] = np.asarray(params["conv0_b"])

    # dense layers (encoder denseblock1 then bottleneck), eval-mode BN folded
    for l, layer in enumerate(dense_layers):
        scale, shift = bn_fold(layer["gamma"], layer["beta"], layer["mean"], layer["var"])
        cin = int(scale.shape[0])
        vec_slab[:cin, 1 + 2 * l] = np.asarray(scale)
        vec_slab[:cin, 2 + 2 * l] = np.asarray(shift)
        wl = np.asarray(_conv3x3_tap_rows(layer["w"]))
        r0 = rows["dense"][l]
        w_slab[r0:r0 + wl.shape[0], :cin] = wl

    # transition1 + skip1 folded into one 1x1 conv (exact: both affine)
    wt = np.asarray(params["trans1_w"])[:, :, 0, 0]          # (c1, c1)
    bt = np.asarray(params["trans1_b"])
    ws = np.asarray(params["skip1_w"])[:, :, 0, 0]           # (c_skip, c1)
    bs = np.asarray(params["skip1_b"])
    w_slab[rows["ts"]:rows["ts"] + L["c_skip"], :L["c1"]] = ws @ wt
    vec_slab[:L["c_skip"], n_cols - 1] = ws @ bt + bs

    return jnp.asarray(w_slab), jnp.asarray(vec_slab)


# ------------------------------ model glue (plain JAX) -------------------------

def densenet_forward(x_nchw, w_slab, vec_slab):
    L = LAYOUT
    N, C, H1, W1 = x_nchw.shape
    H2, W2 = H1 // 2, W1 // 2
    # NCHW -> channels-major flat (C, N*H*W) with batch*spatial on the lane axis
    x_cm = jnp.transpose(x_nchw, (1, 0, 2, 3)).reshape(C, N * H1 * W1).astype(jnp.float32)
    pool_mat = build_pool_matrix(N, H1, W1)
    mask1 = build_tap_masks(N, H1, W1)
    mask2 = build_tap_masks(N, H2, W2)
    enc_flat, bot_flat = fused_densenet(x_cm, w_slab, vec_slab, pool_mat,
                                        mask1, mask2, N, H1, W1, L)
    enc = jnp.transpose(enc_flat.reshape(L["c_skip"], N, H2, W2), (1, 0, 2, 3))
    bot = jnp.transpose(bot_flat.reshape(L["c_bot"], N, H2, W2), (1, 0, 2, 3))
    # TODO(synk): self.decoder is an nn.ModuleList; calling it (as DenseNet.forward
    # does) raises NotImplementedError in PyTorch and its _TransitionUp layers need
    # (x, skip) pairs, so decoder_features cannot be produced.
    return enc, bot


def init_params(key):
    keys = iter(jax.random.split(key, 64))
    nk = lambda: next(keys)
    p = {}

    # encoder.conv0 : Conv2d(3, num_init_features, 3, padding=1, bias=True)
    p["conv0_w"] = 0.1 * jax.random.normal(nk(), (NUM_INIT_FEATURES, 3, 3, 3), jnp.float32)
    p["conv0_b"] = 0.1 * jax.random.normal(nk(), (NUM_INIT_FEATURES,), jnp.float32)

    def make_dense_layers(num_layers, c, growth):
        layers = []
        for _ in range(num_layers):
            layers.append({
                "gamma": 1.0 + 0.1 * jax.random.normal(nk(), (c,), jnp.float32),
                "beta": 0.1 * jax.random.normal(nk(), (c,), jnp.float32),
                "mean": 0.1 * jax.random.normal(nk(), (c,), jnp.float32),
                "var": 1.0 + 0.1 * jax.random.uniform(nk(), (c,), jnp.float32),
                "w": 0.1 * jax.random.normal(nk(), (growth, c, 3, 3), jnp.float32),
            })
            c += growth
        return layers, c

    p["enc_block1"], nf = make_dense_layers(ENCODER_BLOCK_CONFIG[0],
                                            NUM_INIT_FEATURES, GROWTH_RATE)
    p["trans1_w"] = 0.1 * jax.random.normal(nk(), (nf, nf, 1, 1), jnp.float32)
    p["trans1_b"] = 0.1 * jax.random.normal(nk(), (nf,), jnp.float32)
    skip_out = int(nf * COMPRESSION_RATIO)
    p["skip1_w"] = 0.1 * jax.random.normal(nk(), (skip_out, nf, 1, 1), jnp.float32)
    p["skip1_b"] = 0.1 * jax.random.normal(nk(), (skip_out,), jnp.float32)
    p["bottleneck"], _ = make_dense_layers(BOTTLENECK_LAYERS, nf, GROWTH_RATE)
    return p


# ------------------------------ plain-JAX reference (correctness check) --------

def reference_forward(x, params, eps=BN_EPS):
    dn = ("NCHW", "OIHW", "NCHW")
    hp = jax.lax.Precision.HIGHEST

    def conv(x, w, pad):
        return jax.lax.conv_general_dilated(x, w, (1, 1), ((pad, pad), (pad, pad)),
                                            dimension_numbers=dn, precision=hp)

    def cvec(v):
        return v.reshape(1, -1, 1, 1)

    def dense_block(x, layers):
        for l in layers:
            a = (x - cvec(l["mean"])) / jnp.sqrt(cvec(l["var"]) + eps)
            a = jnp.maximum(a * cvec(l["gamma"]) + cvec(l["beta"]), 0.0)
            x = jnp.concatenate([x, conv(a, l["w"], 1)], axis=1)
        return x

    h = jnp.maximum(conv(x, params["conv0_w"], 1) + cvec(params["conv0_b"]), 0.0)
    h = dense_block(h, params["enc_block1"])
    h = conv(h, params["trans1_w"], 0) + cvec(params["trans1_b"])
    N, C, H, W = h.shape
    h = h.reshape(N, C, H // 2, 2, W // 2, 2).mean(axis=(3, 5))     # AvgPool2d(2, 2)
    enc = conv(h, params["skip1_w"], 0) + cvec(params["skip1_b"])
    bot = dense_block(enc, params["bottleneck"])
    return enc, bot


if __name__ == "__main__":
    root = jax.random.PRNGKey(0)
    pkey, xkey = jax.random.split(root)
    params = init_params(pkey)
    x = jax.random.normal(xkey, (2, 3, 16, 16), jnp.float32)   # NCHW, like the PyTorch module

    w_slab, vec_slab = pack_params(params, LAYOUT)
    fwd = jax.jit(densenet_forward)
    encoder_features, bottle_neck = fwd(x, w_slab, vec_slab)
    jax.block_until_ready((encoder_features, bottle_neck))

    # 3 -> conv0 -> 8 -> denseblock(+2*4) -> 16 -> transition (half spatial) -> skip -> 16
    assert encoder_features.shape == (2, 16, 8, 8), encoder_features.shape
    # bottleneck adds 2 * growth_rate channels: 16 + 8 = 24
    assert bottle_neck.shape == (2, 24, 8, 8), bottle_neck.shape

    # numeric check against a plain-JAX re-implementation of the PyTorch forward
    enc_expected, bot_expected = jax.jit(reference_forward)(x, params)
    np.testing.assert_allclose(np.asarray(encoder_features), np.asarray(enc_expected),
                               rtol=5e-2, atol=5e-2)
    np.testing.assert_allclose(np.asarray(bottle_neck), np.asarray(bot_expected),
                               rtol=5e-2, atol=5e-2)
    print("KERNEL_OK")
</pallas_src>

<mosaic_0001>
module attributes {stable_mosaic.version = 11 : i64} {
  func.func @kernel(%arg0: i32, %arg1: memref<3x512xf32, #tpu.memory_space<vmem>>, %arg2: memref<248x20xf32, #tpu.memory_space<vmem>>, %arg3: memref<20x10xf32, #tpu.memory_space<vmem>>, %arg4: memref<512x128xf32, #tpu.memory_space<vmem>>, %arg5: memref<9x512xf32, #tpu.memory_space<vmem>>, %arg6: memref<9x128xf32, #tpu.memory_space<vmem>>, %arg7: memref<16x128xf32, #tpu.memory_space<vmem>>, %arg8: memref<24x128xf32, #tpu.memory_space<vmem>>, %arg9: memref<16x512xf32, #tpu.memory_space<vmem>>) attributes {dimension_semantics = [#tpu.dimension_semantics<arbitrary>], iteration_bounds = array<i64: 1>, scalar_prefetch = 0 : i64, scratch_operands = 1 : i64, tpu.core_type = #tpu.core_type<tc>, window_params = [{pipeline_mode = #tpu.pipeline_mode<synchronous>, transform_indices = @transform_0, window_bounds = array<i64: 3, 512>}, {pipeline_mode = #tpu.pipeline_mode<synchronous>, transform_indices = @transform_1, window_bounds = array<i64: 248, 20>}, {pipeline_mode = #tpu.pipeline_mode<synchronous>, transform_indices = @transform_2, window_bounds = array<i64: 20, 10>}, {pipeline_mode = #tpu.pipeline_mode<synchronous>, transform_indices = @transform_3, window_bounds = array<i64: 512, 128>}, {pipeline_mode = #tpu.pipeline_mode<synchronous>, transform_indices = @transform_4, window_bounds = array<i64: 9, 512>}, {pipeline_mode = #tpu.pipeline_mode<synchronous>, transform_indices = @transform_5, window_bounds = array<i64: 9, 128>}, {pipeline_mode = #tpu.pipeline_mode<synchronous>, transform_indices = @transform_6, window_bounds = array<i64: 16, 128>}, {pipeline_mode = #tpu.pipeline_mode<synchronous>, transform_indices = @transform_7, window_bounds = array<i64: 24, 128>}]} {
    %c0 = arith.constant 0 : index
    %c0_0 = arith.constant 0 : index
    %0 = vector.load %arg1[%c0, %c0_0] : memref<3x512xf32, #tpu.memory_space<vmem>>, vector<3x512xf32>
    %c0_1 = arith.constant 0 : index
    %c0_2 = arith.constant 0 : index
    %1 = vector.load %arg2[%c0_1, %c0_2] : memref<248x20xf32, #tpu.memory_space<vmem>>, vector<72x3xf32>
    %cst = arith.constant dense<0.000000e+00> : vector<72x512xf32>
    %2 = tpu.matmul %1, %0, %cst {dimension_numbers = #tpu.dot_dimension_numbers<[1], [0], [0], [1], [0, 0, 1, 1], [], []>} : vector<72x3xf32>, vector<3x512xf32>, vector<72x512xf32> -> vector<72x512xf32>
    %3 = vector.extract_strided_slice %2 {offsets = [32, 0], sizes = [8, 512], strides = [1, 1]} : vector<72x512xf32> to vector<8x512xf32>
    %c0_3 = arith.constant 0 : index
    %c0_4 = arith.constant 0 : index
    %4 = vector.load %arg5[%c0_3, %c0_4] : memref<9x512xf32, #tpu.memory_space<vmem>>, vector<1x512xf32>
    %5 = vector.extract_strided_slice %2 {offsets = [0, 0], sizes = [8, 512], strides = [1, 1]} : vector<72x512xf32> to vector<8x512xf32>
    %cst_5 = arith.constant 0.000000e+00 : f32
    %6 = vector.broadcast %cst_5 : f32 to vector<8x17xf32>
    %7 = vector.extract_strided_slice %5 {offsets = [0, 0], sizes = [8, 495], strides = [1, 1]} : vector<8x512xf32> to vector<8x495xf32>
    %8 = tpu.concatenate %6, %7 in 1 : vector<8x17xf32>, vector<8x495xf32> -> vector<8x512xf32>
    %9 = vector.broadcast %4 : vector<1x512xf32> to vector<8x512xf32>
    %10 = arith.mulf %9, %8 : vector<8x512xf32>
    %11 = arith.addf %3, %10 : vector<8x512xf32>
    %c1 = arith.constant 1 : index
    %c0_6 = arith.constant 0 : index
    %12 = vector.load %arg5[%c1, %c0_6] : memref<9x512xf32, #tpu.memory_space<vmem>>, vector<1x512xf32>
    %13 = vector.extract_strided_slice %2 {offsets = [8, 0], sizes = [8, 512], strides = [1, 1]} : vector<72x512xf32> to vector<8x512xf32>
    %cst_7 = arith.constant 0.000000e+00 : f32
    %14 = vector.broadcast %cst_7 : f32 to vector<8x16xf32>
    %15 = vector.extract_strided_slice %13 {offsets = [0, 0], sizes = [8, 496], strides = [1, 1]} : vector<8x512xf32> to vector<8x496xf32>
    %16 = tpu.concatenate %14, %15 in 1 : vector<8x16xf32>, vector<8x496xf32> -> vector<8x512xf32>
    %17 = vector.broadcast %12 : vector<1x512xf32> to vector<8x512xf32>
    %18 = arith.mulf %17, %16 : vector<8x512xf32>
    %19 = arith.addf %11, %18 : vector<8x512xf32>
    %c2 = arith.constant 2 : index
    %c0_8 = arith.constant 0 : index
    %20 = vector.load %arg5[%c2, %c0_8] : memref<9x512xf32, #tpu.memory_space<vmem>>, vector<1x512xf32>
    %21 = vector.extract_strided_slice %2 {offsets = [16, 0], sizes = [8, 512], strides = [1, 1]} : vector<72x512xf32> to vector<8x512xf32>
    %cst_9 = arith.constant 0.000000e+00 : f32
    %22 = vector.broadcast %cst_9 : f32 to vector<8x15xf32>
    %23 = vector.extract_strided_slice %21 {offsets = [0, 0], sizes = [8, 497], strides = [1, 1]} : vector<8x512xf32> to vector<8x497xf32>
    %24 = tpu.concatenate %22, %23 in 1 : vector<8x15xf32>, vector<8x497xf32> -> vector<8x512xf32>
    %25 = vector.broadcast %20 : vector<1x512xf32> to vector<8x512xf32>
    %26 = arith.mulf %25, %24 : vector<8x512xf32>
    %27 = arith.addf %19, %26 : vector<8x512xf32>
    %c3 = arith.constant 3 : index
    %c0_10 = arith.constant 0 : index
    %28 = vector.load %arg5[%c3, %c0_10] : memref<9x512xf32, #tpu.memory_space<vmem>>, vector<1x512xf32>
    %29 = vector.extract_strided_slice %2 {offsets = [24, 0], sizes = [8, 512], strides = [1, 1]} : vector<72x512xf32> to vector<8x512xf32>
    %cst_11 = arith.constant 0.000000e+00 : f32
    %30 = vector.broadcast %cst_11 : f32 to vector<8x1xf32>
    %31 = vector.extract_strided_slice %29 {offsets = [0, 0], sizes = [8, 511], strides = [1, 1]} : vector<8x512xf32> to vector<8x511xf32>
    %32 = tpu.concatenate %30, %31 in 1 : vector<8x1xf32>, vector<8x511xf32> -> vector<8x512xf32>
    %33 = vector.broadcast %28 : vector<1x512xf32> to vector<8x512xf32>
    %34 = arith.mulf %33, %32 : vector<8x512xf32>
    %35 = arith.addf %27, %34 : vector<8x512xf32>
    %c5 = arith.constant 5 : index
    %c0_12 = arith.constant 0 : index
    %36 = vector.load %arg5[%c5, %c0_12] : memref<9x512xf32, #tpu.memory_space<vmem>>, vector<1x512xf32>
    %37 = vector.extract_strided_slice %2 {offsets = [40, 0], sizes = [8, 512], strides = [1, 1]} : vector<72x512xf32> to vector<8x512xf32>
    %cst_13 = arith.constant 0.000000e+00 : f32
    %38 = vector.broadcast %cst_13 : f32 to vector<8x1xf32>
    %39 = vector.extract_strided_slice %37 {offsets = [0, 1], sizes = [8, 511], strides = [1, 1]} : vector<8x512xf32> to vector<8x511xf32>
    %40 = tpu.concatenate %39, %38 in 1 : vector<8x511xf32>, vector<8x1xf32> -> vector<8x512xf32>
    %41 = vector.broadcast %36 : vector<1x512xf32> to vector<8x512xf32>
    %42 = arith.mulf %41, %40 : vector<8x512xf32>
    %43 = arith.addf %35, %42 : vector<8x512xf32>
    %c6 = arith.constant 6 : index
    %c0_14 = arith.constant 0 : index
    %44 = vector.load %arg5[%c6, %c0_14] : memref<9x512xf32, #tpu.memory_space<vmem>>, vector<1x512xf32>
    %45 = vector.extract_strided_slice %2 {offsets = [48, 0], sizes = [8, 512], strides = [1, 1]} : vector<72x512xf32> to vector<8x512xf32>
    %cst_15 = arith.constant 0.000000e+00 : f32
    %46 = vector.broadcast %cst_15 : f32 to vector<8x15xf32>
    %47 = vector.extract_strided_slice %45 {offsets = [0, 15], sizes = [8, 497], strides = [1, 1]} : vector<8x512xf32> to vector<8x497xf32>
    %48 = tpu.concatenate %47, %46 in 1 : vector<8x497xf32>, vector<8x15xf32> -> vector<8x512xf32>
    %49 = vector.broadcast %44 : vector<1x512xf32> to vector<8x512xf32>
    %50 = arith.mulf %49, %48 : vector<8x512xf32>
    %51 = arith.addf %43, %50 : vector<8x512xf32>
    %c7 = arith.constant 7 : index
    %c0_16 = arith.constant 0 : index
    %52 = vector.load %arg5[%c7, %c0_16] : memref<9x512xf32, #tpu.memory_space<vmem>>, vector<1x512xf32>
    %53 = vector.extract_strided_slice %2 {offsets = [56, 0], sizes = [8, 512], strides = [1, 1]} : vector<72x512xf32> to vector<8x512xf32>
    %cst_17 = arith.constant 0.000000e+00 : f32
    %54 = vector.broadcast %cst_17 : f32 to vector<8x16xf32>
    %55 = vector.extract_strided_slice %53 {offsets = [0, 16], sizes = [8, 496], strides = [1, 1]} : vector<8x512xf32> to vector<8x496xf32>
    %56 = tpu.concatenate %55, %54 in 1 : vector<8x496xf32>, vector<8x16xf32> -> vector<8x512xf32>
    %57 = vector.broadcast %52 : vector<1x512xf32> to vector<8x512xf32>
    %58 = arith.mulf %57, %56 : vector<8x512xf32>
    %59 = arith.addf %51, %58 : vector<8x512xf32>
    %c8 = arith.constant 8 : index
    %c0_18 = arith.constant 0 : index
    %60 = vector.load %arg5[%c8, %c0_18] : memref<9x512xf32, #tpu.memory_space<vmem>>, vector<1x512xf32>
    %61 = vector.extract_strided_slice %2 {offsets = [64, 0], sizes = [8, 512], strides = [1, 1]} : vector<72x512xf32> to vector<8x512xf32>
    %cst_19 = arith.constant 0.000000e+00 : f32
    %62 = vector.broadcast %cst_19 : f32 to vector<8x17xf32>
    %63 = vector.extract_strided_slice %61 {offsets = [0, 17], sizes = [8, 495], strides = [1, 1]} : vector<8x512xf32> to vector<8x495xf32>
    %64 = tpu.concatenate %63, %62 in 1 : vector<8x495xf32>, vector<8x17xf32> -> vector<8x512xf32>
    %65 = vector.broadcast %60 : vector<1x512xf32> to vector<8x512xf32>
    %66 = arith.mulf %65, %64 : vector<8x512xf32>
    %67 = arith.addf %59, %66 : vector<8x512xf32>
    %c0_20 = arith.constant 0 : index
    %c0_21 = arith.constant 0 : index
    %68 = vector.load %arg3[%c0_20, %c0_21] : memref<20x10xf32, #tpu.memory_space<vmem>>, vector<8x1xf32>
    %69 = vector.broadcast %68 : vector<8x1xf32> to vector<8x512xf32>
    %70 = arith.addf %67, %69 : vector<8x512xf32>
    %cst_22 = arith.constant 0.000000e+00 : f32
    %71 = vector.broadcast %cst_22 : f32 to vector<8x512xf32>
    %72 = arith.maximumf %70, %71 : vector<8x512xf32>
    %c0_23 = arith.constant 0 : index
    %c0_24 = arith.constant 0 : index
    %73 = vector.load %arg9[%c0_23, %c0_24] : memref<16x512xf32, #tpu.memory_space<vmem>>, vector<8x512xf32>
    tpu.vector_store %arg9[%c0_23, %c0_24], %72 {strides = array<i32>} : memref<16x512xf32, #tpu.memory_space<vmem>>, vector<8x512xf32>,
    %c0_25 = arith.constant 0 : index
    %c1_26 = arith.constant 1 : index
    %74 = vector.load %arg3[%c0_25, %c1_26] : memref<20x10xf32, #tpu.memory_space<vmem>>, vector<8x1xf32>
    %c0_27 = arith.constant 0 : index
    %c2_28 = arith.constant 2 : index
    %75 = vector.load %arg3[%c0_27, %c2_28] : memref<20x10xf32, #tpu.memory_space<vmem>>, vector<8x1xf32>
    %c0_29 = arith.constant 0 : index
    %c0_30 = arith.constant 0 : index
    %76 = vector.load %arg9[%c0_29, %c0_30] : memref<16x512xf32, #tpu.memory_space<vmem>>, vector<8x512xf32>
    %77 = vector.broadcast %74 : vector<8x1xf32> to vector<8x512xf32>
    %78 = arith.mulf %76, %77 : vector<8x512xf32>
    %79 = vector.broadcast %75 : vector<8x1xf32> to vector<8x512xf32>
    %80 = arith.addf %78, %79 : vector<8x512xf32>
    %cst_31 = arith.constant 0.000000e+00 : f32
    %81 = vector.broadcast %cst_31 : f32 to vector<8x512xf32>
    %82 = arith.maximumf %80, %81 : vector<8x512xf32>
    %c72 = arith.constant 72 : index
    %c0_32 = arith.constant 0 : index
    %83 = vector.load %arg2[%c72, %c0_32] : memref<248x20xf32, #tpu.memory_space<vmem>>, vector<36x8xf32>
    %cst_33 = arith.constant dense<0.000000e+00> : vector<36x512xf32>
    %84 = tpu.matmul %83, %82, %cst_33 {dimension_numbers = #tpu.dot_dimension_numbers<[1], [0], [0], [1], [0, 0, 1, 1], [], []>} : vector<36x8xf32>, vector<8x512xf32>, vector<36x512xf32> -> vector<36x512xf32>
    %85 = vector.extract_strided_slice %84 {offsets = [16, 0], sizes = [4, 512], strides = [1, 1]} : vector<36x512xf32> to vector<4x512xf32>
    %c0_34 = arith.constant 0 : index
    %c0_35 = arith.constant 0 : index
    %86 = vector.load %arg5[%c0_34, %c0_35] : memref<9x512xf32, #tpu.memory_space<vmem>>, vector<1x512xf32>
    %87 = vector.extract_strided_slice %84 {offsets = [0, 0], sizes = [4, 512], strides = [1, 1]} : vector<36x512xf32> to vector<4x512xf32>
    %cst_36 = arith.constant 0.000000e+00 : f32
    %88 = vector.broadcast %cst_36 : f32 to vector<4x17xf32>
    %89 = vector.extract_strided_slice %87 {offsets = [0, 0], sizes = [4, 495], strides = [1, 1]} : vector<4x512xf32> to vector<4x495xf32>
    %90 = tpu.concatenate %88, %89 in 1 : vector<4x17xf32>, vector<4x495xf32> -> vector<4x512xf32>
    %91 = vector.broadcast %86 : vector<1x512xf32> to vector<4x512xf32>
    %92 = arith.mulf %91, %90 : vector<4x512xf32>
    %93 = arith.addf %85, %92 : vector<4x512xf32>
    %c1_37 = arith.constant 1 : index
    %c0_38 = arith.constant 0 : index
    %94 = vector.load %arg5[%c1_37, %c0_38] : memref<9x512xf32, #tpu.memory_space<vmem>>, vector<1x512xf32>
    %95 = vector.extract_strided_slice %84 {offsets = [4, 0], sizes = [4, 512], strides = [1, 1]} : vector<36x512xf32> to vector<4x512xf32>
    %cst_39 = arith.constant 0.000000e+00 : f32
    %96 = vector.broadcast %cst_39 : f32 to vector<4x16xf32>
    %97 = vector.extract_strided_slice %95 {offsets = [0, 0], sizes = [4, 496], strides = [1, 1]} : vector<4x512xf32> to vector<4x496xf32>
    %98 = tpu.concatenate %96, %97 in 1 : vector<4x16xf32>, vector<4x496xf32> -> vector<4x512xf32>
    %99 = vector.broadcast %94 : vector<1x512xf32> to vector<4x512xf32>
    %100 = arith.mulf %99, %98 : vector<4x512xf32>
    %101 = arith.addf %93, %100 : vector<4x512xf32>
    %c2_40 = arith.constant 2 : index
    %c0_41 = arith.constant 0 : index
    %102 = vector.load %arg5[%c2_40, %c0_41] : memref<9x512xf32, #tpu.memory_space<vmem>>, vector<1x512xf32>
    %103 = vector.extract_strided_slice %84 {offsets = [8, 0], sizes = [4, 512], strides = [1, 1]} : vector<36x512xf32> to vector<4x512xf32>
    %cst_42 = arith.constant 0.000000e+00 : f32
    %104 = vector.broadcast %cst_42 : f32 to vector<4x15xf32>
    %105 = vector.extract_strided_slice %103 {offsets = [0, 0], sizes = [4, 497], strides = [1, 1]} : vector<4x512xf32> to vector<4x497xf32>
    %106 = tpu.concatenate %104, %105 in 1 : vector<4x15xf32>, vector<4x497xf32> -> vector<4x512xf32>
    %107 = vector.broadcast %102 : vector<1x512xf32> to vector<4x512xf32>
    %108 = arith.mulf %107, %106 : vector<4x512xf32>
    %109 = arith.addf %101, %108 : vector<4x512xf32>
    %c3_43 = arith.constant 3 : index
    %c0_44 = arith.constant 0 : index
    %110 = vector.load %arg5[%c3_43, %c0_44] : memref<9x512xf32, #tpu.memory_space<vmem>>, vector<1x512xf32>
    %111 = vector.extract_strided_slice %84 {offsets = [12, 0], sizes = [4, 512], strides = [1, 1]} : vector<36x512xf32> to vector<4x512xf32>
    %cst_45 = arith.constant 0.000000e+00 : f32
    %112 = vector.broadcast %cst_45 : f32 to vector<4x1xf32>
    %113 = vector.extract_strided_slice %111 {offsets = [0, 0], sizes = [4, 511], strides = [1, 1]} : vector<4x512xf32> to vector<4x511xf32>
    %114 = tpu.concatenate %112, %113 in 1 : vector<4x1xf32>, vector<4x511xf32> -> vector<4x512xf32>
    %115 = vector.broadcast %110 : vector<1x512xf32> to vector<4x512xf32>
    %116 = arith.mulf %115, %114 : vector<4x512xf32>
    %117 = arith.addf %109, %116 : vector<4x512xf32>
    %c5_46 = arith.constant 5 : index
    %c0_47 = arith.constant 0 : index
    %118 = vector.load %arg5[%c5_46, %c0_47] : memref<9x512xf32, #tpu.memory_space<vmem>>, vector<1x512xf32>
    %119 = vector.extract_strided_slice %84 {offsets = [20, 0], sizes = [4, 512], strides = [1, 1]} : vector<36x512xf32> to vector<4x512xf32>
    %cst_48 = arith.constant 0.000000e+00 : f32
    %120 = vector.broadcast %cst_48 : f32 to vector<4x1xf32>
    %121 = vector.extract_strided_slice %119 {offsets = [0, 1], sizes = [4, 511], strides = [1, 1]} : vector<4x512xf32> to vector<4x511xf32>
    %122 = tpu.concatenate %121, %120 in 1 : vector<4x511xf32>, vector<4x1xf32> -> vector<4x512xf32>
    %123 = vector.broadcast %118 : vector<1x512xf32> to vector<4x512xf32>
    %124 = arith.mulf %123, %122 : vector<4x512xf32>
    %125 = arith.addf %117, %124 : vector<4x512xf32>
    %c6_49 = arith.constant 6 : index
    %c0_50 = arith.constant 0 : index
    %126 = vector.load %arg5[%c6_49, %c0_50] : memref<9x512xf32, #tpu.memory_space<vmem>>, vector<1x512xf32>
    %127 = vector.extract_strided_slice %84 {offsets = [24, 0], sizes = [4, 512], strides = [1, 1]} : vector<36x512xf32> to vector<4x512xf32>
    %cst_51 = arith.constant 0.000000e+00 : f32
    %128 = vector.broadcast %cst_51 : f32 to vector<4x15xf32>
    %129 = vector.extract_strided_slice %127 {offsets = [0, 15], sizes = [4, 497], strides = [1, 1]} : vector<4x512xf32> to vector<4x497xf32>
    %130 = tpu.concatenate %129, %128 in 1 : vector<4x497xf32>, vector<4x15xf32> -> vector<4x512xf32>
    %131 = vector.broadcast %126 : vector<1x512xf32> to vector<4x512xf32>
    %132 = arith.mulf %131, %130 : vector<4x512xf32>
    %133 = arith.addf %125, %132 : vector<4x512xf32>
    %c7_52 = arith.constant 7 : index
    %c0_53 = arith.constant 0 : index
    %134 = vector.load %arg5[%c7_52, %c0_53] : memref<9x512xf32, #tpu.memory_space<vmem>>, vector<1x512xf32>
    %135 = vector.extract_strided_slice %84 {offsets = [28, 0], sizes = [4, 512], strides = [1, 1]} : vector<36x512xf32> to vector<4x512xf32>
    %cst_54 = arith.constant 0.000000e+00 : f32
    %136 = vector.broadcast %cst_54 : f32 to vector<4x16xf32>
    %137 = vector.extract_strided_slice %135 {offsets = [0, 16], sizes = [4, 496], strides = [1, 1]} : vector<4x512xf32> to vector<4x496xf32>
    %138 = tpu.concatenate %137, %136 in 1 : vector<4x496xf32>, vector<4x16xf32> -> vector<4x512xf32>
    %139 = vector.broadcast %134 : vector<1x512xf32> to vector<4x512xf32>
    %140 = arith.mulf %139, %138 : vector<4x512xf32>
    %141 = arith.addf %133, %140 : vector<4x512xf32>
    %c8_55 = arith.constant 8 : index
    %c0_56 = arith.constant 0 : index
    %142 = vector.load %arg5[%c8_55, %c0_56] : memref<9x512xf32, #tpu.memory_space<vmem>>, vector<1x512xf32>
    %143 = vector.extract_strided_slice %84 {offsets = [32, 0], sizes = [4, 512], strides = [1, 1]} : vector<36x512xf32> to vector<4x512xf32>
    %cst_57 = arith.constant 0.000000e+00 : f32
    %144 = vector.broadcast %cst_57 : f32 to vector<4x17xf32>
    %145 = vector.extract_strided_slice %143 {offsets = [0, 17], sizes = [4, 495], strides = [1, 1]} : vector<4x512xf32> to vector<4x495xf32>
    %146 = tpu.concatenate %145, %144 in 1 : vector<4x495xf32>, vector<4x17xf32> -> vector<4x512xf32>
    %147 = vector.broadcast %142 : vector<1x512xf32> to vector<4x512xf32>
    %148 = arith.mulf %147, %146 : vector<4x512xf32>
    %149 = arith.addf %141, %148 : vector<4x512xf32>
    %c8_58 = arith.constant 8 : index
    %c0_59 = arith.constant 0 : index
    %150 = vector.load %arg9[%c8_58, %c0_59] : memref<16x512xf32, #tpu.memory_space<vmem>>, vector<4x512xf32>
    tpu.vector_store %arg9[%c8_58, %c0_59], %149 {strides = array<i32>} : memref<16x512xf32, #tpu.memory_space<vmem>>, vector<4x512xf32>,
    %c0_60 = arith.constant 0 : index
    %c3_61 = arith.constant 3 : index
    %151 = vector.load %arg3[%c0_60, %c3_61] : memref<20x10xf32, #tpu.memory_space<vmem>>, vector<12x1xf32>
    %c0_62 = arith.constant 0 : index
    %c4 = arith.constant 4 : index
    %152 = vector.load %arg3[%c0_62, %c4] : memref<20x10xf32, #tpu.memory_space<vmem>>, vector<12x1xf32>
    %c0_63 = arith.constant 0 : index
    %c0_64 = arith.constant 0 : index
    %153 = vector.load %arg9[%c0_63, %c0_64] : memref<16x512xf32, #tpu.memory_space<vmem>>, vector<12x512xf32>
    %154 = vector.broadcast %151 : vector<12x1xf32> to vector<12x512xf32>
    %155 = arith.mulf %153, %154 : vector<12x512xf32>
    %156 = vector.broadcast %152 : vector<12x1xf32> to vector<12x512xf32>
    %157 = arith.addf %155, %156 : vector<12x512xf32>
    %cst_65 = arith.constant 0.000000e+00 : f32
    %158 = vector.broadcast %cst_65 : f32 to vector<12x512xf32>
    %159 = arith.maximumf %157, %158 : vector<12x512xf32>
    %c112 = arith.constant 112 : index
    %c0_66 = arith.constant 0 : index
    %160 = vector.load %arg2[%c112, %c0_66] : memref<248x20xf32, #tpu.memory_space<vmem>>, vector<36x12xf32>
    %cst_67 = arith.constant dense<0.000000e+00> : vector<36x512xf32>
    %161 = tpu.matmul %160, %159, %cst_67 {dimension_numbers = #tpu.dot_dimension_numbers<[1], [0], [0], [1], [0, 0, 1, 1], [], []>} : vector<36x12xf32>, vector<12x512xf32>, vector<36x512xf32> -> vector<36x512xf32>
    %162 = vector.extract_strided_slice %161 {offsets = [16, 0], sizes = [4, 512], strides = [1, 1]} : vector<36x512xf32> to vector<4x512xf32>
    %c0_68 = arith.constant 0 : index
    %c0_69 = arith.constant 0 : index
    %163 = vector.load %arg5[%c0_68, %c0_69] : memref<9x512xf32, #tpu.memory_space<vmem>>, vector<1x512xf32>
    %164 = vector.extract_strided_slice %161 {offsets = [0, 0], sizes = [4, 512], strides = [1, 1]} : vector<36x512xf32> to vector<4x512xf32>
    %cst_70 = arith.constant 0.000000e+00 : f32
    %165 = vector.broadcast %cst_70 : f32 to vector<4x17xf32>
    %166 = vector.extract_strided_slice %164 {offsets = [0, 0], sizes = [4, 495], strides = [1, 1]} : vector<4x512xf32> to vector<4x495xf32>
    %167 = tpu.concatenate %165, %166 in 1 : vector<4x17xf32>, vector<4x495xf32> -> vector<4x512xf32>
    %168 = vector.broadcast %163 : vector<1x512xf32> to vector<4x512xf32>
    %169 = arith.mulf %168, %167 : vector<4x512xf32>
    %170 = arith.addf %162, %169 : vector<4x512xf32>
    %c1_71 = arith.constant 1 : index
    %c0_72 = arith.constant 0 : index
    %171 = vector.load %arg5[%c1_71, %c0_72] : memref<9x512xf32, #tpu.memory_space<vmem>>, vector<1x512xf32>
    %172 = vector.extract_strided_slice %161 {offsets = [4, 0], sizes = [4, 512], strides = [1, 1]} : vector<36x512xf32> to vector<4x512xf32>
    %cst_73 = arith.constant 0.000000e+00 : f32
    %173 = vector.broadcast %cst_73 : f32 to vector<4x16xf32>
    %174 = vector.extract_strided_slice %172 {offsets = [0, 0], sizes = [4, 496], strides = [1, 1]} : vector<4x512xf32> to vector<4x496xf32>
    %175 = tpu.concatenate %173, %174 in 1 : vector<4x16xf32>, vector<4x496xf32> -> vector<4x512xf32>
    %176 = vector.broadcast %171 : vector<1x512xf32> to vector<4x512xf32>
    %177 = arith.mulf %176, %175 : vector<4x512xf32>
    %178 = arith.addf %170, %177 : vector<4x512xf32>
    %c2_74 = arith.constant 2 : index
    %c0_75 = arith.constant 0 : index
    %179 = vector.load %arg5[%c2_74, %c0_75] : memref<9x512xf32, #tpu.memory_space<vmem>>, vector<1x512xf32>
    %180 = vector.extract_strided_slice %161 {offsets = [8, 0], sizes = [4, 512], strides = [1, 1]} : vector<36x512xf32> to vector<4x512xf32>
    %cst_76 = arith.constant 0.000000e+00 : f32
    %181 = vector.broadcast %cst_76 : f32 to vector<4x15xf32>
    %182 = vector.extract_strided_slice %180 {offsets = [0, 0], sizes = [4, 497], strides = [1, 1]} : vector<4x512xf32> to vector<4x497xf32>
    %183 = tpu.concatenate %181, %182 in 1 : vector<4x15xf32>, vector<4x497xf32> -> vector<4x512xf32>
    %184 = vector.broadcast %179 : vector<1x512xf32> to vector<4x512xf32>
    %185 = arith.mulf %184, %183 : vector<4x512xf32>
    %186 = arith.addf %178, %185 : vector<4x512xf32>
    %c3_77 = arith.constant 3 : index
    %c0_78 = arith.constant 0 : index
    %187 = vector.load %arg5[%c3_77, %c0_78] : memref<9x512xf32, #tpu.memory_space<vmem>>, vector<1x512xf32>
    %188 = vector.extract_strided_slice %161 {offsets = [12, 0], sizes = [4, 512], strides = [1, 1]} : vector<36x512xf32> to vector<4x512xf32>
    %cst_79 = arith.constant 0.000000e+00 : f32
    %189 = vector.broadcast %cst_79 : f32 to vector<4x1xf32>
    %190 = vector.extract_strided_slice %188 {offsets = [0, 0], sizes = [4, 511], strides = [1, 1]} : vector<4x512xf32> to vector<4x511xf32>
    %191 = tpu.concatenate %189, %190 in 1 : vector<4x1xf32>, vector<4x511xf32> -> vector<4x512xf32>
    %192 = vector.broadcast %187 : vector<1x512xf32> to vector<4x512xf32>
    %193 = arith.mulf %192, %191 : vector<4x512xf32>
    %194 = arith.addf %186, %193 : vector<4x512xf32>
    %c5_80 = arith.constant 5 : index
    %c0_81 = arith.constant 0 : index
    %195 = vector.load %arg5[%c5_80, %c0_81] : memref<9x512xf32, #tpu.memory_space<vmem>>, vector<1x512xf32>
    %196 = vector.extract_strided_slice %161 {offsets = [20, 0], sizes = [4, 512], strides = [1, 1]} : vector<36x512xf32> to vector<4x512xf32>
    %cst_82 = arith.constant 0.000000e+00 : f32
    %197 = vector.broadcast %cst_82 : f32 to vector<4x1xf32>
    %198 = vector.extract_strided_slice %196 {offsets = [0, 1], sizes = [4, 511], strides = [1, 1]} : vector<4x512xf32> to vector<4x511xf32>
    %199 = tpu.concatenate %198, %197 in 1 : vector<4x511xf32>, vector<4x1xf32> -> vector<4x512xf32>
    %200 = vector.broadcast %195 : vector<1x512xf32> to vector<4x512xf32>
    %201 = arith.mulf %200, %199 : vector<4x512xf32>
    %202 = arith.addf %194, %201 : vector<4x512xf32>
    %c6_83 = arith.constant 6 : index
    %c0_84 = arith.constant 0 : index
    %203 = vector.load %arg5[%c6_83, %c0_84] : memref<9x512xf32, #tpu.memory_space<vmem>>, vector<1x512xf32>
    %204 = vector.extract_strided_slice %161 {offsets = [24, 0], sizes = [4, 512], strides = [1, 1]} : vector<36x512xf32> to vector<4x512xf32>
    %cst_85 = arith.constant 0.000000e+00 : f32
    %205 = vector.broadcast %cst_85 : f32 to vector<4x15xf32>
    %206 = vector.extract_strided_slice %204 {offsets = [0, 15], sizes = [4, 497], strides = [1, 1]} : vector<4x512xf32> to vector<4x497xf32>
    %207 = tpu.concatenate %206, %205 in 1 : vector<4x497xf32>, vector<4x15xf32> -> vector<4x512xf32>
    %208 = vector.broadcast %203 : vector<1x512xf32> to vector<4x512xf32>
    %209 = arith.mulf %208, %207 : vector<4x512xf32>
    %210 = arith.addf %202, %209 : vector<4x512xf32>
    %c7_86 = arith.constant 7 : index
    %c0_87 = arith.constant 0 : index
    %211 = vector.load %arg5[%c7_86, %c0_87] : memref<9x512xf32, #tpu.memory_space<vmem>>, vector<1x512xf32>
    %212 = vector.extract_strided_slice %161 {offsets = [28, 0], sizes = [4, 512], strides = [1, 1]} : vector<36x512xf32> to vector<4x512xf32>
    %cst_88 = arith.constant 0.000000e+00 : f32
    %213 = vector.broadcast %cst_88 : f32 to vector<4x16xf32>
    %214 = vector.extract_strided_slice %212 {offsets = [0, 16], sizes = [4, 496], strides = [1, 1]} : vector<4x512xf32> to vector<4x496xf32>
    %215 = tpu.concatenate %214, %213 in 1 : vector<4x496xf32>, vector<4x16xf32> -> vector<4x512xf32>
    %216 = vector.broadcast %211 : vector<1x512xf32> to vector<4x512xf32>
    %217 = arith.mulf %216, %215 : vector<4x512xf32>
    %218 = arith.addf %210, %217 : vector<4x512xf32>
    %c8_89 = arith.constant 8 : index
    %c0_90 = arith.constant 0 : index
    %219 = vector.load %arg5[%c8_89, %c0_90] : memref<9x512xf32, #tpu.memory_space<vmem>>, vector<1x512xf32>
    %220 = vector.extract_strided_slice %161 {offsets = [32, 0], sizes = [4, 512], strides = [1, 1]} : vector<36x512xf32> to vector<4x512xf32>
    %cst_91 = arith.constant 0.000000e+00 : f32
    %221 = vector.broadcast %cst_91 : f32 to vector<4x17xf32>
    %222 = vector.extract_strided_slice %220 {offsets = [0, 17], sizes = [4, 495], strides = [1, 1]} : vector<4x512xf32> to vector<4x495xf32>
    %223 = tpu.concatenate %222, %221 in 1 : vector<4x495xf32>, vector<4x17xf32> -> vector<4x512xf32>
    %224 = vector.broadcast %219 : vector<1x512xf32> to vector<4x512xf32>
    %225 = arith.mulf %224, %223 : vector<4x512xf32>
    %226 = arith.addf %218, %225 : vector<4x512xf32>
    %c12 = arith.constant 12 : index
    %c0_92 = arith.constant 0 : index
    %227 = vector.load %arg9[%c12, %c0_92] : memref<16x512xf32, #tpu.memory_space<vmem>>, vector<4x512xf32>
    tpu.vector_store %arg9[%c12, %c0_92], %226 {strides = array<i32>} : memref<16x512xf32, #tpu.memory_space<vmem>>, vector<4x512xf32>,
    %c0_93 = arith.constant 0 : index
    %c0_94 = arith.constant 0 : index
    %228 = vector.load %arg9[%c0_93, %c0_94] : memref<16x512xf32, #tpu.memory_space<vmem>>, vector<16x512xf32>
    %c0_95 = arith.constant 0 : index
    %c0_96 = arith.constant 0 : index
    %229 = vector.load %arg4[%c0_95, %c0_96] : memref<512x128xf32, #tpu.memory_space<vmem>>, vector<512x128xf32>
    %cst_97 = arith.constant dense<0.000000e+00> : vector<16x128xf32>
    %230 = tpu.matmul %228, %229, %cst_97 {dimension_numbers = #tpu.dot_dimension_numbers<[1], [0], [0], [1], [0, 0, 1, 1], [], []>} : vector<16x512xf32>, vector<512x128xf32>, vector<16x128xf32> -> vector<16x128xf32>
    %c232 = arith.constant 232 : index
    %c0_98 = arith.constant 0 : index
    %231 = vector.load %arg2[%c232, %c0_98] : memref<248x20xf32, #tpu.memory_space<vmem>>, vector<16x16xf32>
    %cst_99 = arith.constant dense<0.000000e+00> : vector<16x128xf32>
    %232 = tpu.matmul %231, %230, %cst_99 {dimension_numbers = #tpu.dot_dimension_numbers<[1], [0], [0], [1], [0, 0, 1, 1], [], []>} : vector<16x16xf32>, vector<16x128xf32>, vector<16x128xf32> -> vector<16x128xf32>
    %c0_100 = arith.constant 0 : index
    %c9 = arith.constant 9 : index
    %233 = vector.load %arg3[%c0_100, %c9] : memref<20x10xf32, #tpu.memory_space<vmem>>, vector<16x1xf32>
    %234 = vector.broadcast %233 : vector<16x1xf32> to vector<16x128xf32>
    %235 = arith.addf %232, %234 : vector<16x128xf32>
    %c0_101 = arith.constant 0 : index
    %c0_102 = arith.constant 0 : index
    %236 = vector.load %arg7[%c0_101, %c0_102] : memref<16x128xf32, #tpu.memory_space<vmem>>, vector<16x128xf32>
    tpu.vector_store %arg7[%c0_101, %c0_102], %235 {strides = array<i32>} : memref<16x128xf32, #tpu.memory_space<vmem>>, vector<16x128xf32>,
    %c0_103 = arith.constant 0 : index
    %c0_104 = arith.constant 0 : index
    %237 = vector.load %arg8[%c0_103, %c0_104] : memref<24x128xf32, #tpu.memory_space<vmem>>, vector<16x128xf32>
    tpu.vector_store %arg8[%c0_103, %c0_104], %235 {strides = array<i32>} : memref<24x128xf32, #tpu.memory_space<vmem>>, vector<16x128xf32>,
    %c0_105 = arith.constant 0 : index
    %c5_106 = arith.constant 5 : index
    %238 = vector.load %arg3[%c0_105, %c5_106] : memref<20x10xf32, #tpu.memory_space<vmem>>, vector<16x1xf32>
    %c0_107 = arith.constant 0 : index
    %c6_108 = arith.constant 6 : index
    %239 = vector.load %arg3[%c0_107, %c6_108] : memref<20x10xf32, #tpu.memory_space<vmem>>, vector<16x1xf32>
    %c0_109 = arith.constant 0 : index
    %c0_110 = arith.constant 0 : index
    %240 = vector.load %arg8[%c0_109, %c0_110] : memref<24x128xf32, #tpu.memory_space<vmem>>, vector<16x128xf32>
    %241 = vector.broadcast %238 : vector<16x1xf32> to vector<16x128xf32>
    %242 = arith.mulf %240, %241 : vector<16x128xf32>
    %243 = vector.broadcast %239 : vector<16x1xf32> to vector<16x128xf32>
    %244 = arith.addf %242, %243 : vector<16x128xf32>
    %cst_111 = arith.constant 0.000000e+00 : f32
    %245 = vector.broadcast %cst_111 : f32 to vector<16x128xf32>
    %246 = arith.maximumf %244, %245 : vector<16x128xf32>
    %c152 = arith.constant 152 : index
    %c0_112 = arith.constant 0 : index
    %247 = vector.load %arg2[%c152, %c0_112] : memref<248x20xf32, #tpu.memory_space<vmem>>, vector<36x16xf32>
    %cst_113 = arith.constant dense<0.000000e+00> : vector<36x128xf32>
    %248 = tpu.matmul %247, %246, %cst_113 {dimension_numbers = #tpu.dot_dimension_numbers<[1], [0], [0], [1], [0, 0, 1, 1], [], []>} : vector<36x16xf32>, vector<16x128xf32>, vector<36x128xf32> -> vector<36x128xf32>
    %249 = vector.extract_strided_slice %248 {offsets = [16, 0], sizes = [4, 128], strides = [1, 1]} : vector<36x128xf32> to vector<4x128xf32>
    %c0_114 = arith.constant 0 : index
    %c0_115 = arith.constant 0 : index
    %250 = vector.load %arg6[%c0_114, %c0_115] : memref<9x128xf32, #tpu.memory_space<vmem>>, vector<1x128xf32>
    %251 = vector.extract_strided_slice %248 {offsets = [0, 0], sizes = [4, 128], strides = [1, 1]} : vector<36x128xf32> to vector<4x128xf32>
    %cst_116 = arith.constant 0.000000e+00 : f32
    %252 = vector.broadcast %cst_116 : f32 to vector<4x9xf32>
    %253 = vector.extract_strided_slice %251 {offsets = [0, 0], sizes = [4, 119], strides = [1, 1]} : vector<4x128xf32> to vector<4x119xf32>
    %254 = tpu.concatenate %252, %253 in 1 : vector<4x9xf32>, vector<4x119xf32> -> vector<4x128xf32>
    %255 = vector.broadcast %250 : vector<1x128xf32> to vector<4x128xf32>
    %256 = arith.mulf %255, %254 : vector<4x128xf32>
    %257 = arith.addf %249, %256 : vector<4x128xf32>
    %c1_117 = arith.constant 1 : index
    %c0_118 = arith.constant 0 : index
    %258 = vector.load %arg6[%c1_117, %c0_118] : memref<9x128xf32, #tpu.memory_space<vmem>>, vector<1x128xf32>
    %259 = vector.extract_strided_slice %248 {offsets = [4, 0], sizes = [4, 128], strides = [1, 1]} : vector<36x128xf32> to vector<4x128xf32>
    %cst_119 = arith.constant 0.000000e+00 : f32
    %260 = vector.broadcast %cst_119 : f32 to vector<4x8xf32>
    %261 = vector.extract_strided_slice %259 {offsets = [0, 0], sizes = [4, 120], strides = [1, 1]} : vector<4x128xf32> to vector<4x120xf32>
    %262 = tpu.concatenate %260, %261 in 1 : vector<4x8xf32>, vector<4x120xf32> -> vector<4x128xf32>
    %263 = vector.broadcast %258 : vector<1x128xf32> to vector<4x128xf32>
    %264 = arith.mulf %263, %262 : vector<4x128xf32>
    %265 = arith.addf %257, %264 : vector<4x128xf32>
    %c2_120 = arith.constant 2 : index
    %c0_121 = arith.constant 0 : index
    %266 = vector.load %arg6[%c2_120, %c0_121] : memref<9x128xf32, #tpu.memory_space<vmem>>, vector<1x128xf32>
    %267 = vector.extract_strided_slice %248 {offsets = [8, 0], sizes = [4, 128], strides = [1, 1]} : vector<36x128xf32> to vector<4x128xf32>
    %cst_122 = arith.constant 0.000000e+00 : f32
    %268 = vector.broadcast %cst_122 : f32 to vector<4x7xf32>
    %269 = vector.extract_strided_slice %267 {offsets = [0, 0], sizes = [4, 121], strides = [1, 1]} : vector<4x128xf32> to vector<4x121xf32>
    %270 = tpu.concatenate %268, %269 in 1 : vector<4x7xf32>, vector<4x121xf32> -> vector<4x128xf32>
    %271 = vector.broadcast %266 : vector<1x128xf32> to vector<4x128xf32>
    %272 = arith.mulf %271, %270 : vector<4x128xf32>
    %273 = arith.addf %265, %272 : vector<4x128xf32>
    %c3_123 = arith.constant 3 : index
    %c0_124 = arith.constant 0 : index
    %274 = vector.load %arg6[%c3_123, %c0_124] : memref<9x128xf32, #tpu.memory_space<vmem>>, vector<1x128xf32>
    %275 = vector.extract_strided_slice %248 {offsets = [12, 0], sizes = [4, 128], strides = [1, 1]} : vector<36x128xf32> to vector<4x128xf32>
    %cst_125 = arith.constant 0.000000e+00 : f32
    %276 = vector.broadcast %cst_125 : f32 to vector<4x1xf32>
    %277 = vector.extract_strided_slice %275 {offsets = [0, 0], sizes = [4, 127], strides = [1, 1]} : vector<4x128xf32> to vector<4x127xf32>
    %278 = tpu.concatenate %276, %277 in 1 : vector<4x1xf32>, vector<4x127xf32> -> vector<4x128xf32>
    %279 = vector.broadcast %274 : vector<1x128xf32> to vector<4x128xf32>
    %280 = arith.mulf %279, %278 : vector<4x128xf32>
    %281 = arith.addf %273, %280 : vector<4x128xf32>
    %c5_126 = arith.constant 5 : index
    %c0_127 = arith.constant 0 : index
    %282 = vector.load %arg6[%c5_126, %c0_127] : memref<9x128xf32, #tpu.memory_space<vmem>>, vector<1x128xf32>
    %283 = vector.extract_strided_slice %248 {offsets = [20, 0], sizes = [4, 128], strides = [1, 1]} : vector<36x128xf32> to vector<4x128xf32>
    %cst_128 = arith.constant 0.000000e+00 : f32
    %284 = vector.broadcast %cst_128 : f32 to vector<4x1xf32>
    %285 = vector.extract_strided_slice %283 {offsets = [0, 1], sizes = [4, 127], strides = [1, 1]} : vector<4x128xf32> to vector<4x127xf32>
    %286 = tpu.concatenate %285, %284 in 1 : vector<4x127xf32>, vector<4x1xf32> -> vector<4x128xf32>
    %287 = vector.broadcast %282 : vector<1x128xf32> to vector<4x128xf32>
    %288 = arith.mulf %287, %286 : vector<4x128xf32>
    %289 = arith.addf %281, %288 : vector<4x128xf32>
    %c6_129 = arith.constant 6 : index
    %c0_130 = arith.constant 0 : index
    %290 = vector.load %arg6[%c6_129, %c0_130] : memref<9x128xf32, #tpu.memory_space<vmem>>, vector<1x128xf32>
    %291 = vector.extract_strided_slice %248 {offsets = [24, 0], sizes = [4, 128], strides = [1, 1]} : vector<36x128xf32> to vector<4x128xf32>
    %cst_131 = arith.constant 0.000000e+00 : f32
    %292 = vector.broadcast %cst_131 : f32 to vector<4x7xf32>
    %293 = vector.extract_strided_slice %291 {offsets = [0, 7], sizes = [4, 121], strides = [1, 1]} : vector<4x128xf32> to vector<4x121xf32>
    %294 = tpu.concatenate %293, %292 in 1 : vector<4x121xf32>, vector<4x7xf32> -> vector<4x128xf32>
    %295 = vector.broadcast %290 : vector<1x128xf32> to vector<4x128xf32>
    %296 = arith.mulf %295, %294 : vector<4x128xf32>
    %297 = arith.addf %289, %296 : vector<4x128xf32>
    %c7_132 = arith.constant 7 : index
    %c0_133 = arith.constant 0 : index
    %298 = vector.load %arg6[%c7_132, %c0_133] : memref<9x128xf32, #tpu.memory_space<vmem>>, vector<1x128xf32>
    %299 = vector.extract_strided_slice %248 {offsets = [28, 0], sizes = [4, 128], strides = [1, 1]} : vector<36x128xf32> to vector<4x128xf32>
    %cst_134 = arith.constant 0.000000e+00 : f32
    %300 = vector.broadcast %cst_134 : f32 to vector<4x8xf32>
    %301 = vector.extract_strided_slice %299 {offsets = [0, 8], sizes = [4, 120], strides = [1, 1]} : vector<4x128xf32> to vector<4x120xf32>
    %302 = tpu.concatenate %301, %300 in 1 : vector<4x120xf32>, vector<4x8xf32> -> vector<4x128xf32>
    %303 = vector.broadcast %298 : vector<1x128xf32> to vector<4x128xf32>
    %304 = arith.mulf %303, %302 : vector<4x128xf32>
    %305 = arith.addf %297, %304 : vector<4x128xf32>
    %c8_135 = arith.constant 8 : index
    %c0_136 = arith.constant 0 : index
    %306 = vector.load %arg6[%c8_135, %c0_136] : memref<9x128xf32, #tpu.memory_space<vmem>>, vector<1x128xf32>
    %307 = vector.extract_strided_slice %248 {offsets = [32, 0], sizes = [4, 128], strides = [1, 1]} : vector<36x128xf32> to vector<4x128xf32>
    %cst_137 = arith.constant 0.000000e+00 : f32
    %308 = vector.broadcast %cst_137 : f32 to vector<4x9xf32>
    %309 = vector.extract_strided_slice %307 {offsets = [0, 9], sizes = [4, 119], strides = [1, 1]} : vector<4x128xf32> to vector<4x119xf32>
    %310 = tpu.concatenate %309, %308 in 1 : vector<4x119xf32>, vector<4x9xf32> -> vector<4x128xf32>
    %311 = vector.broadcast %306 : vector<1x128xf32> to vector<4x128xf32>
    %312 = arith.mulf %311, %310 : vector<4x128xf32>
    %313 = arith.addf %305, %312 : vector<4x128xf32>
    %c16 = arith.constant 16 : index
    %c0_138 = arith.constant 0 : index
    %314 = vector.load %arg8[%c16, %c0_138] : memref<24x128xf32, #tpu.memory_space<vmem>>, vector<4x128xf32>
    tpu.vector_store %arg8[%c16, %c0_138], %313 {strides = array<i32>} : memref<24x128xf32, #tpu.memory_space<vmem>>, vector<4x128xf32>,
    %c0_139 = arith.constant 0 : index
    %c7_140 = arith.constant 7 : index
    %315 = vector.load %arg3[%c0_139, %c7_140] : memref<20x10xf32, #tpu.memory_space<vmem>>, vector<20x1xf32>
    %c0_141 = arith.constant 0 : index
    %c8_142 = arith.constant 8 : index
    %316 = vector.load %arg3[%c0_141, %c8_142] : memref<20x10xf32, #tpu.memory_space<vmem>>, vector<20x1xf32>
    %c0_143 = arith.constant 0 : index
    %c0_144 = arith.constant 0 : index
    %317 = vector.load %arg8[%c0_143, %c0_144] : memref<24x128xf32, #tpu.memory_space<vmem>>, vector<20x128xf32>
    %318 = vector.broadcast %315 : vector<20x1xf32> to vector<20x128xf32>
    %319 = arith.mulf %317, %318 : vector<20x128xf32>
    %320 = vector.broadcast %316 : vector<20x1xf32> to vector<20x128xf32>
    %321 = arith.addf %319, %320 : vector<20x128xf32>
    %cst_145 = arith.constant 0.000000e+00 : f32
    %322 = vector.broadcast %cst_145 : f32 to vector<20x128xf32>
    %323 = arith.maximumf %321, %322 : vector<20x128xf32>
    %c192 = arith.constant 192 : index
    %c0_146 = arith.constant 0 : index
    %324 = vector.load %arg2[%c192, %c0_146] : memref<248x20xf32, #tpu.memory_space<vmem>>, vector<36x20xf32>
    %cst_147 = arith.constant dense<0.000000e+00> : vector<36x128xf32>
    %325 = tpu.matmul %324, %323, %cst_147 {dimension_numbers = #tpu.dot_dimension_numbers<[1], [0], [0], [1], [0, 0, 1, 1], [], []>} : vector<36x20xf32>, vector<20x128xf32>, vector<36x128xf32> -> vector<36x128xf32>
    %326 = vector.extract_strided_slice %325 {offsets = [16, 0], sizes = [4, 128], strides = [1, 1]} : vector<36x128xf32> to vector<4x128xf32>
    %c0_148 = arith.constant 0 : index
    %c0_149 = arith.constant 0 : index
    %327 = vector.load %arg6[%c0_148, %c0_149] : memref<9x128xf32, #tpu.memory_space<vmem>>, vector<1x128xf32>
    %328 = vector.extract_strided_slice %325 {offsets = [0, 0], sizes = [4, 128], strides = [1, 1]} : vector<36x128xf32> to vector<4x128xf32>
    %cst_150 = arith.constant 0.000000e+00 : f32
    %329 = vector.broadcast %cst_150 : f32 to vector<4x9xf32>
    %330 = vector.extract_strided_slice %328 {offsets = [0, 0], sizes = [4, 119], strides = [1, 1]} : vector<4x128xf32> to vector<4x119xf32>
    %331 = tpu.concatenate %329, %330 in 1 : vector<4x9xf32>, vector<4x119xf32> -> vector<4x128xf32>
    %332 = vector.broadcast %327 : vector<1x128xf32> to vector<4x128xf32>
    %333 = arith.mulf %332, %331 : vector<4x128xf32>
    %334 = arith.addf %326, %333 : vector<4x128xf32>
    %c1_151 = arith.constant 1 : index
    %c0_152 = arith.constant 0 : index
    %335 = vector.load %arg6[%c1_151, %c0_152] : memref<9x128xf32, #tpu.memory_space<vmem>>, vector<1x128xf32>
    %336 = vector.extract_strided_slice %325 {offsets = [4, 0], sizes = [4, 128], strides = [1, 1]} : vector<36x128xf32> to vector<4x128xf32>
    %cst_153 = arith.constant 0.000000e+00 : f32
    %337 = vector.broadcast %cst_153 : f32 to vector<4x8xf32>
    %338 = vector.extract_strided_slice %336 {offsets = [0, 0], sizes = [4, 120], strides = [1, 1]} : vector<4x128xf32> to vector<4x120xf32>
    %339 = tpu.concatenate %337, %338 in 1 : vector<4x8xf32>, vector<4x120xf32> -> vector<4x128xf32>
    %340 = vector.broadcast %335 : vector<1x128xf32> to vector<4x128xf32>
    %341 = arith.mulf %340, %339 : vector<4x128xf32>
    %342 = arith.addf %334, %341 : vector<4x128xf32>
    %c2_154 = arith.constant 2 : index
    %c0_155 = arith.constant 0 : index
    %343 = vector.load %arg6[%c2_154, %c0_155] : memref<9x128xf32, #tpu.memory_space<vmem>>, vector<1x128xf32>
    %344 = vector.extract_strided_slice %325 {offsets = [8, 0], sizes = [4, 128], strides = [1, 1]} : vector<36x128xf32> to vector<4x128xf32>
    %cst_156 = arith.constant 0.000000e+00 : f32
    %345 = vector.broadcast %cst_156 : f32 to vector<4x7xf32>
    %346 = vector.extract_strided_slice %344 {offsets = [0, 0], sizes = [4, 121], strides = [1, 1]} : vector<4x128xf32> to vector<4x121xf32>
    %347 = tpu.concatenate %345, %346 in 1 : vector<4x7xf32>, vector<4x121xf32> -> vector<4x128xf32>
    %348 = vector.broadcast %343 : vector<1x128xf32> to vector<4x128xf32>
    %349 = arith.mulf %348, %347 : vector<4x128xf32>
    %350 = arith.addf %342, %349 : vector<4x128xf32>
    %c3_157 = arith.constant 3 : index
    %c0_158 = arith.constant 0 : index
    %351 = vector.load %arg6[%c3_157, %c0_158] : memref<9x128xf32, #tpu.memory_space<vmem>>, vector<1x128xf32>
    %352 = vector.extract_strided_slice %325 {offsets = [12, 0], sizes = [4, 128], strides = [1, 1]} : vector<36x128xf32> to vector<4x128xf32>
    %cst_159 = arith.constant 0.000000e+00 : f32
    %353 = vector.broadcast %cst_159 : f32 to vector<4x1xf32>
    %354 = vector.extract_strided_slice %352 {offsets = [0, 0], sizes = [4, 127], strides = [1, 1]} : vector<4x128xf32> to vector<4x127xf32>
    %355 = tpu.concatenate %353, %354 in 1 : vector<4x1xf32>, vector<4x127xf32> -> vector<4x128xf32>
    %356 = vector.broadcast %351 : vector<1x128xf32> to vector<4x128xf32>
    %357 = arith.mulf %356, %355 : vector<4x128xf32>
    %358 = arith.addf %350, %357 : vector<4x128xf32>
    %c5_160 = arith.constant 5 : index
    %c0_161 = arith.constant 0 : index
    %359 = vector.load %arg6[%c5_160, %c0_161] : memref<9x128xf32, #tpu.memory_space<vmem>>, vector<1x128xf32>
    %360 = vector.extract_strided_slice %325 {offsets = [20, 0], sizes = [4, 128], strides = [1, 1]} : vector<36x128xf32> to vector<4x128xf32>
    %cst_162 = arith.constant 0.000000e+00 : f32
    %361 = vector.broadcast %cst_162 : f32 to vector<4x1xf32>
    %362 = vector.extract_strided_slice %360 {offsets = [0, 1], sizes = [4, 127], strides = [1, 1]} : vector<4x128xf32> to vector<4x127xf32>
    %363 = tpu.concatenate %362, %361 in 1 : vector<4x127xf32>, vector<4x1xf32> -> vector<4x128xf32>
    %364 = vector.broadcast %359 : vector<1x128xf32> to vector<4x128xf32>
    %365 = arith.mulf %364, %363 : vector<4x128xf32>
    %366 = arith.addf %358, %365 : vector<4x128xf32>
    %c6_163 = arith.constant 6 : index
    %c0_164 = arith.constant 0 : index
    %367 = vector.load %arg6[%c6_163, %c0_164] : memref<9x128xf32, #tpu.memory_space<vmem>>, vector<1x128xf32>
    %368 = vector.extract_strided_slice %325 {offsets = [24, 0], sizes = [4, 128], strides = [1, 1]} : vector<36x128xf32> to vector<4x128xf32>
    %cst_165 = arith.constant 0.000000e+00 : f32
    %369 = vector.broadcast %cst_165 : f32 to vector<4x7xf32>
    %370 = vector.extract_strided_slice %368 {offsets = [0, 7], sizes = [4, 121], strides = [1, 1]} : vector<4x128xf32> to vector<4x121xf32>
    %371 = tpu.concatenate %370, %369 in 1 : vector<4x121xf32>, vector<4x7xf32> -> vector<4x128xf32>
    %372 = vector.broadcast %367 : vector<1x128xf32> to vector<4x128xf32>
    %373 = arith.mulf %372, %371 : vector<4x128xf32>
    %374 = arith.addf %366, %373 : vector<4x128xf32>
    %c7_166 = arith.constant 7 : index
    %c0_167 = arith.constant 0 : index
    %375 = vector.load %arg6[%c7_166, %c0_167] : memref<9x128xf32, #tpu.memory_space<vmem>>, vector<1x128xf32>
    %376 = vector.extract_strided_slice %325 {offsets = [28, 0], sizes = [4, 128], strides = [1, 1]} : vector<36x128xf32> to vector<4x128xf32>
    %cst_168 = arith.constant 0.000000e+00 : f32
    %377 = vector.broadcast %cst_168 : f32 to vector<4x8xf32>
    %378 = vector.extract_strided_slice %376 {offsets = [0, 8], sizes = [4, 120], strides = [1, 1]} : vector<4x128xf32> to vector<4x120xf32>
    %379 = tpu.concatenate %378, %377 in 1 : vector<4x120xf32>, vector<4x8xf32> -> vector<4x128xf32>
    %380 = vector.broadcast %375 : vector<1x128xf32> to vector<4x128xf32>
    %381 = arith.mulf %380, %379 : vector<4x128xf32>
    %382 = arith.addf %374, %381 : vector<4x128xf32>
    %c8_169 = arith.constant 8 : index
    %c0_170 = arith.constant 0 : index
    %383 = vector.load %arg6[%c8_169, %c0_170] : memref<9x128xf32, #tpu.memory_space<vmem>>, vector<1x128xf32>
    %384 = vector.extract_strided_slice %325 {offsets = [32, 0], sizes = [4, 128], strides = [1, 1]} : vector<36x128xf32> to vector<4x128xf32>
    %cst_171 = arith.constant 0.000000e+00 : f32
    %385 = vector.broadcast %cst_171 : f32 to vector<4x9xf32>
    %386 = vector.extract_strided_slice %384 {offsets = [0, 9], sizes = [4, 119], strides = [1, 1]} : vector<4x128xf32> to vector<4x119xf32>
    %387 = tpu.concatenate %386, %385 in 1 : vector<4x119xf32>, vector<4x9xf32> -> vector<4x128xf32>
    %388 = vector.broadcast %383 : vector<1x128xf32> to vector<4x128xf32>
    %389 = arith.mulf %388, %387 : vector<4x128xf32>
    %390 = arith.addf %382, %389 : vector<4x128xf32>
    %c20 = arith.constant 20 : index
    %c0_172 = arith.constant 0 : index
    %391 = vector.load %arg8[%c20, %c0_172] : memref<24x128xf32, #tpu.memory_space<vmem>>, vector<4x128xf32>
    tpu.vector_store %arg8[%c20, %c0_172], %390 {strides = array<i32>} : memref<24x128xf32, #tpu.memory_space<vmem>>, vector<4x128xf32>,
    return
  }
  func.func @transform_0(%arg0: i32) -> (i32, i32) {
    %c0_i32 = arith.constant 0 : i32
    %c0_i32_0 = arith.constant 0 : i32
    %c0_i32_1 = arith.constant 0 : i32
    return %c0_i32, %c0_i32_0 : i32, i32
  }
  func.func @transform_1(%arg0: i32) -> (i32, i32) {
    %c0_i32 = arith.constant 0 : i32
    %c0_i32_0 = arith.constant 0 : i32
    %c0_i32_1 = arith.constant 0 : i32
    return %c0_i32, %c0_i32_0 : i32, i32
  }
  func.func @transform_2(%arg0: i32) -> (i32, i32) {
    %c0_i32 = arith.constant 0 : i32
    %c0_i32_0 = arith.constant 0 : i32
    %c0_i32_1 = arith.constant 0 : i32
    return %c0_i32, %c0_i32_0 : i32, i32
  }
  func.func @transform_3(%arg0: i32) -> (i32, i32) {
    %c0_i32 = arith.constant 0 : i32
    %c0_i32_0 = arith.constant 0 : i32
    %c0_i32_1 = arith.constant 0 : i32
    return %c0_i32, %c0_i32_0 : i32, i32
  }
  func.func @transform_4(%arg0: i32) -> (i32, i32) {
    %c0_i32 = arith.constant 0 : i32
    %c0_i32_0 = arith.constant 0 : i32
    %c0_i32_1 = arith.constant 0 : i32
    return %c0_i32, %c0_i32_0 : i32, i32
  }
  func.func @transform_5(%arg0: i32) -> (i32, i32) {
    %c0_i32 = arith.constant 0 : i32
    %c0_i32_0 = arith.constant 0 : i32
    %c0_i32_1 = arith.constant 0 : i32
    return %c0_i32, %c0_i32_0 : i32, i32
  }
  func.func @transform_6(%arg0: i32) -> (i32, i32) {
    %c0_i32 = arith.constant 0 : i32
    %c0_i32_0 = arith.constant 0 : i32
    %c0_i32_1 = arith.constant 0 : i32
    return %c0_i32, %c0_i32_0 : i32, i32
  }
  func.func @transform_7(%arg0: i32) -> (i32, i32) {
    %c0_i32 = arith.constant 0 : i32
    %c0_i32_0 = arith.constant 0 : i32
    %c0_i32_1 = arith.constant 0 : i32
    return %c0_i32, %c0_i32_0 : i32, i32
  }
}

</mosaic_0001>

<bundles_post_ra>
// kernel: densenet_forward.1
= control target key start
LH: loop header
LB: loop body
LE: loop exit
PB: predicated region body
PF: predicated region fallthrough
CT: control target
= control target key end

     0   :  { %vm68_vm0 = vcmask 1042432   ;;  %v4882_v2 = vmov 0.0   ;;  %v3326_v5 = vmov 0   ;;  %vm40_vm1 = vcmask 23552   ;;  %s3329_s24 = smov 17   ;;  %s3330_s25 = smov 16   ;;  %s4874_s0 = inlined_call_operand.vmem [shape: f32[3,512], index: 0, kind: input, shape index: {}]   ;;  %s4875_s1 = inlined_call_operand.vmem [shape: f32[248,20], index: 1, kind: input, shape index: {}]   ;;  %s4876_s2 = inlined_call_operand.vmem [shape: f32[20,10], index: 2, kind: input, shape index: {}]   ;;  %s4877_s4 = inlined_call_operand.vmem [shape: f32[9,512], index: 4, kind: input, shape index: {}]   ;;  %s4878_s3 = inlined_call_operand.vmem [shape: f32[512,128], index: 3, kind: input, shape index: {}]   ;;  %s4879_s6 = inlined_call_operand.vmem [shape: f32[16,128], index: 6, kind: output, shape index: {0}]   ;;  %s4880_s7 = inlined_call_operand.vmem [shape: f32[24,128], index: 7, kind: output, shape index: {1}]   ;;  %s4881_s5 = inlined_call_operand.vmem [shape: f32[9,128], index: 5, kind: input, shape index: {}]  }
   0x1   :  { %v25_v0 = vld [vmem:[%s4874_s0] sm:$0x77]  ;;  %v26_v1 = vld [vmem:[%s4874_s0 + $0x8] sm:$0x77]  ;;  %141 = vmatprep.mubr.f32.mxu0 %v4882_v2  ;;  %260 = vmatprep.mubr.f32.mxu1 %v4882_v2  ;;  %v29_v9 = vld [vmem:[%s4875_s1 + $0x10] sm:$0xff]  ;;  %v3327_v16 = vmov 1  }
   0x2   :  { %v38_v3 = vcombine.high %v25_v0, %v25_v0  ;;  %v39_v4 = vcombine.high %v26_v1, %v26_v1  ;;  %3305 = vset.pattern.permute.xlu1 %v3326_v5  ;;  %v27_v6 = vld [vmem:[%s4875_s1] sm:$0xff]  ;;  %v28_v8 = vld [vmem:[%s4875_s1 + $0x8] sm:$0xff]  ;;  %v30_v10 = vld [vmem:[%s4875_s1 + $0x18] sm:$0xff]  ;;  %v3328_v17 = vmov 2   ;;  %s3331_s26 = smov 15   ;;  %s3332_s27 = smov 1  }
   0x3   :  { %v3407_v7 = vld [vmem:[%s4876_s2] sm:$0xff]  ;;  %v32_v12 = vld [vmem:[%s4875_s1 + $0x28] sm:$0xff]  ;;  %v33_v13 = vld [vmem:[%s4875_s1 + $0x30] sm:$0xff]  ;;  %3307 = vset.pattern.permute.xlu0 %v3328_v17  ;;  %s3333_s28 = smov 127   ;;  %s3334_s29 = smov 113   ;;  %vm328_vm2 = vcmask 138240  }
   0x4   :  { %2953 = vmatprep.subr.msk.mxu0 %vm68_vm0, %v38_v3  ;;  %2964 = vmatprep.subr.msk.mxu1 %vm68_vm0, %v39_v4  ;;  %v31_v11 = vld [vmem:[%s4875_s1 + $0x20] sm:$0xff]  ;;  %v34_v14 = vld [vmem:[%s4875_s1 + $0x38] sm:$0xff]  ;;  %s3335_s30 = smov 112   ;;  %s3336_s0 = smov 111   ;;  %vm380_vm3 = vcmask 130048   ;;  %vm432_vm4 = vcmask 121856  }
   0x5   :  { %2954 = vmatpush1.msk.msra.mxu0 %vm68_vm0, %v25_v0  ;;  %2965 = vmatpush1.msk.msra.mxu1 %vm68_vm0, %v26_v1  ;;  %v35_v15 = vld [vmem:[%s4875_s1 + $0x40] sm:$0xff]  ;;  %v338_v1 = vlaneseq  ;;  %vm484_vm5 = vcmask 7168   ;;  %vm536_vm6 = vcmask 1039360   ;;  %vm588_vm7 = vcmask 924672   ;;  %s3346_s23 = smov 9   ;;  %s3347_s8 = smov 8  }
   0x6   :  { %2955 = vmatmul.mubr.msk.f32.vlgmr.msra.gmra.mrb[0].mxu0 %vm40_vm1, %v27_v6  ;;  %2966 = vmatmul.mubr.msk.f32.vlgmr.msra.gmra.mrb[0].mxu1 %vm40_vm1, %v27_v6  ;;  %vm640_vm8 = vcmask 916480   ;;  %vm692_vm9 = vcmask 908288   ;;  %vm779_vm10 = vcmask 64512   ;;  %vm1482_vm11 = vcmask 1043456   ;;  %s3348_s9 = smov 7   ;;  %s3349_s10 = smov 120  }
   0x7   :  { %147 = vmatprep.mubr.f32.mxu0 %v4882_v2  ;;  %266 = vmatprep.mubr.f32.mxu1 %v4882_v2  ;;  %v339_v5 = vshrl.u32 %v338_v1, 7  ;;  %vm3339_vm12 = vmmov 1   ;;  %vm1466_vm14 = vcmask 97280   ;;  %vm3344_vm15 = vmmov 0   ;;  %s3350_s11 = smov 121   ;;  %s3352_s12 = smov 119  }
   0x8   :  { %733 = vperm.xlu1 %3305, %v3407_v7   ;;  %vm4145_vm13 = vmpackc.low %vm1482_vm11, %vm3339_vm12  ;;  %vm2585_vm0 = vcmask 72704  }
   0xa   :  { %2956 = vmatmul.mubr.msk.f32.gmra.mrb[2].mxu0 %vm40_vm1, %v28_v8  ;;  %2967 = vmatmul.mubr.msk.f32.gmra.mrb[2].mxu1 %vm40_vm1, %v28_v8 }
   0xb   :  { %153 = vmatprep.mubr.f32.mxu0 %v4882_v2  ;;  %272 = vmatprep.mubr.f32.mxu1 %v4882_v2 }
   0xc   :  { %3306 = vset.pattern.permute.xlu1 %v3327_v16  ;;  %v3554_v16 = vld [vmem:[%s4877_s4 + $0x1] ss:$8 sm:$0xf] }
   0xe   :  { %2957 = vmatmul.mubr.msk.f32.gmra.mrb[4].mxu0 %vm40_vm1, %v29_v9  ;;  %2968 = vmatmul.mubr.msk.f32.gmra.mrb[4].mxu1 %vm40_vm1, %v29_v9  ;;  %v3536_v9 = vsub.s32 0, %v339_v5 }
   0xf   :  { %159 = vmatprep.mubr.f32.mxu0 %v4882_v2  ;;  %278 = vmatprep.mubr.f32.mxu1 %v4882_v2 }
  0x12   :  { %2958 = vmatmul.mubr.msk.f32.gmra.mrb[6].mxu0 %vm40_vm1, %v30_v10  ;;  %2969 = vmatmul.mubr.msk.f32.gmra.mrb[6].mxu1 %vm40_vm1, %v30_v10  ;;  %v3538_v10 = vsub.s32 3, %v339_v5 }
  0x13   :  { %165 = vmatprep.mubr.f32.mxu0 %v4882_v2  ;;  %284 = vmatprep.mubr.f32.mxu1 %v4882_v2 }
  0x16   :  { %2959 = vmatmul.mubr.msk.f32.gmra.mrb[8].mxu0 %vm40_vm1, %v31_v11  ;;  %2970 = vmatmul.mubr.msk.f32.gmra.mrb[8].mxu1 %vm40_vm1, %v31_v11  ;;  %v315_v11 = vld [vmem:[%s4877_s4] ss:$8 sm:$0xf] }
  0x17   :  { %171 = vmatprep.mubr.f32.mxu0 %v4882_v2  ;;  %290 = vmatprep.mubr.f32.mxu1 %v4882_v2  ;;  %v341_v17 = vrot.slane %v315_v11, %v3536_v9 }
  0x1a   :  { %2960 = vmatmul.mubr.msk.f32.gmra.mrb[10].mxu0 %vm40_vm1, %v32_v12  ;;  %2971 = vmatmul.mubr.msk.f32.gmra.mrb[10].mxu1 %vm40_vm1, %v32_v12  ;;  %v3543_v12 = vsub.s32 1, %v339_v5 }
  0x1b   :  { %177 = vmatprep.mubr.f32.mxu0 %v4882_v2  ;;  %296 = vmatprep.mubr.f32.mxu1 %v4882_v2 }
  0x1e   :  { %2961 = vmatmul.mubr.msk.f32.gmra.mrb[12].mxu0 %vm40_vm1, %v33_v13  ;;  %2972 = vmatmul.mubr.msk.f32.gmra.mrb[12].mxu1 %vm40_vm1, %v33_v13  ;;  %v3545_v13 = vsub.s32 2, %v339_v5 }
  0x1f   :  { %183 = vmatprep.mubr.f32.mxu0 %v4882_v2  ;;  %302 = vmatprep.mubr.f32.mxu1 %v4882_v2 }
  0x22   :  { %2962 = vmatmul.mubr.msk.f32.gmra.mrb[14].mxu0 %vm40_vm1, %v34_v14  ;;  %2973 = vmatmul.mubr.msk.f32.gmra.mrb[14].mxu1 %vm40_vm1, %v34_v14 }
  0x23   :  { %189 = vmatprep.mubr.f32.mxu0 %v4882_v2  ;;  %308 = vmatprep.mubr.f32.mxu1 %v4882_v2 }
  0x26   :  { %2963 = vmatmul.mubr.msk.f32.gmra.mrb[16].mxu0 %vm40_vm1, %v35_v15  ;;  %2974 = vmatmul.mubr.msk.f32.gmra.mrb[16].mxu1 %vm40_vm1, %v35_v15  ;;  %vm2610_vm1 = vcmask 56320  }
  0x27   :  { %954 = vmatprep.mubr.f32.mxu1 %v4882_v2  ;;  %859 = vmatprep.mubr.f32.mxu0 %v4882_v2 }
  0x87   :  { %v3512_v54 = vpop.permute.xlu1 %733 }
  0xd9   :  { %v143_v18 = vpop.f32.mrb[0].mxu0  ;;  %v262_v19 = vpop.f32.mrb[0].mxu1 }
  0xda   :  { %324 = vrot.lane.b32.xlu1 %v262_v19, %s3329_s24  ;;  %320 = vrot.lane.b32.xlu0 %v143_v18, %s3329_s24  ;;  %v145_v20 = vpop.f32.mrb[1].mxu0  ;;  %v264_v21 = vpop.f32.mrb[1].mxu1  ;;  %v353_v18 = vrot.slane %v315_v11, %v3538_v10  ;;  %v3561_v19 = vld [vmem:[%s4877_s4 + $0x2] ss:$8 sm:$0xf] }
  0xdd   :  { %v149_v22 = vpop.f32.mrb[2].mxu0  ;;  %v268_v23 = vpop.f32.mrb[2].mxu1 }
  0xde   :  { %326 = vrot.lane.b32.xlu1 %v264_v21, %s3329_s24  ;;  %322 = vrot.lane.b32.xlu0 %v145_v20, %s3329_s24  ;;  %v151_v24 = vpop.f32.mrb[3].mxu0  ;;  %v270_v25 = vpop.f32.mrb[3].mxu1  ;;  %v345_v20 = vrot.slane %v315_v11, %v3543_v12  ;;  %v349_v21 = vrot.slane %v315_v11, %v3545_v13 }
  0xe1   :  { %v155_v26 = vpop.f32.mrb[4].mxu0  ;;  %v274_v27 = vpop.f32.mrb[4].mxu1 }
  0xe2   :  { %372 = vrot.lane.b32.xlu0 %v149_v22, %s3330_s25  ;;  %374 = vrot.lane.b32.xlu1 %v151_v24, %s3330_s25  ;;  %v157_v28 = vpop.f32.mrb[5].mxu0  ;;  %v276_v29 = vpop.f32.mrb[5].mxu1  ;;  %v393_v22 = vrot.slane %v3554_v16, %v3536_v9 }
  0xe5   :  { %v161_v30 = vpop.f32.mrb[6].mxu0  ;;  %v280_v31 = vpop.f32.mrb[6].mxu1 }
  0xe6   :  { %376 = vrot.lane.b32.xlu0 %v268_v23, %s3330_s25  ;;  %378 = vrot.lane.b32.xlu1 %v270_v25, %s3330_s25  ;;  %v163_v32 = vpop.f32.mrb[7].mxu0  ;;  %v282_v33 = vpop.f32.mrb[7].mxu1  ;;  %v3570_v23 = vld [vmem:[%s4877_s4 + $0x3] ss:$8 sm:$0xf] }
  0xe9   :  { %v3478_v34 = vpop.f32.mrb[8].mxu0  ;;  %v3480_v35 = vpop.f32.mrb[8].mxu1 }
  0xea   :  { %424 = vrot.lane.b32.xlu0 %v155_v26, %s3331_s26  ;;  %426 = vrot.lane.b32.xlu1 %v157_v28, %s3331_s26  ;;  %v3484_v36 = vpop.f32.mrb[9].mxu0  ;;  %v3486_v37 = vpop.f32.mrb[9].mxu1  ;;  %v397_v26 = vrot.slane %v3554_v16, %v3543_v12  ;;  %v405_v28 = vrot.slane %v3554_v16, %v3538_v10 }
  0xed   :  { %v173_v38 = vpop.f32.mrb[10].mxu0  ;;  %v292_v39 = vpop.f32.mrb[10].mxu1 }
  0xee   :  { %428 = vrot.lane.b32.xlu0 %v274_v27, %s3331_s26  ;;  %430 = vrot.lane.b32.xlu1 %v276_v29, %s3331_s26  ;;  %v175_v40 = vpop.f32.mrb[11].mxu0  ;;  %v294_v41 = vpop.f32.mrb[11].mxu1  ;;  %v401_v27 = vrot.slane %v3554_v16, %v3545_v13  ;;  %v3585_v29 = vld [vmem:[%s4877_s4 + $0x5] ss:$8 sm:$0xf] }
  0xf1   :  { %v179_v42 = vpop.f32.mrb[12].mxu0  ;;  %v298_v43 = vpop.f32.mrb[12].mxu1 }
  0xf2   :  { %476 = vrot.lane.b32.xlu0 %v161_v30, %s3332_s27  ;;  %478 = vrot.lane.b32.xlu1 %v163_v32, %s3332_s27  ;;  %v181_v44 = vpop.f32.mrb[13].mxu0  ;;  %v300_v45 = vpop.f32.mrb[13].mxu1  ;;  %v445_v30 = vrot.slane %v3561_v19, %v3536_v9  ;;  %v453_v32 = vrot.slane %v3561_v19, %v3545_v13 }
  0xf5   :  { %v185_v46 = vpop.f32.mrb[14].mxu0  ;;  %v304_v47 = vpop.f32.mrb[14].mxu1 }
  0xf6   :  { %480 = vrot.lane.b32.xlu0 %v280_v31, %s3332_s27  ;;  %482 = vrot.lane.b32.xlu1 %v282_v33, %s3332_s27  ;;  %v187_v48 = vpop.f32.mrb[15].mxu0  ;;  %v306_v49 = vpop.f32.mrb[15].mxu1  ;;  %v449_v31 = vrot.slane %v3561_v19, %v3543_v12  ;;  %v457_v33 = vrot.slane %v3561_v19, %v3538_v10 }
  0xf9   :  { %v191_v50 = vpop.f32.mrb[16].mxu0  ;;  %v310_v51 = vpop.f32.mrb[16].mxu1 }
  0xfa   :  { %532 = vrot.lane.b32.xlu1 %v292_v39, %s3333_s28  ;;  %530 = vrot.lane.b32.xlu0 %v175_v40, %s3333_s28  ;;  %v193_v52 = vpop.f32.mrb[17].mxu0  ;;  %v312_v53 = vpop.f32.mrb[17].mxu1  ;;  %v501_v39 = vrot.slane %v3570_v23, %v3543_v12  ;;  %v505_v40 = vrot.slane %v3570_v23, %v3545_v13 }
  0xfe   :  { %528 = vrot.lane.b32.xlu1 %v173_v38, %s3333_s28  ;;  %534 = vrot.lane.b32.xlu0 %v294_v41, %s3333_s28  ;;  %v497_v38 = vrot.slane %v3570_v23, %v3536_v9  ;;  %v3604_v41 = vld [vmem:[%s4877_s4 + $0x6] ss:$8 sm:$0xf] }
 0x102   :  { %584 = vrot.lane.b32.xlu1 %v298_v43, %s3334_s29  ;;  %582 = vrot.lane.b32.xlu0 %v181_v44, %s3334_s29  ;;  %v509_v44 = vrot.slane %v3570_v23, %v3538_v10 }
 0x106   :  { %580 = vrot.lane.b32.xlu1 %v179_v42, %s3334_s29  ;;  %586 = vrot.lane.b32.xlu0 %v300_v45, %s3334_s29  ;;  %v553_v45 = vrot.slane %v3585_v29, %v3543_v12 }
 0x10a   :  { %632 = vrot.lane.b32.xlu0 %v185_v46, %s3335_s30  ;;  %636 = vrot.lane.b32.xlu1 %v304_v47, %s3335_s30 }
 0x10e   :  { %634 = vrot.lane.b32.xlu0 %v187_v48, %s3335_s30  ;;  %686 = vrot.lane.b32.xlu1 %v193_v52, %s3336_s0  ;;  %v3627_v52 = vld [vmem:[%s4877_s4 + $0x7] ss:$8 sm:$0xf] }
 0x112   :  { %638 = vrot.lane.b32.xlu0 %v306_v49, %s3335_s30  ;;  %690 = vrot.lane.b32.xlu1 %v312_v53, %s3336_s0 }
 0x116   :  { %688 = vrot.lane.b32.xlu0 %v310_v51, %s3336_s0  ;;  %755 = vperm.xlu1 %3306, %v3407_v7   ;;  %v561_v51 = vrot.slane %v3585_v29, %v3538_v10 }
 0x11a   :  { %684 = vrot.lane.b32.xlu0 %v191_v50, %s3336_s0 }
 0x11e   :  { %763 = vperm.xlu0 %3307, %v3407_v7  }
 0x14c   :  { %v3514_v55 = vpop.permute.xlu1 %324  ;;  %v321_v56 = vpop.permute.xlu0 %320 }
 0x14d   :  { %v336_v42 = vsel %vm328_vm2, 0.0, %v321_v56 }
 0x14e   :  { %v358_v5 = vmul.f32 %v341_v17, %v336_v42  ;;  %v3656_v42 = vld [vmem:[%s4877_s4 + $0x20] ss:$8 sm:$0xf] }
 0x150   :  { %v327_v57 = vpop.permute.xlu1 %326  ;;  %v323_v58 = vpop.permute.xlu0 %322 }
 0x151   :  { %v331_v43 = vsel %vm328_vm2, %v3514_v55, %v327_v57  ;;  %v329_v48 = vsel %vm328_vm2, %v321_v56, %v323_v58  ;;  %v330_v53 = vsel %vm328_vm2, %v323_v58, %v3514_v55  ;;  %v613_v57 = vrot.slane %v3604_v41, %v3538_v10 }
 0x152   :  { %v361_v11 = vmul.f32 %v353_v18, %v331_v43  ;;  %v359_v55 = vmul.f32 %v345_v20, %v329_v48  ;;  %v661_v43 = vrot.slane %v3627_v52, %v3545_v13  ;;  %v665_v48 = vrot.slane %v3627_v52, %v3538_v10 }
 0x154   :  { %v3516_v59 = vpop.permute.xlu0 %372  ;;  %v3518_v60 = vpop.permute.xlu1 %374 }
 0x155   :  { %v381_v2 = vsel %vm380_vm3, %v3516_v59, %v3518_v60  ;;  %v388_v17 = vsel %vm380_vm3, 0.0, %v3516_v59  ;;  %v363_v59 = vadd.f32 %v359_v55, %v3484_v36 }
 0x156   :  { %v411_v18 = vmul.f32 %v397_v26, %v381_v2 }
 0x158   :  { %v3520_v61 = vpop.permute.xlu0 %376  ;;  %v3522_v62 = vpop.permute.xlu1 %378 }
 0x159   :  { %v383_v49 = vsel %vm380_vm3, %v3520_v61, %v3522_v62  ;;  %v360_v62 = vmul.f32 %v349_v21, %v330_v53  ;;  %v382_v20 = vsel %vm380_vm3, %v3518_v60, %v3520_v61  ;;  %v362_v21 = vadd.f32 %v358_v5, %v3478_v34 }
 0x15a   :  { %v413_v1 = vmul.f32 %v405_v28, %v383_v49  ;;  %v365_v53 = vadd.f32 %v361_v11, %v3486_v37  ;;  %v717_v61 = vrot.slane %v3656_v42, %v3538_v10  ;;  %v412_v2 = vmul.f32 %v401_v27, %v382_v20 }
 0x15b   :  { %v364_v28 = vadd.f32 %v360_v62, %v3480_v35  ;;  %v410_v49 = vmul.f32 %v393_v22, %v388_v17  ;;  %v415_v5 = vadd.f32 %v411_v18, %v363_v59  ;;  %v709_v59 = vrot.slane %v3656_v42, %v3543_v12 }
 0x15c   :  { %v3524_v63 = vpop.permute.xlu0 %424  ;;  %v3526_v0 = vpop.permute.xlu1 %426  ;;  %v417_v11 = vadd.f32 %v413_v1, %v365_v53 }
 0x15d   :  { %v433_v60 = vsel %vm432_vm4, %v3524_v63, %v3526_v0  ;;  %v440_v36 = vsel %vm432_vm4, 0.0, %v3524_v63  ;;  %v416_v16 = vadd.f32 %v412_v2, %v364_v28 }
 0x15e   :  { %v463_v55 = vmul.f32 %v449_v31, %v433_v60  ;;  %v462_v22 = vmul.f32 %v445_v30, %v440_v36  ;;  %v414_v30 = vadd.f32 %v410_v49, %v362_v21  ;;  %v4886_v36 = vrot.slane %v3604_v41, %v3543_v12 }
 0x160   :  { %v3528_v3 = vpop.permute.xlu0 %428  ;;  %v3530_v4 = vpop.permute.xlu1 %430  ;;  %v466_v53 = vadd.f32 %v462_v22, %v414_v30  ;;  %v4890_v30 = vrot.slane %v3627_v52, %v3536_v9 }
 0x161   :  { %v435_v50 = vsel %vm432_vm4, %v3528_v3, %v3530_v4  ;;  %v434_v26 = vsel %vm432_vm4, %v3526_v0, %v3528_v3 }
 0x162   :  { %v465_v27 = vmul.f32 %v457_v33, %v435_v50  ;;  %v464_v35 = vmul.f32 %v453_v32, %v434_v26  ;;  %v713_v26 = vrot.slane %v3656_v42, %v3545_v13 }
 0x164   :  { %v3532_v6 = vpop.permute.xlu0 %476  ;;  %v3534_v8 = vpop.permute.xlu1 %478  ;;  %v469_v1 = vadd.f32 %v465_v27, %v417_v11  ;;  %v468_v18 = vadd.f32 %v464_v35, %v416_v16 }
 0x165   :  { %v485_v0 = vsel %vm484_vm5, %v3532_v6, %v3534_v8  ;;  %v492_v31 = vsel %vm484_vm5, 0.0, %v3532_v6 }
 0x168   :  { %v3547_v14 = vpop.permute.xlu0 %480  ;;  %v3549_v15 = vpop.permute.xlu1 %482 }
 0x169   :  { %v487_v34 = vsel %vm484_vm5, %v3547_v14, %v3549_v15  ;;  %v486_v3 = vsel %vm484_vm5, %v3534_v8, %v3547_v14  ;;  %v515_v8 = vmul.f32 %v501_v39, %v485_v0  ;;  %v514_v39 = vmul.f32 %v497_v38, %v492_v31 }
 0x16a   :  { %v517_v15 = vmul.f32 %v509_v44, %v487_v34  ;;  %v467_v44 = vadd.f32 %v463_v55, %v415_v5  ;;  %v516_v6 = vmul.f32 %v505_v40, %v486_v3  ;;  %v4884_v40 = vrot.slane %v3585_v29, %v3545_v13 }
 0x16b   :  { %v518_v34 = vadd.f32 %v514_v39, %v466_v53  ;;  %v4887_v5 = vrot.slane %v3604_v41, %v3545_v13  ;;  %v4888_v3 = vrot.slane %v3627_v52, %v3543_v12 }
 0x16c   :  { %v3572_v24 = vpop.permute.xlu1 %532  ;;  %v3574_v25 = vpop.permute.xlu0 %530  ;;  %v521_v62 = vadd.f32 %v517_v15, %v469_v1  ;;  %v519_v60 = vadd.f32 %v515_v8, %v467_v44 }
 0x16d   :  { %v538_v32 = vsel %vm536_vm6, %v3574_v25, %v3572_v24 }
 0x170   :  { %v3613_v46 = vpop.permute.xlu1 %528  ;;  %v3615_v47 = vpop.permute.xlu0 %534 }
 0x171   :  { %v544_v63 = vsel %vm536_vm6, %v3615_v47, 0.0  ;;  %v539_v14 = vsel %vm536_vm6, %v3572_v24, %v3615_v47  ;;  %v567_v24 = vmul.f32 %v553_v45, %v538_v32  ;;  %v537_v47 = vsel %vm536_vm6, %v3613_v46, %v3574_v25 }
 0x172   :  { %v569_v17 = vmul.f32 %v561_v51, %v544_v63  ;;  %v568_v20 = vmul.f32 %v4884_v40, %v539_v14  ;;  %v520_v25 = vadd.f32 %v516_v6, %v468_v18 }
 0x173   :  { %v571_v28 = vadd.f32 %v567_v24, %v519_v60 }
 0x174   :  { %v3643_v58 = vpop.permute.xlu1 %584  ;;  %v3645_v56 = vpop.permute.xlu0 %582  ;;  %v573_v46 = vadd.f32 %v569_v17, %v521_v62 }
 0x175   :  { %v590_v51 = vsel %vm588_vm7, %v3645_v56, %v3643_v58 }
 0x178   :  { %v581_v37 = vpop.permute.xlu1 %580  ;;  %v587_v4 = vpop.permute.xlu0 %586 }
 0x179   :  { %v596_v19 = vsel %vm588_vm7, %v587_v4, 0.0  ;;  %v591_v45 = vsel %vm588_vm7, %v3643_v58, %v587_v4  ;;  %v619_v58 = vmul.f32 %v4886_v36, %v590_v51  ;;  %v572_v4 = vadd.f32 %v568_v20, %v520_v25 }
 0x17a   :  { %v621_v21 = vmul.f32 %v613_v57, %v596_v19  ;;  %v4885_v57 = vrot.slane %v3585_v29, %v3536_v9  ;;  %v589_v27 = vsel %vm588_vm7, %v581_v37, %v3645_v56  ;;  %v620_v11 = vmul.f32 %v4887_v5, %v591_v45 }
 0x17b   :  { %v623_v32 = vadd.f32 %v619_v58, %v571_v28 }
 0x17c   :  { %v633_v33 = vpop.permute.xlu0 %632  ;;  %v637_v50 = vpop.permute.xlu1 %636  ;;  %v566_v49 = vmul.f32 %v4885_v57, %v537_v47  ;;  %v625_v55 = vadd.f32 %v621_v21, %v573_v46  ;;  %v624_v14 = vadd.f32 %v620_v11, %v572_v4 }
 0x17e   :  { %v570_v8 = vadd.f32 %v566_v49, %v518_v34 }
 0x180   :  { %v635_v23 = vpop.permute.xlu0 %634  ;;  %v687_v38 = vpop.permute.xlu1 %686 }
 0x181   :  { %v642_v2 = vsel %vm640_vm8, %v635_v23, %v637_v50  ;;  %v641_v22 = vsel %vm640_vm8, %v633_v33, %v635_v23 }
 0x182   :  { %v671_v29 = vmul.f32 %v4888_v3, %v642_v2  ;;  %v776_v3 = vld [vmem:[%s4875_s1 + $0x58] sm:$0xff] }
 0x184   :  { %v639_v0 = vpop.permute.xlu0 %638  ;;  %v691_v35 = vpop.permute.xlu1 %690  ;;  %v675_v44 = vadd.f32 %v671_v29, %v623_v32  ;;  %v777_v29 = vld [vmem:[%s4875_s1 + $0x60] sm:$0xff] }
 0x185   :  { %v643_v15 = vsel %vm640_vm8, %v637_v50, %v639_v0  ;;  %v648_v63 = vsel %vm640_vm8, %v639_v0, 0.0  ;;  %v700_v16 = vsel %vm692_vm9, %v691_v35, 0.0  ;;  %v4889_v50 = vrot.slane %v3604_v41, %v3536_v9 }
 0x186   :  { %v672_v56 = vmul.f32 %v661_v43, %v643_v15  ;;  %v673_v37 = vmul.f32 %v665_v48, %v648_v63  ;;  %v725_v31 = vmul.f32 %v717_v61, %v700_v16  ;;  %v705_v43 = vrot.slane %v3656_v42, %v3536_v9  ;;  %v778_v15 = vld [vmem:[%s4875_s1 + $0x68] sm:$0xf] }
 0x187   :  { %v618_v1 = vmul.f32 %v4889_v50, %v589_v27  ;;  %v670_v48 = vmul.f32 %v4890_v30, %v641_v22  ;;  %v4891_v0 = vmov 0.0   ;;  %v3337_v63 = vmov 3  }
 0x188   :  { %v677_v33 = vadd.f32 %v673_v37, %v625_v55  ;;  %v689_v19 = vpop.permute.xlu0 %688  ;;  %v676_v17 = vadd.f32 %v672_v56, %v624_v14  ;;  %v774_v55 = vld [vmem:[%s4875_s1 + $0x48] sm:$0xff]  ;;  %3308 = vset.pattern.permute.xlu0 %v3337_v63  ;;  %3309 = vset.pattern.permute.xlu1 %v3337_v63 }
 0x189   :  { %v694_v6 = vsel %vm692_vm9, %v687_v38, %v689_v19  ;;  %v695_v61 = vsel %vm692_vm9, %v689_v19, %v691_v35  ;;  %v622_v62 = vadd.f32 %v618_v1, %v570_v8  ;;  %v775_v35 = vld [vmem:[%s4875_s1 + $0x50] sm:$0xff] }
 0x18a   :  { %v729_v18 = vadd.f32 %v725_v31, %v677_v33  ;;  %v723_v41 = vmul.f32 %v709_v59, %v694_v6  ;;  %v724_v39 = vmul.f32 %v713_v26, %v695_v61 }
 0x18b   :  { %v674_v42 = vadd.f32 %v670_v48, %v622_v62 }
 0x18c   :  { %v739_v24 = vadd.f32 %v3512_v54, %v729_v18  ;;  %v727_v47 = vadd.f32 %v723_v41, %v675_v44  ;;  %v728_v40 = vadd.f32 %v724_v39, %v676_v17  ;;  %v685_v20 = vpop.permute.xlu0 %684 }
 0x18d   :  { %v693_v51 = vsel %vm692_vm9, %v685_v20, %v687_v38 }
 0x18e   :  { %v3783_v52 = vmax.f32 %v739_v24, 0.0  ;;  %v737_v21 = vadd.f32 %v3512_v54, %v727_v47  ;;  %v738_v23 = vadd.f32 %v3512_v54, %v728_v40  ;;  %v722_v53 = vmul.f32 %v705_v43, %v693_v51  ;;  %v1410_v51 = vld [vmem:[%s4876_s2 + $0x8] sm:$0xf] }
 0x190   :  { %v3787_v60 = vmax.f32 %v737_v21, 0.0  ;;  %v3789_v45 = vmax.f32 %v738_v23, 0.0  ;;  %v726_v59 = vadd.f32 %v722_v53, %v674_v42  ;;  %v3338_v21 = vmov 4  }
 0x192   :  { %746 = vst [vmem:[#allocation2 + $0x10] sm:$0xff] %v3789_v45  ;;  %v736_v25 = vadd.f32 %v3512_v54, %v726_v59 }
 0x194   :  { %v3793_v46 = vmax.f32 %v736_v25, 0.0 }
 0x195   :  { %v756_v2 = vpop.permute.xlu1 %755 }
 0x196   :  { %v758_v38 = vmul.f32 %v756_v2, %v3793_v46  ;;  %v760_v26 = vmul.f32 %v756_v2, %v3789_v45  ;;  %v759_v34 = vmul.f32 %v756_v2, %v3787_v60  ;;  %v761_v28 = vmul.f32 %v756_v2, %v3783_v52 }
 0x19d   :  { %v764_v57 = vpop.permute.xlu0 %763 }
 0x19e   :  { %v766_v49 = vadd.f32 %v764_v57, %v758_v38  ;;  %v768_v36 = vadd.f32 %v764_v57, %v760_v26  ;;  %v767_v58 = vadd.f32 %v764_v57, %v759_v34  ;;  %v769_v4 = vadd.f32 %v764_v57, %v761_v28 }
 0x1a0   :  { %v770_v27 = vmax.f32 %v766_v49, 0.0  ;;  %v772_v5 = vmax.f32 %v768_v36, 0.0  ;;  %v771_v11 = vmax.f32 %v767_v58, 0.0  ;;  %v773_v54 = vmax.f32 %v769_v4, 0.0 }
 0x1a1   :  { %v985_v4 = vld [vmem:[%s4877_s4] ss:$8 sm:$0xf] }
 0x1a2   :  { %795 = vmatprep.subr.mxu0 %v771_v11  ;;  %890 = vmatprep.subr.mxu1 %v773_v54  ;;  %v3918_v54 = vld [vmem:[%s4877_s4 + $0x2] ss:$8 sm:$0xf]  ;;  %v1022_v63 = vrot.slane %v985_v4, %v3538_v10 }
 0x1a3   :  { %891 = vmatpush1.msra.mxu1 %v772_v5  ;;  %796 = vmatpush1.msra.mxu0 %v770_v27  ;;  %v3909_v27 = vld [vmem:[%s4877_s4 + $0x1] ss:$8 sm:$0xf] }
 0x1a4   :  { %2987 = vmatmul.mubr.msk.f32.vlgmr.msra.gmra.mrb[18].mxu1 %vm779_vm10, %v774_v55  ;;  %2982 = vmatmul.mubr.msk.f32.vlgmr.msra.gmra.mrb[18].mxu0 %vm779_vm10, %v774_v55  ;;  %v3923_v55 = vld [vmem:[%s4877_s4 + $0x3] ss:$8 sm:$0xf] }
 0x1a5   :  { %865 = vmatprep.mubr.f32.mxu0 %v4891_v0  ;;  %960 = vmatprep.mubr.f32.mxu1 %v4891_v0 }
 0x1a8   :  { %2983 = vmatmul.mubr.msk.f32.gmra.mrb[20].mxu0 %vm779_vm10, %v775_v35  ;;  %2988 = vmatmul.mubr.msk.f32.gmra.mrb[20].mxu1 %vm779_vm10, %v775_v35  ;;  %v1010_v35 = vrot.slane %v985_v4, %v3536_v9 }
 0x1a9   :  { %871 = vmatprep.mubr.f32.mxu0 %v4891_v0  ;;  %966 = vmatprep.mubr.f32.mxu1 %v4891_v0 }
 0x1ac   :  { %2984 = vmatmul.mubr.msk.f32.gmra.mrb[22].mxu0 %vm779_vm10, %v776_v3  ;;  %2989 = vmatmul.mubr.msk.f32.gmra.mrb[22].mxu1 %vm779_vm10, %v776_v3  ;;  %v1060_v3 = vrot.slane %v3909_v27, %v3536_v9 }
 0x1ad   :  { %972 = vmatprep.mubr.f32.mxu1 %v4891_v0  ;;  %877 = vmatprep.mubr.f32.mxu0 %v4891_v0 }
 0x1b0   :  { %2990 = vmatmul.mubr.msk.f32.gmra.mrb[24].mxu1 %vm779_vm10, %v777_v29  ;;  %2985 = vmatmul.mubr.msk.f32.gmra.mrb[24].mxu0 %vm779_vm10, %v777_v29  ;;  %v1014_v29 = vrot.slane %v985_v4, %v3543_v12 }
 0x1b1   :  { %883 = vmatprep.mubr.f32.mxu0 %v4891_v0  ;;  %978 = vmatprep.mubr.f32.mxu1 %v4891_v0 }
 0x1b4   :  { %2986 = vmatmul.mubr.msk.f32.gmra.mrb[26].mxu0 %vm779_vm10, %v778_v15  ;;  %2991 = vmatmul.mubr.msk.f32.gmra.mrb[26].mxu1 %vm779_vm10, %v778_v15  ;;  %v1018_v15 = vrot.slane %v985_v4, %v3545_v13 }
 0x1b5   :  { %1559 = vmatprep.mubr.f32.mxu0 %v4891_v0  ;;  %1654 = vmatprep.mubr.f32.mxu1 %v4891_v0 }
 0x277   :  { %v956_v16 = vpop.f32.mrb[18].mxu1  ;;  %v861_v22 = vpop.f32.mrb[18].mxu0 }
 0x278   :  { %994 = vrot.lane.b32.xlu0 %v956_v16, %s3329_s24  ;;  %990 = vrot.lane.b32.xlu1 %v861_v22, %s3329_s24  ;;  %v863_v56 = vpop.f32.mrb[19].mxu0  ;;  %v958_v37 = vpop.f32.mrb[19].mxu1  ;;  %v1036_v31 = vrot.slane %v861_v22, 4  ;;  %v1038_v1 = vrot.slane %v956_v16, 4  ;;  %v1110_v16 = vrot.slane %v3918_v54, %v3536_v9  ;;  %v1064_v22 = vrot.slane %v3909_v27, %v3543_v12 }
 0x279   :  { %v1037_v48 = vrot.slane %v863_v56, 4  ;;  %v1039_v18 = vrot.slane %v958_v37, 4 }
 0x27b   :  { %v867_v32 = vpop.f32.mrb[20].mxu0  ;;  %v962_v50 = vpop.f32.mrb[20].mxu1 }
 0x27c   :  { %1040 = vrot.lane.b32.xlu0 %v1036_v31, %s3330_s25  ;;  %992 = vrot.lane.b32.xlu1 %v863_v56, %s3329_s24  ;;  %v869_v8 = vpop.f32.mrb[21].mxu0  ;;  %v964_v14 = vpop.f32.mrb[21].mxu1  ;;  %v1136_v62 = vrot.slane %v867_v32, 4  ;;  %v1138_v40 = vrot.slane %v962_v50, 4  ;;  %v1068_v56 = vrot.slane %v3909_v27, %v3545_v13 }
 0x27d   :  { %v1137_v20 = vrot.slane %v869_v8, 4  ;;  %v1139_v42 = vrot.slane %v964_v14, 4 }
 0x27f   :  { %v3838_v33 = vpop.f32.mrb[22].mxu0  ;;  %v3840_v19 = vpop.f32.mrb[22].mxu1 }
 0x280   :  { %1044 = vrot.lane.b32.xlu0 %v1038_v1, %s3330_s25  ;;  %996 = vrot.lane.b32.xlu1 %v958_v37, %s3329_s24  ;;  %v3844_v43 = vpop.f32.mrb[23].mxu0  ;;  %v3846_v30 = vpop.f32.mrb[23].mxu1  ;;  %v3940_v37 = vld [vmem:[%s4877_s4 + $0x5] ss:$8 sm:$0xf]  ;;  %v1072_v1 = vrot.slane %v3909_v27, %v3538_v10 }
 0x283   :  { %v974_v44 = vpop.f32.mrb[24].mxu1  ;;  %v879_v6 = vpop.f32.mrb[24].mxu0 }
 0x284   :  { %1090 = vrot.lane.b32.xlu0 %v867_v32, %s3331_s26  ;;  %1042 = vrot.lane.b32.xlu1 %v1037_v48, %s3330_s25  ;;  %v881_v61 = vpop.f32.mrb[25].mxu0  ;;  %v976_v17 = vpop.f32.mrb[25].mxu1  ;;  %v1118_v48 = vrot.slane %v3918_v54, %v3545_v13 }
 0x287   :  { %v885_v41 = vpop.f32.mrb[26].mxu0  ;;  %v980_v39 = vpop.f32.mrb[26].mxu1 }
 0x288   :  { %1094 = vrot.lane.b32.xlu0 %v962_v50, %s3331_s26  ;;  %1046 = vrot.lane.b32.xlu1 %v1039_v18, %s3330_s25  ;;  %v887_v24 = vpop.f32.mrb[27].mxu0  ;;  %v982_v47 = vpop.f32.mrb[27].mxu1 }
 0x28c   :  { %1140 = vrot.lane.b32.xlu0 %v1136_v62, %s3332_s27  ;;  %1092 = vrot.lane.b32.xlu1 %v869_v8, %s3331_s26  ;;  %v1160_v8 = vrot.slane %v3923_v55, %v3536_v9 }
 0x290   :  { %1144 = vrot.lane.b32.xlu0 %v1138_v40, %s3332_s27  ;;  %1096 = vrot.lane.b32.xlu1 %v964_v14, %s3331_s26  ;;  %v1114_v14 = vrot.slane %v3918_v54, %v3543_v12 }
 0x294   :  { %1192 = vrot.lane.b32.xlu0 %v3844_v43, %s3333_s28  ;;  %1142 = vrot.lane.b32.xlu1 %v1137_v20, %s3332_s27  ;;  %v1214_v20 = vrot.slane %v3940_v37, %v3543_v12 }
 0x298   :  { %1196 = vrot.lane.b32.xlu0 %v3846_v30, %s3333_s28  ;;  %1146 = vrot.lane.b32.xlu1 %v1139_v42, %s3332_s27  ;;  %v1218_v42 = vrot.slane %v3940_v37, %v3545_v13 }
 0x29c   :  { %1302 = vrot.lane.b32.xlu0 %v974_v44, %s3335_s30  ;;  %1194 = vrot.lane.b32.xlu1 %v3840_v19, %s3333_s28 }
 0x2a0   :  { %1252 = vrot.lane.b32.xlu0 %v879_v6, %s3334_s29  ;;  %1190 = vrot.lane.b32.xlu1 %v3838_v33, %s3333_s28 }
 0x2a4   :  { %1254 = vrot.lane.b32.xlu0 %v881_v61, %s3334_s29  ;;  %1256 = vrot.lane.b32.xlu1 %v974_v44, %s3334_s29  ;;  %v1122_v44 = vrot.slane %v3918_v54, %v3538_v10  ;;  %v4893_v54 = vrot.slane %v3940_v37, %v3538_v10 }
 0x2a8   :  { %1258 = vrot.lane.b32.xlu0 %v976_v17, %s3334_s29  ;;  %1298 = vrot.lane.b32.xlu1 %v879_v6, %s3335_s30  ;;  %v1164_v6 = vrot.slane %v3923_v55, %v3543_v12 }
 0x2ac   :  { %1362 = vrot.lane.b32.xlu0 %v887_v24, %s3336_s0  ;;  %1300 = vrot.lane.b32.xlu1 %v881_v61, %s3335_s30 }
 0x2b0   :  { %1366 = vrot.lane.b32.xlu0 %v982_v47, %s3336_s0  ;;  %1304 = vrot.lane.b32.xlu1 %v976_v17, %s3335_s30  ;;  %v3964_v17 = vld [vmem:[%s4877_s4 + $0x6] ss:$8 sm:$0xf] }
 0x2b4   :  { %1421 = vperm.xlu0 %3308, %v3407_v7   ;;  %1364 = vrot.lane.b32.xlu1 %v980_v39, %s3336_s0 }
 0x2b8   :  { %1360 = vrot.lane.b32.xlu1 %v885_v41, %s3336_s0  ;;  %3311 = vset.pattern.permute.xlu0 %v3338_v21 }
 0x2b9   :  { %1442 = vperm.xlu0 %3311, %v1410_v51  }
 0x2bc   :  { %1426 = vperm.xlu1 %3309, %v1410_v51  }
 0x2c0   :  { %3310 = vset.pattern.permute.xlu1 %v3338_v21  ;;  %v3983_v21 = vld [vmem:[%s4877_s4 + $0x7] ss:$8 sm:$0xf] }
 0x2c1   :  { %1438 = vperm.xlu1 %3310, %v3407_v7   ;;  %v1322_v27 = vrot.slane %v3983_v21, %v3543_v12 }
 0x2ea   :  { %v995_v23 = vpop.permute.xlu0 %994  ;;  %v991_v53 = vpop.permute.xlu1 %990 }
 0x2eb   :  { %v1005_v50 = vsel %vm328_vm2, 0.0, %v991_v53 }
 0x2ec   :  { %v1027_v24 = vmul.f32 %v1010_v35, %v1005_v50  ;;  %v3995_v35 = vld [vmem:[%s4877_s4 + $0x20] ss:$8 sm:$0xf] }
 0x2ee   :  { %v3883_v59 = vpop.permute.xlu0 %1040  ;;  %v993_v25 = vpop.permute.xlu1 %992  ;;  %v1031_v61 = vadd.f32 %v1027_v24, %v3838_v33 }
 0x2ef   :  { %v1055_v18 = vsel %vm380_vm3, 0.0, %v3883_v59  ;;  %v998_v41 = vsel %vm328_vm2, %v991_v53, %v993_v25  ;;  %v999_v47 = vsel %vm328_vm2, %v993_v25, %v995_v23 }
 0x2f0   :  { %v1077_v50 = vmul.f32 %v1060_v3, %v1055_v18  ;;  %v1028_v62 = vmul.f32 %v1014_v29, %v998_v41 }
 0x2f2   :  { %v3885_v2 = vpop.permute.xlu0 %1044  ;;  %v997_v38 = vpop.permute.xlu1 %996  ;;  %v1081_v24 = vadd.f32 %v1077_v50, %v1031_v61 }
 0x2f3   :  { %v1000_v53 = vsel %vm328_vm2, %v995_v23, %v997_v38  ;;  %v1029_v38 = vmul.f32 %v1018_v15, %v999_v47 }
 0x2f4   :  { %v1030_v3 = vmul.f32 %v1022_v63, %v1000_v53  ;;  %v1032_v53 = vadd.f32 %v1028_v62, %v3844_v43 }
 0x2f5   :  { %v1033_v4 = vadd.f32 %v1029_v38, %v3840_v19 }
 0x2f6   :  { %v3887_v26 = vpop.permute.xlu0 %1090  ;;  %v3889_v34 = vpop.permute.xlu1 %1042  ;;  %v1034_v61 = vadd.f32 %v1030_v3, %v3846_v30 }
 0x2f7   :  { %v1105_v47 = vsel %vm432_vm4, 0.0, %v3887_v26  ;;  %v1048_v25 = vsel %vm380_vm3, %v3883_v59, %v3889_v34  ;;  %v1049_v15 = vsel %vm380_vm3, %v3889_v34, %v3885_v2 }
 0x2f8   :  { %v1127_v34 = vmul.f32 %v1110_v16, %v1105_v47  ;;  %v1078_v62 = vmul.f32 %v1064_v22, %v1048_v25  ;;  %v1079_v50 = vmul.f32 %v1068_v56, %v1049_v15 }
 0x2fa   :  { %v3891_v28 = vpop.permute.xlu0 %1094  ;;  %v3893_v57 = vpop.permute.xlu1 %1046  ;;  %v1131_v56 = vadd.f32 %v1127_v34, %v1081_v24 }
 0x2fb   :  { %v1050_v41 = vsel %vm380_vm3, %v3885_v2, %v3893_v57 }
 0x2fc   :  { %v1080_v38 = vmul.f32 %v1072_v1, %v1050_v41  ;;  %v4895_v41 = vrot.slane %v3940_v37, %v3536_v9 }
 0x2fe   :  { %v3895_v49 = vpop.permute.xlu0 %1140  ;;  %v3897_v36 = vpop.permute.xlu1 %1092  ;;  %v1084_v25 = vadd.f32 %v1080_v38, %v1034_v61  ;;  %v4897_v38 = vrot.slane %v3964_v17, %v3545_v13 }
 0x2ff   :  { %v1155_v59 = vsel %vm484_vm5, 0.0, %v3895_v49  ;;  %v1098_v33 = vsel %vm432_vm4, %v3887_v26, %v3897_v36  ;;  %v1099_v43 = vsel %vm432_vm4, %v3897_v36, %v3891_v28 }
 0x300   :  { %v1177_v23 = vmul.f32 %v1160_v8, %v1155_v59  ;;  %v1128_v36 = vmul.f32 %v1114_v14, %v1098_v33  ;;  %v1129_v39 = vmul.f32 %v1118_v48, %v1099_v43 }
 0x302   :  { %v3899_v7 = vpop.permute.xlu0 %1144  ;;  %v3901_v58 = vpop.permute.xlu1 %1096 }
 0x303   :  { %v1100_v63 = vsel %vm432_vm4, %v3891_v28, %v3901_v58 }
 0x304   :  { %v1130_v1 = vmul.f32 %v1122_v44, %v1100_v63 }
 0x306   :  { %v3911_v5 = vpop.permute.xlu0 %1192  ;;  %v3913_v11 = vpop.permute.xlu1 %1142 }
 0x307   :  { %v1148_v30 = vsel %vm484_vm5, %v3895_v49, %v3913_v11  ;;  %v1149_v16 = vsel %vm484_vm5, %v3913_v11, %v3899_v7  ;;  %v1082_v11 = vadd.f32 %v1078_v62, %v1032_v53 }
 0x309   :  { %v1132_v3 = vadd.f32 %v1128_v36, %v1082_v11  ;;  %v4901_v11 = vrot.slane %v3983_v21, %v3538_v10 }
 0x30a   :  { %v3942_v31 = vpop.permute.xlu0 %1196  ;;  %v3944_v32 = vpop.permute.xlu1 %1146 }
 0x30b   :  { %v1205_v22 = vsel %vm536_vm6, %v3942_v31, 0.0  ;;  %v1150_v28 = vsel %vm484_vm5, %v3899_v7, %v3944_v32  ;;  %v1181_v7 = vadd.f32 %v1177_v23, %v1131_v56  ;;  %v4892_v32 = vrot.slane %v3923_v55, %v3545_v13 }
 0x30c   :  { %v1230_v44 = vmul.f32 %v4893_v54, %v1205_v22  ;;  %v1134_v23 = vadd.f32 %v1130_v1, %v1084_v25  ;;  %v1380_v25 = vrot.slane %v3995_v35, %v3536_v9 }
 0x30e   :  { %v3974_v40 = vpop.permute.xlu0 %1302  ;;  %v1195_v51 = vpop.permute.xlu1 %1194  ;;  %v1238_v61 = vrot.slane %v1230_v44, 4 }
 0x30f   :  { %v1199_v2 = vsel %vm536_vm6, %v3911_v5, %v1195_v51  ;;  %v1200_v26 = vsel %vm536_vm6, %v1195_v51, %v3942_v31  ;;  %v1083_v51 = vadd.f32 %v1079_v50, %v1033_v4  ;;  %v1178_v31 = vmul.f32 %v1164_v6, %v1148_v30 }
 0x310   :  { %v1228_v58 = vmul.f32 %v1214_v20, %v1199_v2  ;;  %v1229_v8 = vmul.f32 %v1218_v42, %v1200_v26  ;;  %v1179_v20 = vmul.f32 %v4892_v32, %v1149_v16  ;;  %v4898_v16 = vrot.slane %v3964_v17, %v3538_v10 }
 0x311   :  { %v1133_v4 = vadd.f32 %v1129_v39, %v1083_v51  ;;  %v1182_v53 = vadd.f32 %v1178_v31, %v1132_v3 }
 0x312   :  { %v4008_v29 = vpop.permute.xlu0 %1252  ;;  %v1191_v18 = vpop.permute.xlu1 %1190  ;;  %v1237_v15 = vrot.slane %v1229_v8, 4 }
 0x313   :  { %v1198_v49 = vsel %vm536_vm6, %v1191_v18, %v3911_v5  ;;  %v4894_v5 = vrot.slane %v3923_v55, %v3538_v10  ;;  %v1236_v18 = vrot.slane %v1228_v58, 4  ;;  %v1183_v43 = vadd.f32 %v1179_v20, %v1133_v4 }
 0x314   :  { %v1227_v6 = vmul.f32 %v4895_v41, %v1198_v49  ;;  %v4903_v4 = vrot.slane %v3995_v35, %v3538_v10 }
 0x315   :  { %v1180_v42 = vmul.f32 %v4894_v5, %v1150_v28  ;;  %v1244_v62 = vadd.f32 %v1236_v18, %v1182_v53  ;;  %v1245_v36 = vadd.f32 %v1237_v15, %v1183_v43 }
 0x316   :  { %v1255_v57 = vpop.permute.xlu0 %1254  ;;  %v1257_v19 = vpop.permute.xlu1 %1256  ;;  %v1235_v2 = vrot.slane %v1227_v6, 4 }
 0x317   :  { %v1261_v47 = vsel %vm588_vm7, %v1255_v57, %v1257_v19  ;;  %v1184_v37 = vadd.f32 %v1180_v42, %v1134_v23  ;;  %v1260_v30 = vsel %vm588_vm7, %v4008_v29, %v1255_v57  ;;  %v4900_v29 = vrot.slane %v3983_v21, %v3545_v13 }
 0x318   :  { %v1243_v31 = vadd.f32 %v1235_v2, %v1181_v7 }
 0x31a   :  { %v1259_v14 = vpop.permute.xlu0 %1258  ;;  %v1299_v48 = vpop.permute.xlu1 %1298 }
 0x31b   :  { %v1262_v33 = vsel %vm588_vm7, %v1257_v19, %v1259_v14  ;;  %v1267_v59 = vsel %vm588_vm7, %v1259_v14, 0.0  ;;  %v4896_v19 = vrot.slane %v3964_v17, %v3543_v12 }
 0x31c   :  { %v1291_v26 = vmul.f32 %v4897_v38, %v1262_v33  ;;  %v1292_v22 = vmul.f32 %v4898_v16, %v1267_v59  ;;  %v4905_v33 = vrot.slane %v3995_v35, %v3545_v13 }
 0x31d   :  { %v1290_v50 = vmul.f32 %v4896_v19, %v1261_v47 }
 0x31e   :  { %v1301_v63 = vpop.permute.xlu1 %1300  ;;  %v1363_v24 = vpop.permute.xlu0 %1362  ;;  %v1295_v54 = vadd.f32 %v1291_v26, %v1245_v36 }
 0x31f   :  { %v1306_v55 = vsel %vm640_vm8, %v1299_v48, %v1301_v63  ;;  %v1307_v39 = vsel %vm640_vm8, %v1301_v63, %v3974_v40  ;;  %v1246_v48 = vadd.f32 %v1238_v61, %v1184_v37  ;;  %v1294_v20 = vadd.f32 %v1290_v50, %v1244_v62 }
 0x320   :  { %v1336_v34 = vmul.f32 %v1322_v27, %v1307_v39  ;;  %v4899_v27 = vrot.slane %v3983_v21, %v3536_v9 }
 0x321   :  { %v1296_v44 = vadd.f32 %v1292_v22, %v1246_v48 }
 0x322   :  { %v1335_v28 = vmul.f32 %v4899_v27, %v1306_v55  ;;  %v1305_v58 = vpop.permute.xlu1 %1304  ;;  %v1367_v56 = vpop.permute.xlu0 %1366  ;;  %v1344_v1 = vrot.slane %v1336_v34, 4 }
 0x323   :  { %v1308_v8 = vsel %vm640_vm8, %v3974_v40, %v1305_v58  ;;  %v1313_v49 = vsel %vm640_vm8, %v1305_v58, 0.0  ;;  %v1375_v14 = vsel %vm692_vm9, %v1367_v56, 0.0  ;;  %v4902_v40 = vrot.slane %v3964_v17, %v3536_v9 }
 0x324   :  { %v1337_v57 = vmul.f32 %v4900_v29, %v1308_v8  ;;  %v1338_v51 = vmul.f32 %v4901_v11, %v1313_v49  ;;  %v1400_v18 = vmul.f32 %v4903_v4, %v1375_v14  ;;  %v1343_v21 = vrot.slane %v1335_v28, 4  ;;  %v2145_v29 = vld [vmem:[%s4878_s3 + $0x80] sm:$0xff] }
 0x325   :  { %v1289_v32 = vmul.f32 %v4902_v40, %v1260_v30  ;;  %v1352_v41 = vadd.f32 %v1344_v1, %v1294_v20  ;;  %v4904_v17 = vrot.slane %v3995_v35, %v3543_v12  ;;  %v2178_v40 = vld [vmem:[%s4878_s3 + $0x188] sm:$0xff] }
 0x326   :  { %v1345_v5 = vrot.slane %v1337_v57, 4  ;;  %v1346_v42 = vrot.slane %v1338_v51, 4  ;;  %v1365_v3 = vpop.permute.xlu1 %1364 }
 0x327   :  { %v1369_v6 = vsel %vm692_vm9, %v1363_v24, %v1365_v3  ;;  %v1370_v7 = vsel %vm692_vm9, %v1365_v3, %v1367_v56  ;;  %v1293_v53 = vadd.f32 %v1289_v32, %v1243_v31  ;;  %v2146_v31 = vld [vmem:[%s4878_s3 + $0x88] sm:$0xff] }
 0x328   :  { %v1353_v23 = vadd.f32 %v1345_v5, %v1295_v54  ;;  %v1354_v15 = vadd.f32 %v1346_v42, %v1296_v44  ;;  %v1398_v47 = vmul.f32 %v4904_v17, %v1369_v6  ;;  %v1399_v63 = vmul.f32 %v4905_v33, %v1370_v7  ;;  %v2129_v6 = vld [vmem:[%s4878_s3] sm:$0xff] }
 0x329   :  { %v1351_v37 = vadd.f32 %v1343_v21, %v1293_v53  ;;  %v3203_v21 = vpack.c.bf16 %v2146_v31, %v2145_v29  ;;  %v2161_v33 = vld [vmem:[%s4878_s3 + $0x100] sm:$0xff]  ;;  %v2147_v53 = vld [vmem:[%s4878_s3 + $0x90] sm:$0xff]  ;;  %v2184_v29 = vld [vmem:[%s4878_s3 + $0x1b8] sm:$0xff] }
 0x32a   :  { %v1402_v59 = vadd.f32 %v1398_v47, %v1352_v41  ;;  %v1403_v55 = vadd.f32 %v1399_v63, %v1353_v23  ;;  %v1404_v39 = vadd.f32 %v1400_v18, %v1354_v15  ;;  %v1361_v43 = vpop.permute.xlu1 %1360  ;;  %v2130_v47 = vld [vmem:[%s4878_s3 + $0x8] sm:$0xff]  ;;  %v2136_v31 = vld [vmem:[%s4878_s3 + $0x38] sm:$0xff] }
 0x32b   :  { %v1368_v61 = vsel %vm692_vm9, %v1361_v43, %v1363_v24  ;;  %v2162_v63 = vld [vmem:[%s4878_s3 + $0x108] sm:$0xff]  ;;  %v1461_v43 = vld [vmem:[%s4875_s1 + $0x70] sm:$0xff] }
 0x32c   :  { %1406 = vst [vmem:[#allocation2 + $0x28] sm:$0xf] %v1402_v59  ;;  %1407 = vst [vmem:[#allocation2 + $0x30] sm:$0xf] %v1403_v55  ;;  %v1397_v34 = vmul.f32 %v1380_v25, %v1368_v61  ;;  %v2148_v59 = vld [vmem:[%s4878_s3 + $0x98] sm:$0xff]  ;;  %v2179_v55 = vld [vmem:[%s4878_s3 + $0x190] sm:$0xff]  ;;  %v3205_v61 = vpack.c.bf16 %v2130_v47, %v2129_v6 }
 0x32d   :  { %1408 = vst [vmem:[#allocation2 + $0x38] sm:$0xf] %v1404_v39  ;;  %v2180_v39 = vld [vmem:[%s4878_s3 + $0x198] sm:$0xff] }
 0x32e   :  { %v1401_v62 = vadd.f32 %v1397_v34, %v1351_v37  ;;  %v3237_v37 = vpack.c.bf16 %v2162_v63, %v2161_v33  ;;  %v2131_v34 = vld [vmem:[%s4878_s3 + $0x10] sm:$0xff]  ;;  %v2156_v47 = vld [vmem:[%s4878_s3 + $0xd8] sm:$0xff] }
 0x32f   :  { %v2187_v33 = vld [vmem:[%s4878_s3 + $0x1d0] sm:$0xff]  ;;  %v2188_v63 = vld [vmem:[%s4878_s3 + $0x1d8] sm:$0xff] }
 0x330   :  { %1405 = vst [vmem:[#allocation2 + $0x20] sm:$0xf] %v1401_v62  ;;  %v2132_v62 = vld [vmem:[%s4878_s3 + $0x18] sm:$0xff] }
 0x333   :  { %v1422_v2 = vpop.permute.xlu0 %1421  ;;  %v1416_v19 = vld [vmem:[#allocation2 + $0x28] sm:$0xf]  ;;  %v1417_v35 = vld [vmem:[#allocation2 + $0x30] sm:$0xf] }
 0x334   :  { %v1418_v26 = vld [vmem:[#allocation2 + $0x38] sm:$0xf]  ;;  %v1429_v1 = vmul.f32 %v1422_v2, %v3793_v46  ;;  %v1430_v8 = vmul.f32 %v1422_v2, %v3787_v60  ;;  %v1431_v49 = vmul.f32 %v1422_v2, %v3789_v45  ;;  %v1432_v14 = vmul.f32 %v1422_v2, %v3783_v52  ;;  %v2177_v45 = vld [vmem:[%s4878_s3 + $0x180] sm:$0xff]  ;;  %v2163_v2 = vld [vmem:[%s4878_s3 + $0x110] sm:$0xff] }
 0x335   :  { %v3235_v41 = vpack.c.bf16 %v2178_v40, %v2177_v45  ;;  %v2167_v45 = vld [vmem:[%s4878_s3 + $0x130] sm:$0xff]  ;;  %v2168_v40 = vld [vmem:[%s4878_s3 + $0x138] sm:$0xff] }
 0x336   :  { %v3249_v18 = vpack.c.bf16 %v2168_v40, %v2167_v45 }
 0x337   :  { %v1415_v38 = vld [vmem:[#allocation2 + $0x20] sm:$0xf] }
 0x338   :  { %v1443_v36 = vpop.permute.xlu0 %1442 }
 0x33b   :  { %v1427_v50 = vpop.permute.xlu1 %1426 }
 0x33c   :  { %v1433_v30 = vmul.f32 %v1427_v50, %v1415_v38  ;;  %v1434_v16 = vmul.f32 %v1427_v50, %v1416_v19  ;;  %v1435_v22 = vmul.f32 %v1427_v50, %v1417_v35  ;;  %v1436_v27 = vmul.f32 %v1427_v50, %v1418_v26  ;;  %v2164_v19 = vld [vmem:[%s4878_s3 + $0x118] sm:$0xff]  ;;  %v2149_v35 = vld [vmem:[%s4878_s3 + $0xa0] sm:$0xff]  ;;  %v2150_v26 = vld [vmem:[%s4878_s3 + $0xa8] sm:$0xff] }
 0x33d   :  { %v3207_v50 = vpack.c.bf16 %v2148_v59, %v2147_v53  ;;  %v3239_v38 = vpack.c.bf16 %v2180_v39, %v2179_v55  ;;  %v1465_v53 = vld [vmem:[%s4875_s1 + $0x90] sm:$0xf] }
 0x33e   :  { %v1449_v28 = vadd.f32 %v1443_v36, %v1433_v30  ;;  %v1450_v24 = vadd.f32 %v1443_v36, %v1434_v16  ;;  %v1451_v58 = vadd.f32 %v1443_v36, %v1435_v22  ;;  %v1452_v56 = vadd.f32 %v1443_v36, %v1436_v27  ;;  %v2181_v36 = vld [vmem:[%s4878_s3 + $0x1a0] sm:$0xff]  ;;  %v2182_v30 = vld [vmem:[%s4878_s3 + $0x1a8] sm:$0xff]  ;;  %v1462_v16 = vld [vmem:[%s4875_s1 + $0x78] sm:$0xff] }
 0x33f   :  { %v3209_v22 = vpack.c.bf16 %v2132_v62, %v2131_v34  ;;  %v3241_v27 = vpack.c.bf16 %v2164_v19, %v2163_v2  ;;  %v2139_v39 = vld [vmem:[%s4878_s3 + $0x50] sm:$0xff]  ;;  %v3255_v34 = vpack.c.bf16 %v2188_v63, %v2187_v33  ;;  %v2172_v62 = vld [vmem:[%s4878_s3 + $0x158] sm:$0xff]  ;;  %v2157_v2 = vld [vmem:[%s4878_s3 + $0xe0] sm:$0xff] }
 0x340   :  { %v1439_v48 = vpop.permute.xlu1 %1438  ;;  %v1457_v32 = vmax.f32 %v1449_v28, 0.0  ;;  %v1458_v20 = vmax.f32 %v1450_v24, 0.0  ;;  %v1459_v54 = vmax.f32 %v1451_v58, 0.0  ;;  %v1460_v44 = vmax.f32 %v1452_v56, 0.0  ;;  %v2133_v28 = vld [vmem:[%s4878_s3 + $0x20] sm:$0xff]  ;;  %v2134_v24 = vld [vmem:[%s4878_s3 + $0x28] sm:$0xff] }
 0x341   :  { %v1445_v57 = vadd.f32 %v1439_v48, %v1429_v1  ;;  %v1446_v11 = vadd.f32 %v1439_v48, %v1430_v8  ;;  %v1447_v51 = vadd.f32 %v1439_v48, %v1431_v49  ;;  %v1448_v25 = vadd.f32 %v1439_v48, %v1432_v14  ;;  %v2165_v58 = vld [vmem:[%s4878_s3 + $0x120] sm:$0xff]  ;;  %v2166_v56 = vld [vmem:[%s4878_s3 + $0x128] sm:$0xff]  ;;  %v2151_v49 = vld [vmem:[%s4878_s3 + $0xb0] sm:$0xff] }
 0x342   :  { %v3211_v1 = vpack.c.bf16 %v2150_v26, %v2149_v35  ;;  %v3243_v8 = vpack.c.bf16 %v2182_v30, %v2181_v36  ;;  %v2152_v14 = vld [vmem:[%s4878_s3 + $0xb8] sm:$0xff]  ;;  %v2183_v48 = vld [vmem:[%s4878_s3 + $0x1b0] sm:$0xff]  ;;  %v2158_v19 = vld [vmem:[%s4878_s3 + $0xe8] sm:$0xff] }
 0x343   :  { %v1453_v5 = vmax.f32 %v1445_v57, 0.0  ;;  %v1454_v42 = vmax.f32 %v1446_v11, 0.0  ;;  %v1455_v3 = vmax.f32 %v1447_v51, 0.0  ;;  %v1456_v4 = vmax.f32 %v1448_v25, 0.0  ;;  %v1463_v57 = vld [vmem:[%s4875_s1 + $0x80] sm:$0xff]  ;;  %v2135_v25 = vld [vmem:[%s4878_s3 + $0x30] sm:$0xff] }
 0x344   :  { %v3213_v11 = vpack.c.bf16 %v2134_v24, %v2133_v28  ;;  %v3245_v51 = vpack.c.bf16 %v2166_v56, %v2165_v58  ;;  %v3227_v36 = vpack.c.bf16 %v2158_v19, %v2157_v2  ;;  %v2141_v30 = vld [vmem:[%s4878_s3 + $0x60] sm:$0xff]  ;;  %v2160_v28 = vld [vmem:[%s4878_s3 + $0xf8] sm:$0xff]  ;;  %v2191_v24 = vld [vmem:[%s4878_s3 + $0x1f0] sm:$0xff] }
 0x345   :  { %v3194_v7 = vpack.c.bf16 %v1457_v32, %v1453_v5  ;;  %v3200_v23 = vpack.c.bf16 %v1459_v54, %v1455_v3  ;;  %v3191_v15 = vpack.c.bf16 %v1458_v20, %v1454_v42  ;;  %v3197_v17 = vpack.c.bf16 %v1460_v44, %v1456_v4  ;;  %v2153_v54 = vld [vmem:[%s4878_s3 + $0xc0] sm:$0xff]  ;;  %v2154_v44 = vld [vmem:[%s4878_s3 + $0xc8] sm:$0xff]  ;;  %v2192_v58 = vld [vmem:[%s4878_s3 + $0x1f8] sm:$0xff] }
 0x346   :  { %v3215_v32 = vpack.c.bf16 %v2152_v14, %v2151_v49  ;;  %v3247_v20 = vpack.c.bf16 %v2184_v29, %v2183_v48  ;;  %v2185_v5 = vld [vmem:[%s4878_s3 + $0x1c0] sm:$0xff]  ;;  %v2186_v42 = vld [vmem:[%s4878_s3 + $0x1c8] sm:$0xff]  ;;  %v3217_v4 = vpack.c.bf16 %v2136_v31, %v2135_v25  ;;  %v3219_v6 = vpack.c.bf16 %v2154_v44, %v2153_v54  ;;  %v2143_v49 = vld [vmem:[%s4878_s3 + $0x70] sm:$0xff] }
 0x347   :  { %3193 = vmatprep.subr.msk.bf16.mxu0 %vm4145_vm13, %v3191_v15  ;;  %3199 = vmatprep.subr.msk.bf16.mxu1 %vm4145_vm13, %v3197_v17  ;;  %v1464_v3 = vld [vmem:[%s4875_s1 + $0x88] sm:$0xff]  ;;  %v2155_v17 = vld [vmem:[%s4878_s3 + $0xd0] sm:$0xff]  ;;  %v2144_v14 = vld [vmem:[%s4878_s3 + $0x78] sm:$0xff]  ;;  %v3263_v48 = vpack.c.bf16 %v2192_v58, %v2191_v24 }
 0x348   :  { %3196 = vmatpush1.bf16.msk.msra.mxu0 %vm4145_vm13, %v3194_v7  ;;  %3202 = vmatpush1.bf16.msk.msra.mxu1 %vm4145_vm13, %v3200_v23  ;;  %v3251_v7 = vpack.c.bf16 %v2186_v42, %v2185_v5  ;;  %v2169_v23 = vld [vmem:[%s4878_s3 + $0x140] sm:$0xff]  ;;  %v2170_v15 = vld [vmem:[%s4878_s3 + $0x148] sm:$0xff]  ;;  %v2175_v29 = vld [vmem:[%s4878_s3 + $0x170] sm:$0xff] }
 0x349   :  { %3204 = vmatprep.subr.bf16.mxu0 %v3203_v21  ;;  %3236 = vmatprep.subr.bf16.mxu1 %v3235_v41  ;;  %v2137_v21 = vld [vmem:[%s4878_s3 + $0x40] sm:$0xff]  ;;  %v2138_v41 = vld [vmem:[%s4878_s3 + $0x48] sm:$0xff]  ;;  %v3253_v55 = vpack.c.bf16 %v2170_v15, %v2169_v23  ;;  %v2123_v25 = vld [vmem:[#allocation2 + $0x10] sm:$0xff] }
 0x34a   :  { %v3221_v59 = vpack.c.bf16 %v2138_v41, %v2137_v21 }
 0x34b   :  { %3001 = vmatmul.mubr.msk.f32.vlgmr.msra.gmra.mrb[28].mxu0 %vm1466_vm14, %v1461_v43  ;;  %3008 = vmatmul.mubr.msk.f32.vlgmr.msra.gmra.mrb[28].mxu1 %vm1466_vm14, %v1461_v43  ;;  %v2140_v43 = vld [vmem:[%s4878_s3 + $0x58] sm:$0xff] }
 0x34c   :  { %3206 = vmatpush3.bf16.msra.mxu0 %v3205_v61  ;;  %3238 = vmatpush3.bf16.msra.mxu1 %v3237_v37  ;;  %v2171_v61 = vld [vmem:[%s4878_s3 + $0x150] sm:$0xff]  ;;  %v3223_v37 = vpack.c.bf16 %v2156_v47, %v2155_v17  ;;  %v3225_v35 = vpack.c.bf16 %v2140_v43, %v2139_v39 }
 0x34d   :  { %1565 = vmatprep.mubr.f32.mxu0 %v4891_v0  ;;  %1660 = vmatprep.mubr.f32.mxu1 %v4891_v0  ;;  %v3257_v26 = vpack.c.bf16 %v2172_v62, %v2171_v61 }
 0x34e   :  { %3208 = vmatprep.subr.bf16.mxu0 %v3207_v50  ;;  %3240 = vmatprep.subr.bf16.mxu1 %v3239_v38  ;;  %v2189_v50 = vld [vmem:[%s4878_s3 + $0x1e0] sm:$0xff]  ;;  %v2190_v38 = vld [vmem:[%s4878_s3 + $0x1e8] sm:$0xff] }
 0x34f   :  { %3002 = vmatmul.mubr.msk.f32.gmra.mrb[30].mxu0 %vm1466_vm14, %v1462_v16  ;;  %3009 = vmatmul.mubr.msk.f32.gmra.mrb[30].mxu1 %vm1466_vm14, %v1462_v16  ;;  %v2142_v16 = vld [vmem:[%s4878_s3 + $0x68] sm:$0xff] }
 0x350   :  { %3210 = vmatpush3.bf16.msra.mxu0 %v3209_v22  ;;  %3242 = vmatpush3.bf16.msra.mxu1 %v3241_v27  ;;  %v2173_v22 = vld [vmem:[%s4878_s3 + $0x160] sm:$0xff]  ;;  %v2159_v27 = vld [vmem:[%s4878_s3 + $0xf0] sm:$0xff]  ;;  %v3229_v56 = vpack.c.bf16 %v2142_v16, %v2141_v30 }
 0x351   :  { %1571 = vmatprep.mubr.f32.mxu0 %v4891_v0  ;;  %1666 = vmatprep.mubr.f32.mxu1 %v4891_v0 }
 0x352   :  { %3212 = vmatprep.subr.bf16.mxu0 %v3211_v1  ;;  %3244 = vmatprep.subr.bf16.mxu1 %v3243_v8  ;;  %v3231_v8 = vpack.c.bf16 %v2160_v28, %v2159_v27 }
 0x353   :  { %3003 = vmatmul.mubr.msk.f32.gmra.mrb[32].mxu0 %vm1466_vm14, %v1463_v57  ;;  %3010 = vmatmul.mubr.msk.f32.gmra.mrb[32].mxu1 %vm1466_vm14, %v1463_v57  ;;  %v2176_v57 = vld [vmem:[%s4878_s3 + $0x178] sm:$0xff] }
 0x354   :  { %3214 = vmatpush3.bf16.msra.mxu0 %v3213_v11  ;;  %3246 = vmatpush3.bf16.msra.mxu1 %v3245_v51  ;;  %v3233_v11 = vpack.c.bf16 %v2144_v14, %v2143_v49  ;;  %v3265_v51 = vpack.c.bf16 %v2176_v57, %v2175_v29  ;;  %v4459_v29 = vld [vmem:[%s4877_s4 + $0x3] ss:$8 sm:$0xf] }
 0x355   :  { %1577 = vmatprep.mubr.f32.mxu0 %v4891_v0  ;;  %1672 = vmatprep.mubr.f32.mxu1 %v4891_v0 }
 0x356   :  { %3216 = vmatprep.subr.bf16.mxu0 %v3215_v32  ;;  %3248 = vmatprep.subr.bf16.mxu1 %v3247_v20 }
 0x357   :  { %3004 = vmatmul.mubr.msk.f32.gmra.mrb[34].mxu0 %vm1466_vm14, %v1464_v3  ;;  %3011 = vmatmul.mubr.msk.f32.gmra.mrb[34].mxu1 %vm1466_vm14, %v1464_v3 }
 0x358   :  { %3218 = vmatpush3.bf16.msra.mxu0 %v3217_v4  ;;  %3250 = vmatpush3.bf16.msra.mxu1 %v3249_v18 }
 0x359   :  { %1583 = vmatprep.mubr.f32.mxu0 %v4891_v0  ;;  %1678 = vmatprep.mubr.f32.mxu1 %v4891_v0 }
 0x35a   :  { %3220 = vmatprep.subr.bf16.mxu0 %v3219_v6  ;;  %3252 = vmatprep.subr.bf16.mxu1 %v3251_v7 }
 0x35b   :  { %3005 = vmatmul.mubr.msk.f32.gmra.mrb[36].mxu0 %vm1466_vm14, %v1465_v53  ;;  %3012 = vmatmul.mubr.msk.f32.gmra.mrb[36].mxu1 %vm1466_vm14, %v1465_v53 }
 0x35c   :  { %3222 = vmatpush3.bf16.msra.mxu0 %v3221_v59  ;;  %2257 = vmatprep.mubr.f32.mxu0 %v3787_v60  ;;  %v3259_v60 = vpack.c.bf16 %v2190_v38, %v2189_v50 }
 0x35d   :  { %3254 = vmatpush3.bf16.msra.mxu1 %v3253_v55  ;;  %2332 = vmatprep.mubr.f32.mxu1 %v3783_v52  ;;  %v2174_v52 = vld [vmem:[%s4878_s3 + $0x168] sm:$0xff] }
 0x35e   :  { %3224 = vmatprep.subr.bf16.mxu0 %v3223_v37  ;;  %3256 = vmatprep.subr.bf16.mxu1 %v3255_v34  ;;  %v3261_v1 = vpack.c.bf16 %v2174_v52, %v2173_v22 }
 0x360   :  { %3226 = vmatpush3.bf16.msra.mxu0 %v3225_v35 }
 0x361   :  { %3258 = vmatpush3.bf16.msra.mxu1 %v3257_v26  ;;  %3228 = vmatprep.subr.bf16.mxu0 %v3227_v36 }
 0x362   :  { %3260 = vmatprep.subr.bf16.mxu1 %v3259_v60 }
 0x364   :  { %3230 = vmatpush3.bf16.msra.mxu0 %v3229_v56 }
 0x365   :  { %3262 = vmatpush3.bf16.msra.mxu1 %v3261_v1  ;;  %3232 = vmatprep.subr.bf16.mxu0 %v3231_v8  ;;  %v1685_v1 = vld [vmem:[%s4877_s4] ss:$8 sm:$0xf]  ;;  %v4445_v8 = vld [vmem:[%s4877_s4 + $0x1] ss:$8 sm:$0xf] }
 0x366   :  { %3264 = vmatprep.subr.bf16.mxu1 %v3263_v48  ;;  %v4454_v48 = vld [vmem:[%s4877_s4 + $0x2] ss:$8 sm:$0xf]  ;;  %v1710_v57 = vrot.slane %v1685_v1, %v3536_v9 }
 0x368   :  { %3234 = vmatpush3.bf16.msra.mxu0 %v3233_v11  ;;  %v1760_v11 = vrot.slane %v4445_v8, %v3536_v9 }
 0x369   :  { %3266 = vmatpush3.bf16.msra.mxu1 %v3265_v51  ;;  %v1714_v51 = vrot.slane %v1685_v1, %v3543_v12 }
 0x36b   :  { %2258 = vmatmul.mubr.f32.vlgmr.msra.gmra.mrb[38].mxu0 %v3793_v46 }
 0x36c   :  { %2333 = vmatmul.mubr.f32.vlgmr.msra.gmra.mrb[38].mxu1 %v2123_v25  ;;  %v1718_v25 = vrot.slane %v1685_v1, %v3545_v13 }
 0x41e   :  { %v1561_v31 = vpop.f32.mrb[28].mxu0  ;;  %v1656_v45 = vpop.f32.mrb[28].mxu1 }
 0x41f   :  { %1694 = vrot.lane.b32.xlu0 %v1656_v45, %s3329_s24  ;;  %1690 = vrot.lane.b32.xlu1 %v1561_v31, %s3329_s24  ;;  %v1563_v40 = vpop.f32.mrb[29].mxu0  ;;  %v1658_v32 = vpop.f32.mrb[29].mxu1  ;;  %v1736_v20 = vrot.slane %v1561_v31, 4  ;;  %v1738_v5 = vrot.slane %v1656_v45, 4  ;;  %v1722_v31 = vrot.slane %v1685_v1, %v3538_v10  ;;  %v1764_v45 = vrot.slane %v4445_v8, %v3543_v12 }
 0x420   :  { %v1737_v41 = vrot.slane %v1563_v40, 4  ;;  %v1739_v17 = vrot.slane %v1658_v32, 4 }
 0x422   :  { %v1567_v54 = vpop.f32.mrb[30].mxu0  ;;  %v1662_v44 = vpop.f32.mrb[30].mxu1 }
 0x423   :  { %1740 = vrot.lane.b32.xlu0 %v1736_v20, %s3330_s25  ;;  %1692 = vrot.lane.b32.xlu1 %v1563_v40, %s3329_s24  ;;  %v1569_v42 = vpop.f32.mrb[31].mxu0  ;;  %v1664_v46 = vpop.f32.mrb[31].mxu1  ;;  %v1836_v63 = vrot.slane %v1567_v54, 4  ;;  %v1838_v55 = vrot.slane %v1662_v44, 4  ;;  %v1768_v40 = vrot.slane %v4445_v8, %v3545_v13 }
 0x424   :  { %v1837_v39 = vrot.slane %v1569_v42, 4  ;;  %v1839_v43 = vrot.slane %v1664_v46, 4 }
 0x426   :  { %v4377_v3 = vpop.f32.mrb[32].mxu0  ;;  %v4379_v4 = vpop.f32.mrb[32].mxu1 }
 0x427   :  { %1744 = vrot.lane.b32.xlu0 %v1738_v5, %s3330_s25  ;;  %1696 = vrot.lane.b32.xlu1 %v1658_v32, %s3329_s24  ;;  %v4383_v18 = vpop.f32.mrb[33].mxu0  ;;  %v4385_v21 = vpop.f32.mrb[33].mxu1  ;;  %v1810_v32 = vrot.slane %v4454_v48, %v3536_v9 }
 0x42a   :  { %v1579_v6 = vpop.f32.mrb[34].mxu0  ;;  %v1674_v7 = vpop.f32.mrb[34].mxu1 }
 0x42b   :  { %1742 = vrot.lane.b32.xlu1 %v1737_v41, %s3330_s25  ;;  %1790 = vrot.lane.b32.xlu0 %v1567_v54, %s3331_s26  ;;  %v1676_v23 = vpop.f32.mrb[35].mxu1  ;;  %v1581_v15 = vpop.f32.mrb[35].mxu0  ;;  %v4478_v54 = vld [vmem:[%s4877_s4 + $0x5] ss:$8 sm:$0xf]  ;;  %v1814_v41 = vrot.slane %v4454_v48, %v3543_v12 }
 0x42e   :  { %v1585_v47 = vpop.f32.mrb[36].mxu0  ;;  %v1680_v33 = vpop.f32.mrb[36].mxu1 }
 0x42f   :  { %1746 = vrot.lane.b32.xlu1 %v1739_v17, %s3330_s25  ;;  %1794 = vrot.lane.b32.xlu0 %v1662_v44, %s3331_s26  ;;  %v1587_v53 = vpop.f32.mrb[37].mxu0  ;;  %v1682_v59 = vpop.f32.mrb[37].mxu1  ;;  %v4500_v17 = vld [vmem:[%s4877_s4 + $0x6] ss:$8 sm:$0xf] }
 0x433   :  { %1840 = vrot.lane.b32.xlu0 %v1836_v63, %s3332_s27  ;;  %1792 = vrot.lane.b32.xlu1 %v1569_v42, %s3331_s26  ;;  %v1772_v42 = vrot.slane %v4445_v8, %v3538_v10  ;;  %v1872_v63 = vrot.slane %v4459_v29, %v3538_v10 }
 0x437   :  { %1844 = vrot.lane.b32.xlu0 %v1838_v55, %s3332_s27  ;;  %1796 = vrot.lane.b32.xlu1 %v1664_v46, %s3331_s26  ;;  %v1860_v46 = vrot.slane %v4459_v29, %v3536_v9 }
 0x43b   :  { %1842 = vrot.lane.b32.xlu1 %v1837_v39, %s3332_s27  ;;  %1892 = vrot.lane.b32.xlu0 %v4383_v18, %s3333_s28  ;;  %v1914_v39 = vrot.slane %v4478_v54, %v3543_v12 }
 0x43e   :  { %v3081_v61 = vpop.f32.mrb[38].mxu0 }
 0x43f   :  { %v3119_v37 = vpop.f32.mrb[38].mxu1  ;;  %1846 = vrot.lane.b32.xlu1 %v1839_v43, %s3332_s27  ;;  %1896 = vrot.lane.b32.xlu0 %v4385_v21, %s3333_s28  ;;  %v3082_v34 = vpop.f32.mrb[39].mxu0  ;;  %v1918_v43 = vrot.slane %v4478_v54, %v3545_v13 }
 0x440   :  { %v3120_v62 = vpop.f32.mrb[39].mxu1  ;;  %v3083_v2 = vadd.f32 %v3082_v34, %v3081_v61  ;;  %v4519_v34 = vld [vmem:[%s4877_s4 + $0x7] ss:$8 sm:$0xf] }
 0x441   :  { %v3121_v19 = vadd.f32 %v3120_v62, %v3119_v37 }
 0x443   :  { %v4401_v50 = vadd.f32 %v3121_v19, %v3083_v2  ;;  %1894 = vrot.lane.b32.xlu1 %v4379_v4, %s3333_s28  ;;  %2002 = vrot.lane.b32.xlu0 %v1674_v7, %s3335_s30  ;;  %v2022_v19 = vrot.slane %v4519_v34, %v3543_v12 }
 0x447   :  { %1890 = vrot.lane.b32.xlu1 %v4377_v3, %s3333_s28  ;;  %1952 = vrot.lane.b32.xlu0 %v1579_v6, %s3334_s29 }
 0x44b   :  { %1956 = vrot.lane.b32.xlu1 %v1674_v7, %s3334_s29  ;;  %1954 = vrot.lane.b32.xlu0 %v1581_v15, %s3334_s29  ;;  %v1822_v7 = vrot.slane %v4454_v48, %v3538_v10 }
 0x44f   :  { %1998 = vrot.lane.b32.xlu1 %v1579_v6, %s3335_s30  ;;  %1958 = vrot.lane.b32.xlu0 %v1676_v23, %s3334_s29  ;;  %v1818_v6 = vrot.slane %v4454_v48, %v3545_v13 }
 0x453   :  { %2000 = vrot.lane.b32.xlu1 %v1581_v15, %s3335_s30  ;;  %2062 = vrot.lane.b32.xlu0 %v1587_v53, %s3336_s0  ;;  %v1868_v15 = vrot.slane %v4459_v29, %v3545_v13  ;;  %v1922_v53 = vrot.slane %v4478_v54, %v3538_v10 }
 0x457   :  { %2004 = vrot.lane.b32.xlu1 %v1676_v23, %s3335_s30  ;;  %2066 = vrot.lane.b32.xlu0 %v1682_v59, %s3336_s0  ;;  %v1864_v23 = vrot.slane %v4459_v29, %v3543_v12 }
 0x45b   :  { %2064 = vrot.lane.b32.xlu1 %v1680_v33, %s3336_s0 }
 0x45f   :  { %2060 = vrot.lane.b32.xlu1 %v1585_v47, %s3336_s0 }
 0x491   :  { %v1695_v38 = vpop.permute.xlu0 %1694  ;;  %v1691_v35 = vpop.permute.xlu1 %1690 }
 0x492   :  { %v1705_v5 = vsel %vm328_vm2, 0.0, %v1691_v35 }
 0x493   :  { %v1727_v59 = vmul.f32 %v1710_v57, %v1705_v5 }
 0x495   :  { %v4419_v26 = vpop.permute.xlu0 %1740  ;;  %v1693_v36 = vpop.permute.xlu1 %1692  ;;  %v1731_v2 = vadd.f32 %v1727_v59, %v4377_v3 }
 0x496   :  { %v1755_v47 = vsel %vm380_vm3, 0.0, %v4419_v26  ;;  %v1698_v33 = vsel %vm328_vm2, %v1691_v35, %v1693_v36  ;;  %v1699_v55 = vsel %vm328_vm2, %v1693_v36, %v1695_v38  ;;  %v4531_v36 = vld [vmem:[%s4877_s4 + $0x20] ss:$8 sm:$0xf] }
 0x497   :  { %v1777_v1 = vmul.f32 %v1760_v11, %v1755_v47  ;;  %v1728_v8 = vmul.f32 %v1714_v51, %v1698_v33 }
 0x499   :  { %v4421_v30 = vpop.permute.xlu0 %1744  ;;  %v1697_v16 = vpop.permute.xlu1 %1696  ;;  %v1781_v59 = vadd.f32 %v1777_v1, %v1731_v2 }
 0x49a   :  { %v1700_v62 = vsel %vm328_vm2, %v1695_v38, %v1697_v16  ;;  %v1729_v16 = vmul.f32 %v1718_v25, %v1699_v55  ;;  %vm2662_vm2 = vcmask 982016  }
 0x49b   :  { %v1730_v11 = vmul.f32 %v1722_v31, %v1700_v62  ;;  %v1732_v62 = vadd.f32 %v1728_v8, %v4383_v18 }
 0x49c   :  { %v1733_v33 = vadd.f32 %v1729_v16, %v4379_v4 }
 0x49d   :  { %v4423_v22 = vpop.permute.xlu1 %1742  ;;  %v4425_v60 = vpop.permute.xlu0 %1790  ;;  %v1734_v2 = vadd.f32 %v1730_v11, %v4385_v21 }
 0x49e   :  { %v1748_v55 = vsel %vm380_vm3, %v4419_v26, %v4423_v22  ;;  %v1805_v5 = vsel %vm432_vm4, 0.0, %v4425_v60  ;;  %v1749_v25 = vsel %vm380_vm3, %v4423_v22, %v4421_v30 }
 0x49f   :  { %v1778_v22 = vmul.f32 %v1764_v45, %v1748_v55  ;;  %v1827_v1 = vmul.f32 %v1810_v32, %v1805_v5  ;;  %v1779_v8 = vmul.f32 %v1768_v40, %v1749_v25  ;;  %v4908_v5 = vrot.slane %v4478_v54, %v3536_v9 }
 0x4a1   :  { %v4427_v52 = vpop.permute.xlu1 %1746  ;;  %v4429_v27 = vpop.permute.xlu0 %1794  ;;  %v1831_v32 = vadd.f32 %v1827_v1, %v1781_v59 }
 0x4a2   :  { %v1750_v26 = vsel %vm380_vm3, %v4421_v30, %v4427_v52 }
 0x4a3   :  { %v1780_v16 = vmul.f32 %v1772_v42, %v1750_v26  ;;  %v4909_v26 = vrot.slane %v4500_v17, %v3543_v12 }
 0x4a5   :  { %v4431_v28 = vpop.permute.xlu0 %1840  ;;  %v4433_v24 = vpop.permute.xlu1 %1792 }
 0x4a6   :  { %v1855_v35 = vsel %vm484_vm5, 0.0, %v4431_v28  ;;  %v1798_v3 = vsel %vm432_vm4, %v4425_v60, %v4433_v24  ;;  %v1799_v18 = vsel %vm432_vm4, %v4433_v24, %v4429_v27 }
 0x4a7   :  { %v1877_v38 = vmul.f32 %v1860_v46, %v1855_v35  ;;  %v1828_v24 = vmul.f32 %v1814_v41, %v1798_v3  ;;  %v1829_v57 = vmul.f32 %v1818_v6, %v1799_v18  ;;  %v1784_v35 = vadd.f32 %v1780_v16, %v1734_v2 }
 0x4a8   :  { %v4910_v2 = vrot.slane %v4500_v17, %v3545_v13 }
 0x4a9   :  { %v4435_v58 = vpop.permute.xlu0 %1844  ;;  %v4437_v56 = vpop.permute.xlu1 %1796 }
 0x4aa   :  { %v1800_v31 = vsel %vm432_vm4, %v4429_v27, %v4437_v56  ;;  %vm2678_vm4 = vcmask 973824  }
 0x4ab   :  { %v1830_v42 = vmul.f32 %v1822_v7, %v1800_v31 }
 0x4ad   :  { %v4447_v49 = vpop.permute.xlu1 %1842  ;;  %v4449_v14 = vpop.permute.xlu0 %1892 }
 0x4ae   :  { %v1848_v21 = vsel %vm484_vm5, %v4431_v28, %v4447_v49  ;;  %v1849_v45 = vsel %vm484_vm5, %v4447_v49, %v4435_v58  ;;  %v1782_v49 = vadd.f32 %v1778_v22, %v1732_v62 }
 0x4b0   :  { %v1832_v7 = vadd.f32 %v1828_v24, %v1782_v49 }
 0x4b1   :  { %v4473_v20 = vpop.permute.xlu1 %1846  ;;  %v4480_v44 = vpop.permute.xlu0 %1896 }
 0x4b2   :  { %v1850_v40 = vsel %vm484_vm5, %v4435_v58, %v4473_v20  ;;  %v1905_v27 = vsel %vm536_vm6, %v4480_v44, 0.0  ;;  %v1878_v58 = vmul.f32 %v1864_v23, %v1848_v21  ;;  %v1881_v20 = vadd.f32 %v1877_v38, %v1831_v32 }
 0x4b3   :  { %v1880_v48 = vmul.f32 %v1872_v63, %v1850_v40  ;;  %v1834_v38 = vadd.f32 %v1830_v42, %v1784_v35  ;;  %v4914_v32 = vrot.slane %v4519_v34, %v3538_v10 }
 0x4b4   :  { %v1882_v63 = vadd.f32 %v1878_v58, %v1832_v7 }
 0x4b5   :  { %v1895_v61 = vpop.permute.xlu1 %1894  ;;  %v4514_v37 = vpop.permute.xlu0 %2002  ;;  %v1884_v3 = vadd.f32 %v1880_v48, %v1834_v38  ;;  %v4916_v48 = vrot.slane %v4531_v36, %v3538_v10 }
 0x4b6   :  { %v1899_v30 = vsel %vm536_vm6, %v4449_v14, %v1895_v61  ;;  %v1900_v60 = vsel %vm536_vm6, %v1895_v61, %v4480_v44  ;;  %v1783_v61 = vadd.f32 %v1779_v8, %v1733_v33  ;;  %v1879_v44 = vmul.f32 %v1868_v15, %v1849_v45 }
 0x4b7   :  { %v1928_v56 = vmul.f32 %v1914_v39, %v1899_v30  ;;  %v1929_v46 = vmul.f32 %v1918_v43, %v1900_v60 }
 0x4b8   :  { %v1833_v39 = vadd.f32 %v1829_v57, %v1783_v61 }
 0x4b9   :  { %v1891_v51 = vpop.permute.xlu1 %1890  ;;  %v4544_v47 = vpop.permute.xlu0 %1952  ;;  %v1936_v43 = vrot.slane %v1928_v56, 4  ;;  %v1937_v11 = vrot.slane %v1929_v46, 4  ;;  %v2080_v46 = vrot.slane %v4531_v36, %v3536_v9 }
 0x4ba   :  { %v1898_v28 = vsel %vm536_vm6, %v1891_v51, %v4449_v14  ;;  %v1930_v14 = vmul.f32 %v1922_v53, %v1905_v27  ;;  %v1883_v55 = vadd.f32 %v1879_v44, %v1833_v39 }
 0x4bb   :  { %v1927_v23 = vmul.f32 %v4908_v5, %v1898_v28  ;;  %v1944_v59 = vadd.f32 %v1936_v43, %v1882_v63 }
 0x4bc   :  { %v1938_v54 = vrot.slane %v1930_v14, 4  ;;  %v1945_v1 = vadd.f32 %v1937_v11, %v1883_v55 }
 0x4bd   :  { %v1957_v52 = vpop.permute.xlu1 %1956  ;;  %v1955_v4 = vpop.permute.xlu0 %1954  ;;  %v1935_v62 = vrot.slane %v1927_v23, 4  ;;  %v4918_v23 = vrot.slane %v4531_v36, %v3545_v13 }
 0x4be   :  { %v1961_v51 = vsel %vm588_vm7, %v1955_v4, %v1957_v52  ;;  %v1960_v30 = vsel %vm588_vm7, %v4544_v47, %v1955_v4  ;;  %v1946_v56 = vadd.f32 %v1938_v54, %v1884_v3  ;;  %v4913_v47 = vrot.slane %v4519_v34, %v3545_v13 }
 0x4bf   :  { %v1990_v18 = vmul.f32 %v4909_v26, %v1961_v51  ;;  %v1943_v28 = vadd.f32 %v1935_v62, %v1881_v20  ;;  %v4671_v62 = vld [vmem:[%s4876_s2 + $0x8] sm:$0xff]  ;;  %v3340_v26 = vmov 9  }
 0x4c0   :  { %3313 = vset.pattern.permute.xlu1 %v3340_v26  ;;  %3312 = vset.pattern.permute.xlu0 %v3340_v26 }
 0x4c1   :  { %v1999_v41 = vpop.permute.xlu1 %1998  ;;  %v1959_v6 = vpop.permute.xlu0 %1958  ;;  %2354 = vperm.xlu1 %3313, %v4671_v62  }
 0x4c2   :  { %v1962_v15 = vsel %vm588_vm7, %v1957_v52, %v1959_v6  ;;  %v1967_v25 = vsel %vm588_vm7, %v1959_v6, 0.0  ;;  %v4911_v52 = vrot.slane %v4500_v17, %v3538_v10  ;;  %v1994_v6 = vadd.f32 %v1990_v18, %v1944_v59  ;;  %v4676_v18 = vld [vmem:[%s4876_s2] sm:$0xff] }
 0x4c3   :  { %v1991_v22 = vmul.f32 %v4910_v2, %v1962_v15  ;;  %2349 = vperm.xlu0 %3312, %v4676_v18   ;;  %v3341_v2 = vmov 5   ;;  %vm2734_vm7 = vcmask 162816  }
 0x4c4   :  { %v1992_v8 = vmul.f32 %v4911_v52, %v1967_v25 }
 0x4c5   :  { %v2001_v33 = vpop.permute.xlu1 %2000  ;;  %v2063_v29 = vpop.permute.xlu0 %2062  ;;  %v1995_v49 = vadd.f32 %v1991_v22, %v1945_v1  ;;  %3314 = vset.pattern.permute.xlu1 %v3341_v2  ;;  %v3342_v22 = vmov 6  }
 0x4c6   :  { %v2006_v53 = vsel %vm640_vm8, %v1999_v41, %v2001_v33  ;;  %v2007_v57 = vsel %vm640_vm8, %v2001_v33, %v4514_v37  ;;  %v1996_v61 = vadd.f32 %v1992_v8, %v1946_v56  ;;  %2448 = vperm.xlu1 %3314, %v4676_v18  }
 0x4c7   :  { %v2036_v31 = vmul.f32 %v2022_v19, %v2007_v57  ;;  %v4912_v19 = vrot.slane %v4519_v34, %v3536_v9  ;;  %3315 = vset.pattern.permute.xlu0 %v3341_v2  ;;  %v4781_v2 = vld [vmem:[%s4881_s5 + $0x5] ss:$0 sm:$0xff] }
 0x4c8   :  { %2453 = vperm.xlu0 %3315, %v4671_v62  }
 0x4c9   :  { %v2035_v16 = vmul.f32 %v4912_v19, %v2006_v53  ;;  %v2005_v60 = vpop.permute.xlu1 %2004  ;;  %v2067_v24 = vpop.permute.xlu0 %2066  ;;  %v2044_v21 = vrot.slane %v2036_v31, 4 }
 0x4ca   :  { %v2008_v45 = vsel %vm640_vm8, %v4514_v37, %v2005_v60  ;;  %v2013_v40 = vsel %vm640_vm8, %v2005_v60, 0.0  ;;  %v2075_v27 = vsel %vm692_vm9, %v2067_v24, 0.0  ;;  %v4915_v37 = vrot.slane %v4500_v17, %v3536_v9  ;;  %3316 = vset.pattern.permute.xlu1 %v3342_v22 }
 0x4cb   :  { %v2037_v4 = vmul.f32 %v4913_v47, %v2008_v45  ;;  %v2038_v42 = vmul.f32 %v4914_v32, %v2013_v40  ;;  %v2100_v14 = vmul.f32 %v4916_v48, %v2075_v27  ;;  %v2043_v34 = vrot.slane %v2035_v16, 4  ;;  %2459 = vperm.xlu1 %3316, %v4676_v18   ;;  %v2471_v48 = vld [vmem:[%s4875_s1 + $0xa0] sm:$0xff] }
 0x4cc   :  { %v1989_v41 = vmul.f32 %v4915_v37, %v1960_v30  ;;  %v2052_v7 = vadd.f32 %v2044_v21, %v1994_v6  ;;  %v4917_v9 = vrot.slane %v4531_v36, %v3543_v12  ;;  %v2344_v21 = vld [vmem:[%s4875_s1 + $0xf0] sm:$0xff]  ;;  %v3343_v45 = vmov 0.0|0.0  }
 0x4cd   :  { %v2045_v35 = vrot.slane %v2037_v4, 4  ;;  %v2046_v58 = vrot.slane %v2038_v42, 4  ;;  %v2065_v44 = vpop.permute.xlu1 %2064  ;;  %3274 = vmatprep.subr.bf16.mxu0 %v3343_v45 }
 0x4ce   :  { %v2069_v39 = vsel %vm692_vm9, %v2063_v29, %v2065_v44  ;;  %v2070_v20 = vsel %vm692_vm9, %v2065_v44, %v2067_v24  ;;  %v1993_v11 = vadd.f32 %v1989_v41, %v1943_v28  ;;  %v2470_v44 = vld [vmem:[%s4875_s1 + $0x98] sm:$0xff] }
 0x4cf   :  { %v2053_v43 = vadd.f32 %v2045_v35, %v1995_v49  ;;  %v2054_v5 = vadd.f32 %v2046_v58, %v1996_v61  ;;  %v2098_v17 = vmul.f32 %v4917_v9, %v2069_v39  ;;  %v2099_v38 = vmul.f32 %v4918_v23, %v2070_v20  ;;  %2463 = vperm.xlu1 %3316, %v4671_v62  }
 0x4d0   :  { %v2051_v63 = vadd.f32 %v2043_v34, %v1993_v11  ;;  %v2473_v34 = vld [vmem:[%s4875_s1 + $0xb0] sm:$0xff]  ;;  %v3345_v39 = vmov 7  }
 0x4d1   :  { %v2102_v51 = vadd.f32 %v2098_v17, %v2052_v7  ;;  %v2103_v10 = vadd.f32 %v2099_v38, %v2053_v43  ;;  %v2104_v15 = vadd.f32 %v2100_v14, %v2054_v5  ;;  %v2061_v33 = vpop.permute.xlu1 %2060  ;;  %v2472_v14 = vld [vmem:[%s4875_s1 + $0xa8] sm:$0xff]  ;;  %v2474_v7 = vld [vmem:[%s4875_s1 + $0xb8] sm:$0xf]  ;;  %3317 = vset.pattern.permute.xlu0 %v3345_v39 }
 0x4d2   :  { %v2068_v25 = vsel %vm692_vm9, %v2061_v33, %v2063_v29  ;;  %v2343_v29 = vld [vmem:[%s4875_s1 + $0xe8] sm:$0xff] }
 0x4d3   :  { %v2110_v53 = vrot.slane %v2102_v51, 4  ;;  %v2111_v57 = vrot.slane %v2103_v10, 4  ;;  %v2112_v55 = vrot.slane %v2104_v15, 4  ;;  %v2097_v3 = vmul.f32 %v2080_v46, %v2068_v25  ;;  %3318 = vset.pattern.permute.xlu1 %v3345_v39  ;;  %v2689_v25 = vld [vmem:[%s4876_s2 + $0x10] sm:$0xf] }
 0x4d5   :  { %2118 = vst [vmem:[#allocation2 + $0x28] sm:$0xf0] %v2110_v53  ;;  %2119 = vst [vmem:[#allocation2 + $0x30] sm:$0xf0] %v2111_v57  ;;  %v2101_v12 = vadd.f32 %v2097_v3, %v2051_v63  ;;  %v3351_v63 = vmov 8  }
 0x4d6   :  { %2120 = vst [vmem:[#allocation2 + $0x38] sm:$0xf0] %v2112_v55  ;;  %v4761_v57 = vld [vmem:[%s4881_s5] ss:$0 sm:$0xff] }
 0x4d7   :  { %v2109_v54 = vrot.slane %v2101_v12, 4 }
 0x4d9   :  { %2117 = vst [vmem:[#allocation2 + $0x20] sm:$0xf0] %v2109_v54 }
 0x4dc   :  { %v2126_v13 = vld [vmem:[#allocation2 + $0x28] sm:$0xff]  ;;  %v2127_v31 = vld [vmem:[#allocation2 + $0x30] sm:$0xff] }
 0x4dd   :  { %v2128_v36 = vld [vmem:[#allocation2 + $0x38] sm:$0xff]  ;;  %2262 = vmatprep.mubr.f32.mxu0 %v2126_v13  ;;  %v4768_v13 = vld [vmem:[%s4881_s5 + $0x1] ss:$0 sm:$0xff] }
 0x4de   :  { %2337 = vmatprep.mubr.f32.mxu1 %v2128_v36 }
 0x4df   :  { %2338 = vmatmul.mubr.f32.gmra.mrb[40].mxu1 %v2127_v31 }
 0x4e0   :  { %v2125_v59 = vld [vmem:[#allocation2 + $0x20] sm:$0xff]  ;;  %3148 = vmatprep.mubr.msk.f32.mxu1 %vm380_vm3, %v2343_v29 }
 0x4e1   :  { %2263 = vmatmul.mubr.f32.gmra.mrb[40].mxu0 %v2125_v59 }
 0x4e2   :  { %3176 = vmatprep.mubr.msk.f32.mxu0 %vm3344_vm15, %v4891_v0 }
 0x540   :  { %v2355_v40 = vpop.permute.xlu1 %2354 }
 0x542   :  { %v2350_v27 = vpop.permute.xlu0 %2349 }
 0x547   :  { %v2454_v4 = vpop.permute.xlu0 %2453 }
 0x5b2   :  { %v3122_v1 = vpop.f32.mrb[40].mxu1 }
 0x5b3   :  { %v3123_v30 = vpop.f32.mrb[41].mxu1 }
 0x5b4   :  { %v3124_v52 = vadd.f32 %v3123_v30, %v3122_v1  ;;  %v3084_v8 = vpop.f32.mrb[40].mxu0 }
 0x5b5   :  { %v3085_v19 = vpop.f32.mrb[41].mxu0 }
 0x5b6   :  { %v3086_v16 = vadd.f32 %v3085_v19, %v3084_v8 }
 0x5b8   :  { %v2340_v60 = vadd.f32 %v3124_v52, %v3086_v16  ;;  %v4788_v52 = vld [vmem:[%s4881_s5 + $0x3] ss:$0 sm:$0xff] }
 0x5ba   :  { %v3267_v24 = vpack.c.bf16 %v2340_v60, %v4401_v50  ;;  %v2449_v50 = vpop.permute.xlu1 %2448 }
 0x5bc   :  { %3268 = vmatprep.subr.bf16.mxu1 %v3267_v24 }
 0x5bd   :  { %3270 = vmatpush3.bf16.msra.mxu1 %v3267_v24 }
 0x5be   :  { %3271 = vmatprep.subr.bf16.mxu1 %v3343_v45  ;;  %v2460_v56 = vpop.permute.xlu1 %2459 }
 0x5c0   :  { %3149 = vmatmul.mubr.msk.f32.vlgmr.msra.gmra.mrb[42].mxu1 %vm380_vm3, %v2344_v21 }
 0x5c1   :  { %3155 = vmatprep.mubr.msk.f32.mxu1 %vm3344_vm15, %v4891_v0 }
 0x5c2   :  { %v2464_v41 = vpop.permute.xlu1 %2463 }
 0x693   :  { %v3150_v47 = vpop.f32.mrb[42].mxu1 }
 0x694   :  { %v4693_v32 = vadd.f32 %v3150_v47, %v2355_v40  ;;  %v2429_v42 = vpop.f32.mrb[43].mxu1  ;;  %v4796_v40 = vld [vmem:[%s4881_s5 + $0x7] ss:$0 sm:$0xff] }
 0x695   :  { %v4695_v46 = vadd.f32 %v2429_v42, %v2350_v27  ;;  %v4802_v27 = vld [vmem:[%s4881_s5 + $0x6] ss:$0 sm:$0xff] }
 0x696   :  { %2439 = vst [vmem:[%s4879_s6 + $0x8] sm:$0xff] %v4693_v32  ;;  %2441 = vst [vmem:[%s4880_s7 + $0x8] sm:$0xff] %v4693_v32  ;;  %v2457_v28 = vmul.f32 %v2454_v4, %v4693_v32 }
 0x697   :  { %2438 = vst [vmem:[%s4879_s6] sm:$0xff] %v4695_v46  ;;  %2440 = vst [vmem:[%s4880_s7] sm:$0xff] %v4695_v46  ;;  %v2456_v37 = vmul.f32 %v2449_v50, %v4695_v46 }
 0x698   :  { %v2467_v6 = vadd.f32 %v2464_v41, %v2457_v28 }
 0x699   :  { %v2466_v49 = vadd.f32 %v2460_v56, %v2456_v37 }
 0x69a   :  { %v2469_v61 = vmax.f32 %v2467_v6, 0.0 }
 0x69b   :  { %v2468_v35 = vmax.f32 %v2466_v49, 0.0 }
 0x69d   :  { %v3272_v58 = vpack.c.bf16 %v2469_v61, %v2468_v35 }
 0x69f   :  { %3273 = vmatpush3.bf16.msra.mxu1 %v3272_v58 }
 0x6a2   :  { %3156 = vmatmul.mubr.msk.f32.vlgmr.msra.gmra.mrb[44].mxu1 %vm380_vm3, %v2470_v44 }
 0x6a3   :  { %3158 = vmatprep.mubr.msk.f32.mxu1 %vm3344_vm15, %v4891_v0 }
 0x6a6   :  { %3159 = vmatmul.mubr.msk.f32.gmra.mrb[46].mxu1 %vm380_vm3, %v2471_v48 }
 0x6a7   :  { %3161 = vmatprep.mubr.msk.f32.mxu1 %vm3344_vm15, %v4891_v0 }
 0x6aa   :  { %3162 = vmatmul.mubr.msk.f32.gmra.mrb[48].mxu1 %vm380_vm3, %v2472_v14 }
 0x6ab   :  { %3164 = vmatprep.mubr.msk.f32.mxu1 %vm3344_vm15, %v4891_v0 }
 0x6ae   :  { %3165 = vmatmul.mubr.msk.f32.gmra.mrb[50].mxu1 %vm380_vm3, %v2473_v34 }
 0x6af   :  { %3167 = vmatprep.mubr.msk.f32.mxu1 %vm3344_vm15, %v4891_v0 }
 0x6b2   :  { %3168 = vmatmul.mubr.msk.f32.gmra.mrb[52].mxu1 %vm380_vm3, %v2474_v7  ;;  %vm2650_vm3 = vcmask 990208  }
 0x775   :  { %v2556_v20 = vpop.f32.mrb[44].mxu1 }
 0x776   :  { %v2594_v43 = vrot.slane %v2556_v20, 4  ;;  %2582 = vrot.lane.b32.xlu0 %v2556_v20, %s3346_s23  ;;  %v3157_v5 = vpop.f32.mrb[45].mxu1 }
 0x778   :  { %2595 = vrot.lane.b32.xlu1 %v2594_v43, %s3347_s8 }
 0x779   :  { %v2561_v9 = vpop.f32.mrb[46].mxu1 }
 0x77a   :  { %v2619_v17 = vrot.slane %v2561_v9, 4  ;;  %2607 = vrot.lane.b32.xlu0 %v2561_v9, %s3348_s9  ;;  %v3160_v23 = vpop.f32.mrb[47].mxu1 }
 0x77c   :  { %2620 = vrot.lane.b32.xlu1 %v2619_v17, %s3332_s27 }
 0x77d   :  { %v2566_v38 = vpop.f32.mrb[48].mxu1 }
 0x77e   :  { %2632 = vrot.lane.b32.xlu0 %v2566_v38, %s3333_s28  ;;  %v3163_v11 = vpop.f32.mrb[49].mxu1 }
 0x781   :  { %v2571_v51 = vpop.f32.mrb[50].mxu1 }
 0x782   :  { %2659 = vrot.lane.b32.xlu0 %v2571_v51, %s3349_s10  ;;  %2647 = vrot.lane.b32.xlu1 %v2571_v51, %s3350_s11  ;;  %v3166_v10 = vpop.f32.mrb[51].mxu1 }
 0x785   :  { %v2576_v15 = vpop.f32.mrb[52].mxu1 }
 0x786   :  { %2695 = vperm.xlu0 %3317, %v4676_v18   ;;  %2700 = vperm.xlu1 %3318, %v4671_v62   ;;  %v3169_v33 = vpop.f32.mrb[53].mxu1 }
 0x787   :  { %v2730_v33 = vld [vmem:[%s4875_s1 + $0xc8] sm:$0xff] }
 0x78a   :  { %3320 = vset.pattern.permute.xlu0 %v3351_v63  ;;  %3319 = vset.pattern.permute.xlu1 %v3351_v63 }
 0x78b   :  { %2716 = vperm.xlu0 %3320, %v4671_v62   ;;  %2712 = vperm.xlu1 %3319, %v4676_v18   ;;  %v4775_v62 = vld [vmem:[%s4881_s5 + $0x2] ss:$0 sm:$0xff] }
 0x78f   :  { %2675 = vrot.lane.b32.xlu1 %v2576_v15, %s3352_s12  ;;  %v2729_v15 = vld [vmem:[%s4875_s1 + $0xc0] sm:$0xff] }
 0x790   :  { %3321 = vset.pattern.permute.xlu1 %v3345_v39  ;;  %v4812_v39 = vld [vmem:[%s4881_s5 + $0x8] ss:$0 sm:$0xff] }
 0x793   :  { %2705 = vperm.xlu1 %3321, %v2689_v25  }
 0x797   :  { %3322 = vset.pattern.permute.xlu1 %v3351_v63  ;;  %v2731_v63 = vld [vmem:[%s4875_s1 + $0xd0] sm:$0xff] }
 0x798   :  { %2720 = vperm.xlu1 %3322, %v2689_v25   ;;  %v2732_v25 = vld [vmem:[%s4875_s1 + $0xd8] sm:$0xff] }
 0x7e8   :  { %v2583_v53 = vpop.permute.xlu0 %2582 }
 0x7e9   :  { %v2586_v55 = vsel %vm2585_vm0, 0.0, %v2583_v53  ;;  %v2733_v53 = vld [vmem:[%s4875_s1 + $0xe0] sm:$0xf] }
 0x7ea   :  { %v2596_v3 = vpop.permute.xlu1 %2595  ;;  %v2591_v54 = vmul.f32 %v4761_v57, %v2586_v55 }
 0x7eb   :  { %v2598_v36 = vsel %vm779_vm10, 0.0, %v2596_v3 }
 0x7ec   :  { %v2608_v12 = vpop.permute.xlu0 %2607  ;;  %v2592_v31 = vadd.f32 %v2591_v54, %v2566_v38  ;;  %v2603_v59 = vmul.f32 %v4768_v13, %v2598_v36 }
 0x7ed   :  { %v2611_v26 = vsel %vm2610_vm1, 0.0, %v2608_v12 }
 0x7ee   :  { %v2621_v18 = vpop.permute.xlu1 %2620  ;;  %v2604_v1 = vadd.f32 %v2603_v59, %v2592_v31  ;;  %v2616_v30 = vmul.f32 %v4775_v62, %v2611_v26 }
 0x7ef   :  { %v2623_v8 = vsel %vm484_vm5, 0.0, %v2621_v18 }
 0x7f0   :  { %v2633_v29 = vpop.permute.xlu0 %2632  ;;  %v2617_v24 = vadd.f32 %v2616_v30, %v2604_v1  ;;  %v2628_v21 = vmul.f32 %v4788_v52, %v2623_v8 }
 0x7f1   :  { %v2635_v22 = vsel %vm536_vm6, %v2633_v29, 0.0 }
 0x7f2   :  { %v2640_v19 = vmul.f32 %v4781_v2, %v2635_v22  ;;  %v2629_v42 = vadd.f32 %v2628_v21, %v2617_v24 }
 0x7f4   :  { %v2660_v16 = vpop.permute.xlu0 %2659  ;;  %v2648_v60 = vpop.permute.xlu1 %2647  ;;  %v2642_v45 = vrot.slane %v2640_v19, 4 }
 0x7f5   :  { %v2663_v50 = vsel %vm2662_vm2, %v2660_v16, 0.0  ;;  %v2651_v56 = vsel %vm2650_vm3, %v2648_v60, 0.0 }
 0x7f6   :  { %v2644_v28 = vadd.f32 %v2642_v45, %v2629_v42  ;;  %v2668_v37 = vmul.f32 %v4796_v40, %v2663_v50  ;;  %v2656_v41 = vmul.f32 %v4802_v27, %v2651_v56 }
 0x7f8   :  { %v2670_v48 = vrot.slane %v2668_v37, 4  ;;  %v2657_v14 = vadd.f32 %v2656_v41, %v2644_v28 }
 0x7fa   :  { %v2672_v5 = vadd.f32 %v2670_v48, %v2657_v14 }
 0x805   :  { %v2696_v47 = vpop.permute.xlu0 %2695  ;;  %v2701_v4 = vpop.permute.xlu1 %2700 }
 0x806   :  { %v2708_v6 = vmul.f32 %v2696_v47, %v4695_v46  ;;  %v2709_v49 = vmul.f32 %v2701_v4, %v4693_v32 }
 0x80a   :  { %v2717_v61 = vpop.permute.xlu0 %2716  ;;  %v2713_v35 = vpop.permute.xlu1 %2712 }
 0x80b   :  { %v2724_v58 = vadd.f32 %v2717_v61, %v2709_v49  ;;  %v2723_v44 = vadd.f32 %v2713_v35, %v2708_v6 }
 0x80d   :  { %v2727_v34 = vmax.f32 %v2724_v58, 0.0  ;;  %v2726_v7 = vmax.f32 %v2723_v44, 0.0 }
 0x80e   :  { %v2676_v20 = vpop.permute.xlu1 %2675 }
 0x80f   :  { %v3275_v43 = vpack.c.bf16 %v2727_v34, %v2726_v7  ;;  %v2679_v46 = vsel %vm2678_vm4, %v2676_v20, 0.0 }
 0x810   :  { %v2684_v32 = vmul.f32 %v4812_v39, %v2679_v46 }
 0x811   :  { %3276 = vmatpush3.bf16.msra.mxu0 %v3275_v43 }
 0x812   :  { %v2685_v9 = vadd.f32 %v2684_v32, %v2672_v5  ;;  %3174 = vmatprep.subr.mxu0 %v4891_v0  ;;  %v2706_v17 = vpop.permute.xlu1 %2705 }
 0x814   :  { %2686 = vst [vmem:[%s4880_s7 + $0x10] sm:$0xf] %v2685_v9 }
 0x817   :  { %v2721_v38 = vpop.permute.xlu1 %2720 }
 0x81b   :  { %v2692_v23 = vld [vmem:[%s4880_s7 + $0x10] sm:$0xf] }
 0x81c   :  { %v2710_v11 = vmul.f32 %v2706_v17, %v2692_v23 }
 0x81e   :  { %v2725_v51 = vadd.f32 %v2721_v38, %v2710_v11 }
 0x820   :  { %v2728_v10 = vmax.f32 %v2725_v51, 0.0 }
 0x822   :  { %3175 = vmatpush3.msk.msra.mxu0 %vm1482_vm11, %v2728_v10 }
 0x823   :  { %3177 = vmatmul.mubr.msk.f32.vlgmr.msra.gmra.mrb[42].mxu0 %vm2734_vm7, %v2729_v15 }
 0x824   :  { %3179 = vmatprep.mubr.msk.f32.mxu0 %vm3344_vm15, %v4891_v0 }
 0x827   :  { %3180 = vmatmul.mubr.msk.f32.gmra.mrb[44].mxu0 %vm2734_vm7, %v2730_v33 }
 0x828   :  { %3182 = vmatprep.mubr.msk.f32.mxu0 %vm3344_vm15, %v4891_v0 }
 0x82b   :  { %3183 = vmatmul.mubr.msk.f32.gmra.mrb[46].mxu0 %vm2734_vm7, %v2731_v63 }
 0x82c   :  { %3185 = vmatprep.mubr.msk.f32.mxu0 %vm3344_vm15, %v4891_v0 }
 0x82f   :  { %3186 = vmatmul.mubr.msk.f32.gmra.mrb[48].mxu0 %vm2734_vm7, %v2732_v25 }
 0x830   :  { %3188 = vmatprep.mubr.msk.f32.mxu0 %vm3344_vm15, %v4891_v0 }
 0x833   :  { %3189 = vmatmul.mubr.msk.f32.gmra.mrb[50].mxu0 %vm2734_vm7, %v2733_v53 }
 0x8f6   :  { %v2819_v55 = vpop.f32.mrb[42].mxu0 }
 0x8f7   :  { %v2856_v3 = vrot.slane %v2819_v55, 4  ;;  %2845 = vrot.lane.b32.xlu0 %v2819_v55, %s3346_s23  ;;  %v3178_v12 = vpop.f32.mrb[43].mxu0 }
 0x8f9   :  { %2857 = vrot.lane.b32.xlu1 %v2856_v3, %s3347_s8 }
 0x8fa   :  { %v2824_v54 = vpop.f32.mrb[44].mxu0 }
 0x8fb   :  { %v2880_v36 = vrot.slane %v2824_v54, 4  ;;  %2869 = vrot.lane.b32.xlu0 %v2824_v54, %s3348_s9  ;;  %v3181_v31 = vpop.f32.mrb[45].mxu0 }
 0x8fd   :  { %2881 = vrot.lane.b32.xlu1 %v2880_v36, %s3332_s27 }
 0x8fe   :  { %v2829_v0 = vpop.f32.mrb[46].mxu0 }
 0x8ff   :  { %2893 = vrot.lane.b32.xlu0 %v2829_v0, %s3333_s28  ;;  %v3184_v59 = vpop.f32.mrb[47].mxu0 }
 0x902   :  { %v2834_v29 = vpop.f32.mrb[48].mxu0 }
 0x903   :  { %2919 = vrot.lane.b32.xlu0 %v2834_v29, %s3349_s10  ;;  %2908 = vrot.lane.b32.xlu1 %v2834_v29, %s3350_s11  ;;  %v3187_v26 = vpop.f32.mrb[49].mxu0 }
 0x906   :  { %v2839_v18 = vpop.f32.mrb[50].mxu0 }
 0x907   :  { %2934 = vrot.lane.b32.xlu1 %v2839_v18, %s3352_s12  ;;  %v3190_v22 = vpop.f32.mrb[51].mxu0 }
 0x969   :  { %v2846_v1 = vpop.permute.xlu0 %2845 }
 0x96a   :  { %v2848_v30 = vsel %vm2585_vm0, 0.0, %v2846_v1 }
 0x96b   :  { %v2853_v8 = vmul.f32 %v4761_v57, %v2848_v30  ;;  %v2858_v19 = vpop.permute.xlu1 %2857 }
 0x96c   :  { %v2860_v16 = vsel %vm779_vm10, 0.0, %v2858_v19 }
 0x96d   :  { %v2854_v60 = vadd.f32 %v2853_v8, %v2829_v0  ;;  %v2865_v24 = vmul.f32 %v4768_v13, %v2860_v16  ;;  %v2870_v21 = vpop.permute.xlu0 %2869 }
 0x96e   :  { %v2872_v45 = vsel %vm2610_vm1, 0.0, %v2870_v21 }
 0x96f   :  { %v2866_v50 = vadd.f32 %v2865_v24, %v2854_v60  ;;  %v2877_v56 = vmul.f32 %v4775_v62, %v2872_v45  ;;  %v2882_v47 = vpop.permute.xlu1 %2881 }
 0x970   :  { %v2884_v4 = vsel %vm484_vm5, 0.0, %v2882_v47 }
 0x971   :  { %v2878_v42 = vadd.f32 %v2877_v56, %v2866_v50  ;;  %v2889_v28 = vmul.f32 %v4788_v52, %v2884_v4  ;;  %v2894_v37 = vpop.permute.xlu0 %2893 }
 0x972   :  { %v2896_v57 = vsel %vm536_vm6, %v2894_v37, 0.0 }
 0x973   :  { %v2901_v41 = vmul.f32 %v4781_v2, %v2896_v57  ;;  %v2890_v6 = vadd.f32 %v2889_v28, %v2878_v42 }
 0x975   :  { %v2903_v49 = vrot.slane %v2901_v41, 4  ;;  %v2920_v13 = vpop.permute.xlu0 %2919  ;;  %v2909_v61 = vpop.permute.xlu1 %2908 }
 0x976   :  { %v2922_v35 = vsel %vm2662_vm2, %v2920_v13, 0.0  ;;  %v2911_v58 = vsel %vm2650_vm3, %v2909_v61, 0.0 }
 0x977   :  { %v2905_v62 = vadd.f32 %v2903_v49, %v2890_v6  ;;  %v2927_v44 = vmul.f32 %v4796_v40, %v2922_v35  ;;  %v2916_v48 = vmul.f32 %v4802_v27, %v2911_v58 }
 0x979   :  { %v2929_v14 = vrot.slane %v2927_v44, 4  ;;  %v2917_v52 = vadd.f32 %v2916_v48, %v2905_v62  ;;  %v2935_v34 = vpop.permute.xlu1 %2934 }
 0x97a   :  { %v2937_v7 = vsel %vm2678_vm4, %v2935_v34, 0.0 }
 0x97b   :  { %v2931_v20 = vadd.f32 %v2929_v14, %v2917_v52  ;;  %v2942_v2 = vmul.f32 %v4812_v39, %v2937_v7 }
 0x97d   :  { %v2943_v43 = vadd.f32 %v2942_v2, %v2931_v20 }
 0x97f   :  { %2944 = vst [vmem:[%s4880_s7 + $0x14] sm:$0xf] %v2943_v43 }

</bundles_post_ra>
